<compile_context>
chip_gen: v5e
topology: v5e:2x2
jax: 0.10.0
libtpu: 0.0.40
codegen_flags: <defaults>
</compile_context>

<pallas_src>
import jax
import jax.numpy as jnp
from jax.experimental import pallas as pl
from jax.experimental.pallas import tpu as pltpu

MARGIN = 150.0
NCE_T = 0.07
BIG = 1e30          # finite sentinel; cosine distances are bounded by [0, 2]


# ---------------------------------------------------------------------------
# in-kernel helpers (traced inside the Pallas kernel body)
# ---------------------------------------------------------------------------
def _sum_all(x2d):
    return jnp.sum(x2d, axis=(0, 1), keepdims=True)                    # (1, 1)


def _mean_all(x2d):
    return _sum_all(x2d) * (1.0 / float(x2d.shape[0] * x2d.shape[1]))


def _l2_normalize(x, axis):
    # matches F.normalize: x / max(||x||, 1e-12)  ==  x * min(rsqrt(ss), 1e12)
    ss = jnp.sum(x * x, axis=axis, keepdims=True)
    return x * jnp.minimum(jax.lax.rsqrt(ss), 1e12)


# ---------------------------------------------------------------------------
# fused kernel
# ---------------------------------------------------------------------------
def _total_loss_kernel(scores_ref, label_ref, na_ref, pa_ref, nb_ref, pb_ref, out_ref):
    scores = scores_ref[...]            # (B, C)
    label = label_ref[...]              # (B, C)
    na = na_ref[...]                    # (B, T, D)
    pa = pa_ref[...]
    nb = nb_ref[...]
    pb = pb_ref[...]
    B, T, D = pa.shape
    C = label.shape[1]

    # ----- ActionLoss: BCE(video_scores, label / label.sum(dim=1)) -----
    lab_n = label / jnp.sum(label, axis=1, keepdims=True)
    log_s = jnp.maximum(jnp.log(scores), -100.0)           # torch BCELoss clamps log at -100
    log_1ms = jnp.maximum(jnp.log(1.0 - scores), -100.0)
    loss_cls = -_mean_all(lab_n * log_s + (1.0 - lab_n) * log_1ms)      # (1, 1)

    # ----- temporal means (shared by SniCo and Abs) -----
    na_m = jnp.mean(na, axis=1)                            # (B, D)
    nb_m = jnp.mean(nb, axis=1)
    pa_m = jnp.mean(pa, axis=1)
    pb_m = jnp.mean(pb, axis=1)

    # ----- SniCoLoss: both NCE terms batched into one (2B, T+1) softmax pass -----
    qn = _l2_normalize(jnp.concatenate([na_m, nb_m], axis=0), axis=1)   # (2B, D)
    kn = _l2_normalize(jnp.concatenate([pa_m, pb_m], axis=0), axis=1)   # (2B, D)
    pbn = _l2_normalize(pb, axis=2)                        # negatives for term A
    pan = _l2_normalize(pa, axis=2)                        # negatives for term B
    inv_t = 1.0 / NCE_T
    l_pos = jnp.sum(qn * kn, axis=1, keepdims=True) * inv_t             # (2B, 1)
    l_neg_a = jnp.sum(qn[:B][:, None, :] * pbn, axis=2)                 # (B, T)
    l_neg_b = jnp.sum(qn[B:][:, None, :] * pan, axis=2)                 # (B, T)
    l_neg = jnp.concatenate([l_neg_a, l_neg_b], axis=0) * inv_t         # (2B, T)
    # cross-entropy with label 0 == logsumexp(logits) - logits[:, 0]
    m = jnp.maximum(l_pos, jnp.max(l_neg, axis=1, keepdims=True))
    lse = m + jnp.log(jnp.exp(l_pos - m) +
                      jnp.sum(jnp.exp(l_neg - m), axis=1, keepdims=True))
    ce = lse - l_pos                                                    # (2B, 1)
    loss_snico = _sum_all(ce) * (1.0 / B)                  # mean_B(ce_A) + mean_B(ce_B)

    # ----- Abs (uncertainty-modeling) loss, reusing pa_m / pb_m -----
    act_norm = jnp.sqrt(jnp.sum(pa_m * pa_m, axis=1, keepdims=True))    # (B, 1)
    bkg_norm = jnp.sqrt(jnp.sum(pb_m * pb_m, axis=1, keepdims=True))    # (B, 1)
    loss_act = jnp.maximum(MARGIN - act_norm, 0.0)
    loss_abs = _mean_all((loss_act + bkg_norm) ** 2)                    # (1, 1)

    # ----- Triplet loss: per-class anchor row-select, all VPU (no transpose / MXU) -----
    A = jnp.mean(pa, axis=2)                                            # (B, T): mean over D
    A_hat = A * jax.lax.rsqrt(jnp.sum(A * A, axis=1, keepdims=True))    # row-normalized
    mask = label == 1.0                                                 # (B, C)
    idb = jax.lax.broadcasted_iota(jnp.int32, (B, 1), 0).astype(jnp.float32)
    loss_trip = jnp.zeros((1, 1), jnp.float32)
    # TODO(synk): the PyTorch reference adds one term per class using the LAST idx of a
    # python-set iteration; for small int indices that is the largest in-class index.
    for c in range(C):                                     # C is tiny & static -> unrolled
        mask_c = mask[:, c:c + 1]                                        # (B, 1)
        count_c = jnp.sum(mask_c.astype(jnp.float32), axis=(0, 1), keepdims=True)
        last_c = jnp.max(jnp.where(mask_c, idb, -1.0), axis=(0, 1), keepdims=True)
        onehot_c = (idb == last_c).astype(jnp.float32)                   # (B, 1)
        anchor = jnp.sum(onehot_c * A_hat, axis=0, keepdims=True)        # (1, T) = A_hat[anchor]
        row = 1.0 - jnp.sum(A_hat * anchor, axis=1, keepdims=True)       # (B, 1) cosine distance
        not_self = idb != last_c
        max_d = jnp.maximum(
            0.0,
            jnp.max(jnp.where(jnp.logical_and(mask_c, not_self), row, -BIG),
                    axis=(0, 1), keepdims=True))
        min_init = jnp.max(row, axis=(0, 1), keepdims=True)
        min_d = jnp.minimum(
            min_init,
            jnp.min(jnp.where(jnp.logical_and(jnp.logical_not(mask_c), not_self),
                              row, BIG), axis=(0, 1), keepdims=True))
        contrib = jnp.where(count_c >= 2.0,
                            jnp.maximum(max_d - min_d + 0.8, 0.0),
                            jnp.zeros_like(count_c))
        loss_trip = loss_trip + contrib

    # ----- pack the four losses + weighted total into one lane-dense output row -----
    loss_total = (loss_cls + 0.01 * loss_snico
                  + 0.0005 * loss_abs + 0.005 * loss_trip)
    lane = jax.lax.broadcasted_iota(jnp.int32, (1, 128), 1)
    out_ref[...] = (jnp.where(lane == 0, loss_cls, 0.0)
                    + jnp.where(lane == 1, loss_snico, 0.0)
                    + jnp.where(lane == 2, loss_abs, 0.0)
                    + jnp.where(lane == 3, loss_trip, 0.0)
                    + jnp.where(lane == 4, loss_total, 0.0))


# ---------------------------------------------------------------------------
# wrapper
# ---------------------------------------------------------------------------
@jax.jit
def total_loss(video_scores, label, NA, PA, NB, PB):
    out = pl.pallas_call(
        _total_loss_kernel,
        out_shape=jax.ShapeDtypeStruct((1, 128), jnp.float32),
        in_specs=[pl.BlockSpec(memory_space=pltpu.MemorySpace.VMEM)] * 6,
        out_specs=pl.BlockSpec(memory_space=pltpu.MemorySpace.VMEM),
    )(video_scores, label, NA, PA, NB, PB)
    loss_cls = out[0, 0]
    loss_snico = out[0, 1]
    loss_abs = out[0, 2]
    loss_trip = out[0, 3]
    loss_total = out[0, 4]
    loss_dict = {
        'Loss/Action': loss_cls,
        'Loss/SniCo': loss_snico,
        'Loss/Abs': loss_abs,
        'Loss/Triplet': loss_trip,
        'Loss/Total': loss_total,
    }
    return loss_total, loss_dict


if __name__ == "__main__":
    key = jax.random.PRNGKey(0)
    k1, k2, k3, k4, k5 = jax.random.split(key, 5)
    B, T, D, C = 8, 8, 32, 4   # batch, temporal segments, feature dim, num classes

    NA = jax.random.normal(k1, (B, T, D), dtype=jnp.float32)
    PA = jax.random.normal(k2, (B, T, D), dtype=jnp.float32)
    NB = jax.random.normal(k3, (B, T, D), dtype=jnp.float32)
    PB = jax.random.normal(k4, (B, T, D), dtype=jnp.float32)
    video_scores = jax.nn.sigmoid(jax.random.normal(k5, (B, C), dtype=jnp.float32))

    # deterministic multi-hot labels: every row has 2 classes, every class >=2 samples
    idx = jnp.arange(B)
    label = jnp.clip(jax.nn.one_hot(idx % C, C, dtype=jnp.float32)
                     + jax.nn.one_hot((idx + 1) % C, C, dtype=jnp.float32), 0.0, 1.0)

    loss_total, loss_dict = total_loss(video_scores, label, NA, PA, NB, PB)
    jax.block_until_ready(loss_total)
    print("KERNEL_OK")
</pallas_src>

<mosaic_0001>
module attributes {stable_mosaic.version = 11 : i64} {
  func.func @_total_loss_kernel(%arg0: memref<8x4xf32, #tpu.memory_space<vmem>>, %arg1: memref<8x4xf32, #tpu.memory_space<vmem>>, %arg2: memref<8x8x32xf32, #tpu.memory_space<vmem>>, %arg3: memref<8x8x32xf32, #tpu.memory_space<vmem>>, %arg4: memref<8x8x32xf32, #tpu.memory_space<vmem>>, %arg5: memref<8x8x32xf32, #tpu.memory_space<vmem>>, %arg6: memref<1x128xf32, #tpu.memory_space<vmem>>) attributes {dimension_semantics = [], scalar_prefetch = 0 : i64, scratch_operands = 0 : i64, tpu.core_type = #tpu.core_type<tc>} {
    %c0 = arith.constant 0 : index
    %c0_0 = arith.constant 0 : index
    %0 = vector.load %arg0[%c0, %c0_0] : memref<8x4xf32, #tpu.memory_space<vmem>>, vector<8x4xf32>
    %c0_1 = arith.constant 0 : index
    %c0_2 = arith.constant 0 : index
    %1 = vector.load %arg1[%c0_1, %c0_2] : memref<8x4xf32, #tpu.memory_space<vmem>>, vector<8x4xf32>
    %c0_3 = arith.constant 0 : index
    %c0_4 = arith.constant 0 : index
    %c0_5 = arith.constant 0 : index
    %2 = vector.load %arg2[%c0_3, %c0_4, %c0_5] : memref<8x8x32xf32, #tpu.memory_space<vmem>>, vector<8x8x32xf32>
    %c0_6 = arith.constant 0 : index
    %c0_7 = arith.constant 0 : index
    %c0_8 = arith.constant 0 : index
    %3 = vector.load %arg3[%c0_6, %c0_7, %c0_8] : memref<8x8x32xf32, #tpu.memory_space<vmem>>, vector<8x8x32xf32>
    %c0_9 = arith.constant 0 : index
    %c0_10 = arith.constant 0 : index
    %c0_11 = arith.constant 0 : index
    %4 = vector.load %arg4[%c0_9, %c0_10, %c0_11] : memref<8x8x32xf32, #tpu.memory_space<vmem>>, vector<8x8x32xf32>
    %c0_12 = arith.constant 0 : index
    %c0_13 = arith.constant 0 : index
    %c0_14 = arith.constant 0 : index
    %5 = vector.load %arg5[%c0_12, %c0_13, %c0_14] : memref<8x8x32xf32, #tpu.memory_space<vmem>>, vector<8x8x32xf32>
    %cst = arith.constant dense<0.000000e+00> : vector<8xf32>
    %6 = vector.multi_reduction <add>, %1, %cst [1] : vector<8x4xf32> to vector<8xf32>
    %7 = vector.shape_cast %6 : vector<8xf32> to vector<8x1xf32>
    %8 = vector.broadcast %7 : vector<8x1xf32> to vector<8x4xf32>
    %9 = arith.divf %1, %8 : vector<8x4xf32>
    %10 = math.log %0 : vector<8x4xf32>
    %cst_15 = arith.constant -1.000000e+02 : f32
    %11 = vector.broadcast %cst_15 : f32 to vector<8x4xf32>
    %12 = arith.maximumf %10, %11 : vector<8x4xf32>
    %cst_16 = arith.constant 1.000000e+00 : f32
    %13 = vector.broadcast %cst_16 : f32 to vector<8x4xf32>
    %14 = arith.subf %13, %0 : vector<8x4xf32>
    %15 = math.log %14 : vector<8x4xf32>
    %cst_17 = arith.constant -1.000000e+02 : f32
    %16 = vector.broadcast %cst_17 : f32 to vector<8x4xf32>
    %17 = arith.maximumf %15, %16 : vector<8x4xf32>
    %18 = arith.mulf %9, %12 : vector<8x4xf32>
    %cst_18 = arith.constant 1.000000e+00 : f32
    %19 = vector.broadcast %cst_18 : f32 to vector<8x4xf32>
    %20 = arith.subf %19, %9 : vector<8x4xf32>
    %21 = arith.mulf %20, %17 : vector<8x4xf32>
    %22 = arith.addf %18, %21 : vector<8x4xf32>
    %23 = vector.shape_cast %22 : vector<8x4xf32> to vector<1x8x4xf32>
    %cst_19 = arith.constant dense<0.000000e+00> : vector<1xf32>
    %24 = vector.multi_reduction <add>, %23, %cst_19 [1, 2] : vector<1x8x4xf32> to vector<1xf32>
    %25 = vector.shape_cast %24 : vector<1xf32> to vector<1x1x1xf32>
    %26 = vector.extract %25[0, 0, 0] : f32 from vector<1x1x1xf32>
    %27 = vector.broadcast %26 : f32 to vector<1x1xf32>
    %cst_20 = arith.constant 3.125000e-02 : f32
    %28 = vector.broadcast %cst_20 : f32 to vector<1x1xf32>
    %29 = arith.mulf %27, %28 : vector<1x1xf32>
    %cst_21 = arith.constant 0.000000e+00 : f32
    %30 = vector.broadcast %cst_21 : f32 to vector<1x1xf32>
    %31 = arith.subf %30, %29 : vector<1x1xf32>
    %cst_22 = arith.constant dense<0.000000e+00> : vector<8x32xf32>
    %32 = vector.multi_reduction <add>, %2, %cst_22 [1] : vector<8x8x32xf32> to vector<8x32xf32>
    %cst_23 = arith.constant 8.000000e+00 : f32
    %33 = vector.broadcast %cst_23 : f32 to vector<8x32xf32>
    %34 = arith.divf %32, %33 : vector<8x32xf32>
    %cst_24 = arith.constant dense<0.000000e+00> : vector<8x32xf32>
    %35 = vector.multi_reduction <add>, %4, %cst_24 [1] : vector<8x8x32xf32> to vector<8x32xf32>
    %cst_25 = arith.constant 8.000000e+00 : f32
    %36 = vector.broadcast %cst_25 : f32 to vector<8x32xf32>
    %37 = arith.divf %35, %36 : vector<8x32xf32>
    %cst_26 = arith.constant dense<0.000000e+00> : vector<8x32xf32>
    %38 = vector.multi_reduction <add>, %3, %cst_26 [1] : vector<8x8x32xf32> to vector<8x32xf32>
    %cst_27 = arith.constant 8.000000e+00 : f32
    %39 = vector.broadcast %cst_27 : f32 to vector<8x32xf32>
    %40 = arith.divf %38, %39 : vector<8x32xf32>
    %cst_28 = arith.constant dense<0.000000e+00> : vector<8x32xf32>
    %41 = vector.multi_reduction <add>, %5, %cst_28 [1] : vector<8x8x32xf32> to vector<8x32xf32>
    %cst_29 = arith.constant 8.000000e+00 : f32
    %42 = vector.broadcast %cst_29 : f32 to vector<8x32xf32>
    %43 = arith.divf %41, %42 : vector<8x32xf32>
    %44 = tpu.concatenate %34, %37 in 0 : vector<8x32xf32>, vector<8x32xf32> -> vector<16x32xf32>
    %45 = arith.mulf %44, %44 : vector<16x32xf32>
    %cst_30 = arith.constant dense<0.000000e+00> : vector<16xf32>
    %46 = vector.multi_reduction <add>, %45, %cst_30 [1] : vector<16x32xf32> to vector<16xf32>
    %47 = vector.shape_cast %46 : vector<16xf32> to vector<16x1xf32>
    %48 = math.rsqrt %47 : vector<16x1xf32>
    %cst_31 = arith.constant 9.99999995E+11 : f32
    %49 = vector.broadcast %cst_31 : f32 to vector<16x1xf32>
    %50 = arith.minimumf %48, %49 : vector<16x1xf32>
    %51 = vector.broadcast %50 : vector<16x1xf32> to vector<16x32xf32>
    %52 = arith.mulf %44, %51 : vector<16x32xf32>
    %53 = tpu.concatenate %40, %43 in 0 : vector<8x32xf32>, vector<8x32xf32> -> vector<16x32xf32>
    %54 = arith.mulf %53, %53 : vector<16x32xf32>
    %cst_32 = arith.constant dense<0.000000e+00> : vector<16xf32>
    %55 = vector.multi_reduction <add>, %54, %cst_32 [1] : vector<16x32xf32> to vector<16xf32>
    %56 = vector.shape_cast %55 : vector<16xf32> to vector<16x1xf32>
    %57 = math.rsqrt %56 : vector<16x1xf32>
    %cst_33 = arith.constant 9.99999995E+11 : f32
    %58 = vector.broadcast %cst_33 : f32 to vector<16x1xf32>
    %59 = arith.minimumf %57, %58 : vector<16x1xf32>
    %60 = vector.broadcast %59 : vector<16x1xf32> to vector<16x32xf32>
    %61 = arith.mulf %53, %60 : vector<16x32xf32>
    %62 = arith.mulf %5, %5 : vector<8x8x32xf32>
    %cst_34 = arith.constant dense<0.000000e+00> : vector<8x8xf32>
    %63 = vector.multi_reduction <add>, %62, %cst_34 [2] : vector<8x8x32xf32> to vector<8x8xf32>
    %64 = vector.shape_cast %63 : vector<8x8xf32> to vector<8x8x1xf32>
    %65 = math.rsqrt %64 : vector<8x8x1xf32>
    %cst_35 = arith.constant 9.99999995E+11 : f32
    %66 = vector.broadcast %cst_35 : f32 to vector<8x8x1xf32>
    %67 = arith.minimumf %65, %66 : vector<8x8x1xf32>
    %68 = vector.broadcast %67 : vector<8x8x1xf32> to vector<8x8x32xf32>
    %69 = arith.mulf %5, %68 : vector<8x8x32xf32>
    %70 = arith.mulf %3, %3 : vector<8x8x32xf32>
    %cst_36 = arith.constant dense<0.000000e+00> : vector<8x8xf32>
    %71 = vector.multi_reduction <add>, %70, %cst_36 [2] : vector<8x8x32xf32> to vector<8x8xf32>
    %72 = vector.shape_cast %71 : vector<8x8xf32> to vector<8x8x1xf32>
    %73 = math.rsqrt %72 : vector<8x8x1xf32>
    %cst_37 = arith.constant 9.99999995E+11 : f32
    %74 = vector.broadcast %cst_37 : f32 to vector<8x8x1xf32>
    %75 = arith.minimumf %73, %74 : vector<8x8x1xf32>
    %76 = vector.broadcast %75 : vector<8x8x1xf32> to vector<8x8x32xf32>
    %77 = arith.mulf %3, %76 : vector<8x8x32xf32>
    %78 = arith.mulf %52, %61 : vector<16x32xf32>
    %cst_38 = arith.constant dense<0.000000e+00> : vector<16xf32>
    %79 = vector.multi_reduction <add>, %78, %cst_38 [1] : vector<16x32xf32> to vector<16xf32>
    %80 = vector.shape_cast %79 : vector<16xf32> to vector<16x1xf32>
    %cst_39 = arith.constant 14.2857141 : f32
    %81 = vector.broadcast %cst_39 : f32 to vector<16x1xf32>
    %82 = arith.mulf %80, %81 : vector<16x1xf32>
    %83 = vector.extract_strided_slice %52 {offsets = [0, 0], sizes = [8, 32], strides = [1, 1]} : vector<16x32xf32> to vector<8x32xf32>
    %84 = vector.shape_cast %83 : vector<8x32xf32> to vector<8x1x32xf32>
    %85 = vector.broadcast %84 : vector<8x1x32xf32> to vector<8x8x32xf32>
    %86 = arith.mulf %85, %69 : vector<8x8x32xf32>
    %cst_40 = arith.constant dense<0.000000e+00> : vector<8x8xf32>
    %87 = vector.multi_reduction <add>, %86, %cst_40 [2] : vector<8x8x32xf32> to vector<8x8xf32>
    %88 = vector.extract_strided_slice %52 {offsets = [8, 0], sizes = [8, 32], strides = [1, 1]} : vector<16x32xf32> to vector<8x32xf32>
    %89 = vector.shape_cast %88 : vector<8x32xf32> to vector<8x1x32xf32>
    %90 = vector.broadcast %89 : vector<8x1x32xf32> to vector<8x8x32xf32>
    %91 = arith.mulf %90, %77 : vector<8x8x32xf32>
    %cst_41 = arith.constant dense<0.000000e+00> : vector<8x8xf32>
    %92 = vector.multi_reduction <add>, %91, %cst_41 [2] : vector<8x8x32xf32> to vector<8x8xf32>
    %93 = tpu.concatenate %87, %92 in 0 : vector<8x8xf32>, vector<8x8xf32> -> vector<16x8xf32>
    %cst_42 = arith.constant 14.2857141 : f32
    %94 = vector.broadcast %cst_42 : f32 to vector<16x8xf32>
    %95 = arith.mulf %93, %94 : vector<16x8xf32>
    %cst_43 = arith.constant dense<0xFF800000> : vector<16xf32>
    %96 = vector.multi_reduction <maximumf>, %95, %cst_43 [1] : vector<16x8xf32> to vector<16xf32>
    %97 = vector.shape_cast %96 : vector<16xf32> to vector<16x1xf32>
    %98 = arith.maximumf %82, %97 : vector<16x1xf32>
    %99 = arith.subf %82, %98 : vector<16x1xf32>
    %100 = math.exp %99 : vector<16x1xf32>
    %101 = vector.broadcast %98 : vector<16x1xf32> to vector<16x8xf32>
    %102 = arith.subf %95, %101 : vector<16x8xf32>
    %103 = math.exp %102 : vector<16x8xf32>
    %cst_44 = arith.constant dense<0.000000e+00> : vector<16xf32>
    %104 = vector.multi_reduction <add>, %103, %cst_44 [1] : vector<16x8xf32> to vector<16xf32>
    %105 = vector.shape_cast %104 : vector<16xf32> to vector<16x1xf32>
    %106 = arith.addf %100, %105 : vector<16x1xf32>
    %107 = math.log %106 : vector<16x1xf32>
    %108 = arith.addf %98, %107 : vector<16x1xf32>
    %109 = arith.subf %108, %82 : vector<16x1xf32>
    %110 = vector.shape_cast %109 : vector<16x1xf32> to vector<1x16x1xf32>
    %cst_45 = arith.constant dense<0.000000e+00> : vector<1xf32>
    %111 = vector.multi_reduction <add>, %110, %cst_45 [1, 2] : vector<1x16x1xf32> to vector<1xf32>
    %112 = vector.shape_cast %111 : vector<1xf32> to vector<1x1x1xf32>
    %113 = vector.extract %112[0, 0, 0] : f32 from vector<1x1x1xf32>
    %114 = vector.broadcast %113 : f32 to vector<1x1xf32>
    %cst_46 = arith.constant 1.250000e-01 : f32
    %115 = vector.broadcast %cst_46 : f32 to vector<1x1xf32>
    %116 = arith.mulf %114, %115 : vector<1x1xf32>
    %117 = arith.mulf %40, %40 : vector<8x32xf32>
    %cst_47 = arith.constant dense<0.000000e+00> : vector<8xf32>
    %118 = vector.multi_reduction <add>, %117, %cst_47 [1] : vector<8x32xf32> to vector<8xf32>
    %119 = vector.shape_cast %118 : vector<8xf32> to vector<8x1xf32>
    %120 = math.sqrt %119 : vector<8x1xf32>
    %121 = arith.mulf %43, %43 : vector<8x32xf32>
    %cst_48 = arith.constant dense<0.000000e+00> : vector<8xf32>
    %122 = vector.multi_reduction <add>, %121, %cst_48 [1] : vector<8x32xf32> to vector<8xf32>
    %123 = vector.shape_cast %122 : vector<8xf32> to vector<8x1xf32>
    %124 = math.sqrt %123 : vector<8x1xf32>
    %cst_49 = arith.constant 1.500000e+02 : f32
    %125 = vector.broadcast %cst_49 : f32 to vector<8x1xf32>
    %126 = arith.subf %125, %120 : vector<8x1xf32>
    %cst_50 = arith.constant 0.000000e+00 : f32
    %127 = vector.broadcast %cst_50 : f32 to vector<8x1xf32>
    %128 = arith.maximumf %126, %127 : vector<8x1xf32>
    %129 = arith.addf %128, %124 : vector<8x1xf32>
    %130 = arith.mulf %129, %129 : vector<8x1xf32>
    %131 = vector.shape_cast %130 : vector<8x1xf32> to vector<1x8x1xf32>
    %cst_51 = arith.constant dense<0.000000e+00> : vector<1xf32>
    %132 = vector.multi_reduction <add>, %131, %cst_51 [1, 2] : vector<1x8x1xf32> to vector<1xf32>
    %133 = vector.shape_cast %132 : vector<1xf32> to vector<1x1x1xf32>
    %134 = vector.extract %133[0, 0, 0] : f32 from vector<1x1x1xf32>
    %135 = vector.broadcast %134 : f32 to vector<1x1xf32>
    %cst_52 = arith.constant 1.250000e-01 : f32
    %136 = vector.broadcast %cst_52 : f32 to vector<1x1xf32>
    %137 = arith.mulf %135, %136 : vector<1x1xf32>
    %cst_53 = arith.constant dense<0.000000e+00> : vector<8x8xf32>
    %138 = vector.multi_reduction <add>, %3, %cst_53 [2] : vector<8x8x32xf32> to vector<8x8xf32>
    %cst_54 = arith.constant 3.200000e+01 : f32
    %139 = vector.broadcast %cst_54 : f32 to vector<8x8xf32>
    %140 = arith.divf %138, %139 : vector<8x8xf32>
    %141 = arith.mulf %140, %140 : vector<8x8xf32>
    %cst_55 = arith.constant dense<0.000000e+00> : vector<8xf32>
    %142 = vector.multi_reduction <add>, %141, %cst_55 [1] : vector<8x8xf32> to vector<8xf32>
    %143 = vector.shape_cast %142 : vector<8xf32> to vector<8x1xf32>
    %144 = math.rsqrt %143 : vector<8x1xf32>
    %145 = vector.broadcast %144 : vector<8x1xf32> to vector<8x8xf32>
    %146 = arith.mulf %140, %145 : vector<8x8xf32>
    %cst_56 = arith.constant 1.000000e+00 : f32
    %147 = vector.broadcast %cst_56 : f32 to vector<8x4xf32>
    %148 = arith.cmpf oeq, %1, %147 : vector<8x4xf32>
    %149 = tpu.iota {dimensions = array<i32: 0>} : vector<8x1xi32>
    %150 = arith.sitofp %149 : vector<8x1xi32> to vector<8x1xf32>
    %cst_57 = arith.constant 0.000000e+00 : f32
    %151 = vector.broadcast %cst_57 : f32 to vector<1x1xf32>
    %152 = vector.extract_strided_slice %148 {offsets = [0, 0], sizes = [8, 1], strides = [1, 1]} : vector<8x4xi1> to vector<8x1xi1>
    %153 = arith.extui %152 : vector<8x1xi1> to vector<8x1xi32>
    %154 = arith.sitofp %153 : vector<8x1xi32> to vector<8x1xf32>
    %155 = vector.shape_cast %154 : vector<8x1xf32> to vector<1x8x1xf32>
    %cst_58 = arith.constant dense<0.000000e+00> : vector<1xf32>
    %156 = vector.multi_reduction <add>, %155, %cst_58 [1, 2] : vector<1x8x1xf32> to vector<1xf32>
    %157 = vector.shape_cast %156 : vector<1xf32> to vector<1x1x1xf32>
    %158 = vector.extract %157[0, 0, 0] : f32 from vector<1x1x1xf32>
    %159 = vector.broadcast %158 : f32 to vector<1x1xf32>
    %cst_59 = arith.constant -1.000000e+00 : f32
    %160 = vector.broadcast %cst_59 : f32 to vector<8x1xf32>
    %161 = arith.select %152, %150, %160 : vector<8x1xi1>, vector<8x1xf32>
    %162 = vector.shape_cast %161 : vector<8x1xf32> to vector<1x8x1xf32>
    %cst_60 = arith.constant dense<0xFF800000> : vector<1xf32>
    %163 = vector.multi_reduction <maximumf>, %162, %cst_60 [1, 2] : vector<1x8x1xf32> to vector<1xf32>
    %164 = vector.shape_cast %163 : vector<1xf32> to vector<1x1x1xf32>
    %165 = vector.extract %164[0, 0, 0] : f32 from vector<1x1x1xf32>
    %166 = vector.broadcast %165 : f32 to vector<1x1xf32>
    %167 = vector.broadcast %166 : vector<1x1xf32> to vector<8x1xf32>
    %168 = arith.cmpf oeq, %150, %167 : vector<8x1xf32>
    %169 = arith.extui %168 : vector<8x1xi1> to vector<8x1xi32>
    %170 = arith.sitofp %169 : vector<8x1xi32> to vector<8x1xf32>
    %171 = vector.broadcast %170 : vector<8x1xf32> to vector<8x8xf32>
    %172 = arith.mulf %171, %146 : vector<8x8xf32>
    %cst_61 = arith.constant dense<0.000000e+00> : vector<8xf32>
    %173 = vector.multi_reduction <add>, %172, %cst_61 [0] : vector<8x8xf32> to vector<8xf32>
    %174 = vector.shape_cast %173 : vector<8xf32> to vector<1x8xf32>
    %175 = vector.broadcast %174 : vector<1x8xf32> to vector<8x8xf32>
    %176 = arith.mulf %146, %175 : vector<8x8xf32>
    %cst_62 = arith.constant dense<0.000000e+00> : vector<8xf32>
    %177 = vector.multi_reduction <add>, %176, %cst_62 [1] : vector<8x8xf32> to vector<8xf32>
    %178 = vector.shape_cast %177 : vector<8xf32> to vector<8x1xf32>
    %cst_63 = arith.constant 1.000000e+00 : f32
    %179 = vector.broadcast %cst_63 : f32 to vector<8x1xf32>
    %180 = arith.subf %179, %178 : vector<8x1xf32>
    %181 = vector.broadcast %166 : vector<1x1xf32> to vector<8x1xf32>
    %182 = arith.cmpf one, %150, %181 : vector<8x1xf32>
    %183 = arith.andi %152, %182 : vector<8x1xi1>
    %cst_64 = arith.constant -1.000000e+30 : f32
    %184 = vector.broadcast %cst_64 : f32 to vector<8x1xf32>
    %185 = arith.select %183, %180, %184 : vector<8x1xi1>, vector<8x1xf32>
    %186 = vector.shape_cast %185 : vector<8x1xf32> to vector<1x8x1xf32>
    %cst_65 = arith.constant dense<0xFF800000> : vector<1xf32>
    %187 = vector.multi_reduction <maximumf>, %186, %cst_65 [1, 2] : vector<1x8x1xf32> to vector<1xf32>
    %188 = vector.shape_cast %187 : vector<1xf32> to vector<1x1x1xf32>
    %189 = vector.extract %188[0, 0, 0] : f32 from vector<1x1x1xf32>
    %190 = vector.broadcast %189 : f32 to vector<1x1xf32>
    %cst_66 = arith.constant 0.000000e+00 : f32
    %191 = vector.broadcast %cst_66 : f32 to vector<1x1xf32>
    %192 = arith.maximumf %191, %190 : vector<1x1xf32>
    %193 = vector.shape_cast %180 : vector<8x1xf32> to vector<1x8x1xf32>
    %cst_67 = arith.constant dense<0xFF800000> : vector<1xf32>
    %194 = vector.multi_reduction <maximumf>, %193, %cst_67 [1, 2] : vector<1x8x1xf32> to vector<1xf32>
    %195 = vector.shape_cast %194 : vector<1xf32> to vector<1x1x1xf32>
    %196 = vector.extract %195[0, 0, 0] : f32 from vector<1x1x1xf32>
    %197 = vector.broadcast %196 : f32 to vector<1x1xf32>
    %cst_68 = arith.constant dense<true> : vector<8x1xi1>
    %198 = arith.xori %152, %cst_68 : vector<8x1xi1>
    %199 = arith.andi %198, %182 : vector<8x1xi1>
    %cst_69 = arith.constant 1.000000e+30 : f32
    %200 = vector.broadcast %cst_69 : f32 to vector<8x1xf32>
    %201 = arith.select %199, %180, %200 : vector<8x1xi1>, vector<8x1xf32>
    %202 = vector.shape_cast %201 : vector<8x1xf32> to vector<1x8x1xf32>
    %cst_70 = arith.constant dense<0x7F800000> : vector<1xf32>
    %203 = vector.multi_reduction <minimumf>, %202, %cst_70 [1, 2] : vector<1x8x1xf32> to vector<1xf32>
    %204 = vector.shape_cast %203 : vector<1xf32> to vector<1x1x1xf32>
    %205 = vector.extract %204[0, 0, 0] : f32 from vector<1x1x1xf32>
    %206 = vector.broadcast %205 : f32 to vector<1x1xf32>
    %207 = arith.minimumf %197, %206 : vector<1x1xf32>
    %cst_71 = arith.constant 2.000000e+00 : f32
    %208 = vector.broadcast %cst_71 : f32 to vector<1x1xf32>
    %209 = arith.cmpf oge, %159, %208 : vector<1x1xf32>
    %210 = arith.subf %192, %207 : vector<1x1xf32>
    %cst_72 = arith.constant 8.000000e-01 : f32
    %211 = vector.broadcast %cst_72 : f32 to vector<1x1xf32>
    %212 = arith.addf %210, %211 : vector<1x1xf32>
    %cst_73 = arith.constant 0.000000e+00 : f32
    %213 = vector.broadcast %cst_73 : f32 to vector<1x1xf32>
    %214 = arith.maximumf %212, %213 : vector<1x1xf32>
    %cst_74 = arith.constant 0.000000e+00 : f32
    %215 = vector.broadcast %cst_74 : f32 to vector<1x1xf32>
    %216 = arith.select %209, %214, %215 : vector<1x1xi1>, vector<1x1xf32>
    %217 = arith.addf %151, %216 : vector<1x1xf32>
    %218 = vector.extract_strided_slice %148 {offsets = [0, 1], sizes = [8, 1], strides = [1, 1]} : vector<8x4xi1> to vector<8x1xi1>
    %219 = arith.extui %218 : vector<8x1xi1> to vector<8x1xi32>
    %220 = arith.sitofp %219 : vector<8x1xi32> to vector<8x1xf32>
    %221 = vector.shape_cast %220 : vector<8x1xf32> to vector<1x8x1xf32>
    %cst_75 = arith.constant dense<0.000000e+00> : vector<1xf32>
    %222 = vector.multi_reduction <add>, %221, %cst_75 [1, 2] : vector<1x8x1xf32> to vector<1xf32>
    %223 = vector.shape_cast %222 : vector<1xf32> to vector<1x1x1xf32>
    %224 = vector.extract %223[0, 0, 0] : f32 from vector<1x1x1xf32>
    %225 = vector.broadcast %224 : f32 to vector<1x1xf32>
    %cst_76 = arith.constant -1.000000e+00 : f32
    %226 = vector.broadcast %cst_76 : f32 to vector<8x1xf32>
    %227 = arith.select %218, %150, %226 : vector<8x1xi1>, vector<8x1xf32>
    %228 = vector.shape_cast %227 : vector<8x1xf32> to vector<1x8x1xf32>
    %cst_77 = arith.constant dense<0xFF800000> : vector<1xf32>
    %229 = vector.multi_reduction <maximumf>, %228, %cst_77 [1, 2] : vector<1x8x1xf32> to vector<1xf32>
    %230 = vector.shape_cast %229 : vector<1xf32> to vector<1x1x1xf32>
    %231 = vector.extract %230[0, 0, 0] : f32 from vector<1x1x1xf32>
    %232 = vector.broadcast %231 : f32 to vector<1x1xf32>
    %233 = vector.broadcast %232 : vector<1x1xf32> to vector<8x1xf32>
    %234 = arith.cmpf oeq, %150, %233 : vector<8x1xf32>
    %235 = arith.extui %234 : vector<8x1xi1> to vector<8x1xi32>
    %236 = arith.sitofp %235 : vector<8x1xi32> to vector<8x1xf32>
    %237 = vector.broadcast %236 : vector<8x1xf32> to vector<8x8xf32>
    %238 = arith.mulf %237, %146 : vector<8x8xf32>
    %cst_78 = arith.constant dense<0.000000e+00> : vector<8xf32>
    %239 = vector.multi_reduction <add>, %238, %cst_78 [0] : vector<8x8xf32> to vector<8xf32>
    %240 = vector.shape_cast %239 : vector<8xf32> to vector<1x8xf32>
    %241 = vector.broadcast %240 : vector<1x8xf32> to vector<8x8xf32>
    %242 = arith.mulf %146, %241 : vector<8x8xf32>
    %cst_79 = arith.constant dense<0.000000e+00> : vector<8xf32>
    %243 = vector.multi_reduction <add>, %242, %cst_79 [1] : vector<8x8xf32> to vector<8xf32>
    %244 = vector.shape_cast %243 : vector<8xf32> to vector<8x1xf32>
    %cst_80 = arith.constant 1.000000e+00 : f32
    %245 = vector.broadcast %cst_80 : f32 to vector<8x1xf32>
    %246 = arith.subf %245, %244 : vector<8x1xf32>
    %247 = vector.broadcast %232 : vector<1x1xf32> to vector<8x1xf32>
    %248 = arith.cmpf one, %150, %247 : vector<8x1xf32>
    %249 = arith.andi %218, %248 : vector<8x1xi1>
    %cst_81 = arith.constant -1.000000e+30 : f32
    %250 = vector.broadcast %cst_81 : f32 to vector<8x1xf32>
    %251 = arith.select %249, %246, %250 : vector<8x1xi1>, vector<8x1xf32>
    %252 = vector.shape_cast %251 : vector<8x1xf32> to vector<1x8x1xf32>
    %cst_82 = arith.constant dense<0xFF800000> : vector<1xf32>
    %253 = vector.multi_reduction <maximumf>, %252, %cst_82 [1, 2] : vector<1x8x1xf32> to vector<1xf32>
    %254 = vector.shape_cast %253 : vector<1xf32> to vector<1x1x1xf32>
    %255 = vector.extract %254[0, 0, 0] : f32 from vector<1x1x1xf32>
    %256 = vector.broadcast %255 : f32 to vector<1x1xf32>
    %cst_83 = arith.constant 0.000000e+00 : f32
    %257 = vector.broadcast %cst_83 : f32 to vector<1x1xf32>
    %258 = arith.maximumf %257, %256 : vector<1x1xf32>
    %259 = vector.shape_cast %246 : vector<8x1xf32> to vector<1x8x1xf32>
    %cst_84 = arith.constant dense<0xFF800000> : vector<1xf32>
    %260 = vector.multi_reduction <maximumf>, %259, %cst_84 [1, 2] : vector<1x8x1xf32> to vector<1xf32>
    %261 = vector.shape_cast %260 : vector<1xf32> to vector<1x1x1xf32>
    %262 = vector.extract %261[0, 0, 0] : f32 from vector<1x1x1xf32>
    %263 = vector.broadcast %262 : f32 to vector<1x1xf32>
    %cst_85 = arith.constant dense<true> : vector<8x1xi1>
    %264 = arith.xori %218, %cst_85 : vector<8x1xi1>
    %265 = arith.andi %264, %248 : vector<8x1xi1>
    %cst_86 = arith.constant 1.000000e+30 : f32
    %266 = vector.broadcast %cst_86 : f32 to vector<8x1xf32>
    %267 = arith.select %265, %246, %266 : vector<8x1xi1>, vector<8x1xf32>
    %268 = vector.shape_cast %267 : vector<8x1xf32> to vector<1x8x1xf32>
    %cst_87 = arith.constant dense<0x7F800000> : vector<1xf32>
    %269 = vector.multi_reduction <minimumf>, %268, %cst_87 [1, 2] : vector<1x8x1xf32> to vector<1xf32>
    %270 = vector.shape_cast %269 : vector<1xf32> to vector<1x1x1xf32>
    %271 = vector.extract %270[0, 0, 0] : f32 from vector<1x1x1xf32>
    %272 = vector.broadcast %271 : f32 to vector<1x1xf32>
    %273 = arith.minimumf %263, %272 : vector<1x1xf32>
    %cst_88 = arith.constant 2.000000e+00 : f32
    %274 = vector.broadcast %cst_88 : f32 to vector<1x1xf32>
    %275 = arith.cmpf oge, %225, %274 : vector<1x1xf32>
    %276 = arith.subf %258, %273 : vector<1x1xf32>
    %cst_89 = arith.constant 8.000000e-01 : f32
    %277 = vector.broadcast %cst_89 : f32 to vector<1x1xf32>
    %278 = arith.addf %276, %277 : vector<1x1xf32>
    %cst_90 = arith.constant 0.000000e+00 : f32
    %279 = vector.broadcast %cst_90 : f32 to vector<1x1xf32>
    %280 = arith.maximumf %278, %279 : vector<1x1xf32>
    %cst_91 = arith.constant 0.000000e+00 : f32
    %281 = vector.broadcast %cst_91 : f32 to vector<1x1xf32>
    %282 = arith.select %275, %280, %281 : vector<1x1xi1>, vector<1x1xf32>
    %283 = arith.addf %217, %282 : vector<1x1xf32>
    %284 = vector.extract_strided_slice %148 {offsets = [0, 2], sizes = [8, 1], strides = [1, 1]} : vector<8x4xi1> to vector<8x1xi1>
    %285 = arith.extui %284 : vector<8x1xi1> to vector<8x1xi32>
    %286 = arith.sitofp %285 : vector<8x1xi32> to vector<8x1xf32>
    %287 = vector.shape_cast %286 : vector<8x1xf32> to vector<1x8x1xf32>
    %cst_92 = arith.constant dense<0.000000e+00> : vector<1xf32>
    %288 = vector.multi_reduction <add>, %287, %cst_92 [1, 2] : vector<1x8x1xf32> to vector<1xf32>
    %289 = vector.shape_cast %288 : vector<1xf32> to vector<1x1x1xf32>
    %290 = vector.extract %289[0, 0, 0] : f32 from vector<1x1x1xf32>
    %291 = vector.broadcast %290 : f32 to vector<1x1xf32>
    %cst_93 = arith.constant -1.000000e+00 : f32
    %292 = vector.broadcast %cst_93 : f32 to vector<8x1xf32>
    %293 = arith.select %284, %150, %292 : vector<8x1xi1>, vector<8x1xf32>
    %294 = vector.shape_cast %293 : vector<8x1xf32> to vector<1x8x1xf32>
    %cst_94 = arith.constant dense<0xFF800000> : vector<1xf32>
    %295 = vector.multi_reduction <maximumf>, %294, %cst_94 [1, 2] : vector<1x8x1xf32> to vector<1xf32>
    %296 = vector.shape_cast %295 : vector<1xf32> to vector<1x1x1xf32>
    %297 = vector.extract %296[0, 0, 0] : f32 from vector<1x1x1xf32>
    %298 = vector.broadcast %297 : f32 to vector<1x1xf32>
    %299 = vector.broadcast %298 : vector<1x1xf32> to vector<8x1xf32>
    %300 = arith.cmpf oeq, %150, %299 : vector<8x1xf32>
    %301 = arith.extui %300 : vector<8x1xi1> to vector<8x1xi32>
    %302 = arith.sitofp %301 : vector<8x1xi32> to vector<8x1xf32>
    %303 = vector.broadcast %302 : vector<8x1xf32> to vector<8x8xf32>
    %304 = arith.mulf %303, %146 : vector<8x8xf32>
    %cst_95 = arith.constant dense<0.000000e+00> : vector<8xf32>
    %305 = vector.multi_reduction <add>, %304, %cst_95 [0] : vector<8x8xf32> to vector<8xf32>
    %306 = vector.shape_cast %305 : vector<8xf32> to vector<1x8xf32>
    %307 = vector.broadcast %306 : vector<1x8xf32> to vector<8x8xf32>
    %308 = arith.mulf %146, %307 : vector<8x8xf32>
    %cst_96 = arith.constant dense<0.000000e+00> : vector<8xf32>
    %309 = vector.multi_reduction <add>, %308, %cst_96 [1] : vector<8x8xf32> to vector<8xf32>
    %310 = vector.shape_cast %309 : vector<8xf32> to vector<8x1xf32>
    %cst_97 = arith.constant 1.000000e+00 : f32
    %311 = vector.broadcast %cst_97 : f32 to vector<8x1xf32>
    %312 = arith.subf %311, %310 : vector<8x1xf32>
    %313 = vector.broadcast %298 : vector<1x1xf32> to vector<8x1xf32>
    %314 = arith.cmpf one, %150, %313 : vector<8x1xf32>
    %315 = arith.andi %284, %314 : vector<8x1xi1>
    %cst_98 = arith.constant -1.000000e+30 : f32
    %316 = vector.broadcast %cst_98 : f32 to vector<8x1xf32>
    %317 = arith.select %315, %312, %316 : vector<8x1xi1>, vector<8x1xf32>
    %318 = vector.shape_cast %317 : vector<8x1xf32> to vector<1x8x1xf32>
    %cst_99 = arith.constant dense<0xFF800000> : vector<1xf32>
    %319 = vector.multi_reduction <maximumf>, %318, %cst_99 [1, 2] : vector<1x8x1xf32> to vector<1xf32>
    %320 = vector.shape_cast %319 : vector<1xf32> to vector<1x1x1xf32>
    %321 = vector.extract %320[0, 0, 0] : f32 from vector<1x1x1xf32>
    %322 = vector.broadcast %321 : f32 to vector<1x1xf32>
    %cst_100 = arith.constant 0.000000e+00 : f32
    %323 = vector.broadcast %cst_100 : f32 to vector<1x1xf32>
    %324 = arith.maximumf %323, %322 : vector<1x1xf32>
    %325 = vector.shape_cast %312 : vector<8x1xf32> to vector<1x8x1xf32>
    %cst_101 = arith.constant dense<0xFF800000> : vector<1xf32>
    %326 = vector.multi_reduction <maximumf>, %325, %cst_101 [1, 2] : vector<1x8x1xf32> to vector<1xf32>
    %327 = vector.shape_cast %326 : vector<1xf32> to vector<1x1x1xf32>
    %328 = vector.extract %327[0, 0, 0] : f32 from vector<1x1x1xf32>
    %329 = vector.broadcast %328 : f32 to vector<1x1xf32>
    %cst_102 = arith.constant dense<true> : vector<8x1xi1>
    %330 = arith.xori %284, %cst_102 : vector<8x1xi1>
    %331 = arith.andi %330, %314 : vector<8x1xi1>
    %cst_103 = arith.constant 1.000000e+30 : f32
    %332 = vector.broadcast %cst_103 : f32 to vector<8x1xf32>
    %333 = arith.select %331, %312, %332 : vector<8x1xi1>, vector<8x1xf32>
    %334 = vector.shape_cast %333 : vector<8x1xf32> to vector<1x8x1xf32>
    %cst_104 = arith.constant dense<0x7F800000> : vector<1xf32>
    %335 = vector.multi_reduction <minimumf>, %334, %cst_104 [1, 2] : vector<1x8x1xf32> to vector<1xf32>
    %336 = vector.shape_cast %335 : vector<1xf32> to vector<1x1x1xf32>
    %337 = vector.extract %336[0, 0, 0] : f32 from vector<1x1x1xf32>
    %338 = vector.broadcast %337 : f32 to vector<1x1xf32>
    %339 = arith.minimumf %329, %338 : vector<1x1xf32>
    %cst_105 = arith.constant 2.000000e+00 : f32
    %340 = vector.broadcast %cst_105 : f32 to vector<1x1xf32>
    %341 = arith.cmpf oge, %291, %340 : vector<1x1xf32>
    %342 = arith.subf %324, %339 : vector<1x1xf32>
    %cst_106 = arith.constant 8.000000e-01 : f32
    %343 = vector.broadcast %cst_106 : f32 to vector<1x1xf32>
    %344 = arith.addf %342, %343 : vector<1x1xf32>
    %cst_107 = arith.constant 0.000000e+00 : f32
    %345 = vector.broadcast %cst_107 : f32 to vector<1x1xf32>
    %346 = arith.maximumf %344, %345 : vector<1x1xf32>
    %cst_108 = arith.constant 0.000000e+00 : f32
    %347 = vector.broadcast %cst_108 : f32 to vector<1x1xf32>
    %348 = arith.select %341, %346, %347 : vector<1x1xi1>, vector<1x1xf32>
    %349 = arith.addf %283, %348 : vector<1x1xf32>
    %350 = vector.extract_strided_slice %148 {offsets = [0, 3], sizes = [8, 1], strides = [1, 1]} : vector<8x4xi1> to vector<8x1xi1>
    %351 = arith.extui %350 : vector<8x1xi1> to vector<8x1xi32>
    %352 = arith.sitofp %351 : vector<8x1xi32> to vector<8x1xf32>
    %353 = vector.shape_cast %352 : vector<8x1xf32> to vector<1x8x1xf32>
    %cst_109 = arith.constant dense<0.000000e+00> : vector<1xf32>
    %354 = vector.multi_reduction <add>, %353, %cst_109 [1, 2] : vector<1x8x1xf32> to vector<1xf32>
    %355 = vector.shape_cast %354 : vector<1xf32> to vector<1x1x1xf32>
    %356 = vector.extract %355[0, 0, 0] : f32 from vector<1x1x1xf32>
    %357 = vector.broadcast %356 : f32 to vector<1x1xf32>
    %cst_110 = arith.constant -1.000000e+00 : f32
    %358 = vector.broadcast %cst_110 : f32 to vector<8x1xf32>
    %359 = arith.select %350, %150, %358 : vector<8x1xi1>, vector<8x1xf32>
    %360 = vector.shape_cast %359 : vector<8x1xf32> to vector<1x8x1xf32>
    %cst_111 = arith.constant dense<0xFF800000> : vector<1xf32>
    %361 = vector.multi_reduction <maximumf>, %360, %cst_111 [1, 2] : vector<1x8x1xf32> to vector<1xf32>
    %362 = vector.shape_cast %361 : vector<1xf32> to vector<1x1x1xf32>
    %363 = vector.extract %362[0, 0, 0] : f32 from vector<1x1x1xf32>
    %364 = vector.broadcast %363 : f32 to vector<1x1xf32>
    %365 = vector.broadcast %364 : vector<1x1xf32> to vector<8x1xf32>
    %366 = arith.cmpf oeq, %150, %365 : vector<8x1xf32>
    %367 = arith.extui %366 : vector<8x1xi1> to vector<8x1xi32>
    %368 = arith.sitofp %367 : vector<8x1xi32> to vector<8x1xf32>
    %369 = vector.broadcast %368 : vector<8x1xf32> to vector<8x8xf32>
    %370 = arith.mulf %369, %146 : vector<8x8xf32>
    %cst_112 = arith.constant dense<0.000000e+00> : vector<8xf32>
    %371 = vector.multi_reduction <add>, %370, %cst_112 [0] : vector<8x8xf32> to vector<8xf32>
    %372 = vector.shape_cast %371 : vector<8xf32> to vector<1x8xf32>
    %373 = vector.broadcast %372 : vector<1x8xf32> to vector<8x8xf32>
    %374 = arith.mulf %146, %373 : vector<8x8xf32>
    %cst_113 = arith.constant dense<0.000000e+00> : vector<8xf32>
    %375 = vector.multi_reduction <add>, %374, %cst_113 [1] : vector<8x8xf32> to vector<8xf32>
    %376 = vector.shape_cast %375 : vector<8xf32> to vector<8x1xf32>
    %cst_114 = arith.constant 1.000000e+00 : f32
    %377 = vector.broadcast %cst_114 : f32 to vector<8x1xf32>
    %378 = arith.subf %377, %376 : vector<8x1xf32>
    %379 = vector.broadcast %364 : vector<1x1xf32> to vector<8x1xf32>
    %380 = arith.cmpf one, %150, %379 : vector<8x1xf32>
    %381 = arith.andi %350, %380 : vector<8x1xi1>
    %cst_115 = arith.constant -1.000000e+30 : f32
    %382 = vector.broadcast %cst_115 : f32 to vector<8x1xf32>
    %383 = arith.select %381, %378, %382 : vector<8x1xi1>, vector<8x1xf32>
    %384 = vector.shape_cast %383 : vector<8x1xf32> to vector<1x8x1xf32>
    %cst_116 = arith.constant dense<0xFF800000> : vector<1xf32>
    %385 = vector.multi_reduction <maximumf>, %384, %cst_116 [1, 2] : vector<1x8x1xf32> to vector<1xf32>
    %386 = vector.shape_cast %385 : vector<1xf32> to vector<1x1x1xf32>
    %387 = vector.extract %386[0, 0, 0] : f32 from vector<1x1x1xf32>
    %388 = vector.broadcast %387 : f32 to vector<1x1xf32>
    %cst_117 = arith.constant 0.000000e+00 : f32
    %389 = vector.broadcast %cst_117 : f32 to vector<1x1xf32>
    %390 = arith.maximumf %389, %388 : vector<1x1xf32>
    %391 = vector.shape_cast %378 : vector<8x1xf32> to vector<1x8x1xf32>
    %cst_118 = arith.constant dense<0xFF800000> : vector<1xf32>
    %392 = vector.multi_reduction <maximumf>, %391, %cst_118 [1, 2] : vector<1x8x1xf32> to vector<1xf32>
    %393 = vector.shape_cast %392 : vector<1xf32> to vector<1x1x1xf32>
    %394 = vector.extract %393[0, 0, 0] : f32 from vector<1x1x1xf32>
    %395 = vector.broadcast %394 : f32 to vector<1x1xf32>
    %cst_119 = arith.constant dense<true> : vector<8x1xi1>
    %396 = arith.xori %350, %cst_119 : vector<8x1xi1>
    %397 = arith.andi %396, %380 : vector<8x1xi1>
    %cst_120 = arith.constant 1.000000e+30 : f32
    %398 = vector.broadcast %cst_120 : f32 to vector<8x1xf32>
    %399 = arith.select %397, %378, %398 : vector<8x1xi1>, vector<8x1xf32>
    %400 = vector.shape_cast %399 : vector<8x1xf32> to vector<1x8x1xf32>
    %cst_121 = arith.constant dense<0x7F800000> : vector<1xf32>
    %401 = vector.multi_reduction <minimumf>, %400, %cst_121 [1, 2] : vector<1x8x1xf32> to vector<1xf32>
    %402 = vector.shape_cast %401 : vector<1xf32> to vector<1x1x1xf32>
    %403 = vector.extract %402[0, 0, 0] : f32 from vector<1x1x1xf32>
    %404 = vector.broadcast %403 : f32 to vector<1x1xf32>
    %405 = arith.minimumf %395, %404 : vector<1x1xf32>
    %cst_122 = arith.constant 2.000000e+00 : f32
    %406 = vector.broadcast %cst_122 : f32 to vector<1x1xf32>
    %407 = arith.cmpf oge, %357, %406 : vector<1x1xf32>
    %408 = arith.subf %390, %405 : vector<1x1xf32>
    %cst_123 = arith.constant 8.000000e-01 : f32
    %409 = vector.broadcast %cst_123 : f32 to vector<1x1xf32>
    %410 = arith.addf %408, %409 : vector<1x1xf32>
    %cst_124 = arith.constant 0.000000e+00 : f32
    %411 = vector.broadcast %cst_124 : f32 to vector<1x1xf32>
    %412 = arith.maximumf %410, %411 : vector<1x1xf32>
    %cst_125 = arith.constant 0.000000e+00 : f32
    %413 = vector.broadcast %cst_125 : f32 to vector<1x1xf32>
    %414 = arith.select %407, %412, %413 : vector<1x1xi1>, vector<1x1xf32>
    %415 = arith.addf %349, %414 : vector<1x1xf32>
    %cst_126 = arith.constant 0.00999999977 : f32
    %416 = vector.broadcast %cst_126 : f32 to vector<1x1xf32>
    %417 = arith.mulf %416, %116 : vector<1x1xf32>
    %418 = arith.addf %31, %417 : vector<1x1xf32>
    %cst_127 = arith.constant 5.000000e-04 : f32
    %419 = vector.broadcast %cst_127 : f32 to vector<1x1xf32>
    %420 = arith.mulf %419, %137 : vector<1x1xf32>
    %421 = arith.addf %418, %420 : vector<1x1xf32>
    %cst_128 = arith.constant 5.000000e-03 : f32
    %422 = vector.broadcast %cst_128 : f32 to vector<1x1xf32>
    %423 = arith.mulf %422, %415 : vector<1x1xf32>
    %424 = arith.addf %421, %423 : vector<1x1xf32>
    %425 = tpu.iota {dimensions = array<i32: 1>} : vector<1x128xi32>
    %c0_i32 = arith.constant 0 : i32
    %426 = vector.broadcast %c0_i32 : i32 to vector<1x128xi32>
    %427 = arith.cmpi eq, %425, %426 : vector<1x128xi32>
    %cst_129 = arith.constant 0.000000e+00 : f32
    %428 = vector.shape_cast %31 : vector<1x1xf32> to vector<1x1xf32>
    %429 = vector.broadcast %428 : vector<1x1xf32> to vector<1x128xf32>
    %430 = vector.broadcast %cst_129 : f32 to vector<1x128xf32>
    %431 = arith.select %427, %429, %430 : vector<1x128xi1>, vector<1x128xf32>
    %c1_i32 = arith.constant 1 : i32
    %432 = vector.broadcast %c1_i32 : i32 to vector<1x128xi32>
    %433 = arith.cmpi eq, %425, %432 : vector<1x128xi32>
    %cst_130 = arith.constant 0.000000e+00 : f32
    %434 = vector.shape_cast %116 : vector<1x1xf32> to vector<1x1xf32>
    %435 = vector.broadcast %434 : vector<1x1xf32> to vector<1x128xf32>
    %436 = vector.broadcast %cst_130 : f32 to vector<1x128xf32>
    %437 = arith.select %433, %435, %436 : vector<1x128xi1>, vector<1x128xf32>
    %438 = arith.addf %431, %437 : vector<1x128xf32>
    %c2_i32 = arith.constant 2 : i32
    %439 = vector.broadcast %c2_i32 : i32 to vector<1x128xi32>
    %440 = arith.cmpi eq, %425, %439 : vector<1x128xi32>
    %cst_131 = arith.constant 0.000000e+00 : f32
    %441 = vector.shape_cast %137 : vector<1x1xf32> to vector<1x1xf32>
    %442 = vector.broadcast %441 : vector<1x1xf32> to vector<1x128xf32>
    %443 = vector.broadcast %cst_131 : f32 to vector<1x128xf32>
    %444 = arith.select %440, %442, %443 : vector<1x128xi1>, vector<1x128xf32>
    %445 = arith.addf %438, %444 : vector<1x128xf32>
    %c3_i32 = arith.constant 3 : i32
    %446 = vector.broadcast %c3_i32 : i32 to vector<1x128xi32>
    %447 = arith.cmpi eq, %425, %446 : vector<1x128xi32>
    %cst_132 = arith.constant 0.000000e+00 : f32
    %448 = vector.shape_cast %415 : vector<1x1xf32> to vector<1x1xf32>
    %449 = vector.broadcast %448 : vector<1x1xf32> to vector<1x128xf32>
    %450 = vector.broadcast %cst_132 : f32 to vector<1x128xf32>
    %451 = arith.select %447, %449, %450 : vector<1x128xi1>, vector<1x128xf32>
    %452 = arith.addf %445, %451 : vector<1x128xf32>
    %c4_i32 = arith.constant 4 : i32
    %453 = vector.broadcast %c4_i32 : i32 to vector<1x128xi32>
    %454 = arith.cmpi eq, %425, %453 : vector<1x128xi32>
    %cst_133 = arith.constant 0.000000e+00 : f32
    %455 = vector.shape_cast %424 : vector<1x1xf32> to vector<1x1xf32>
    %456 = vector.broadcast %455 : vector<1x1xf32> to vector<1x128xf32>
    %457 = vector.broadcast %cst_133 : f32 to vector<1x128xf32>
    %458 = arith.select %454, %456, %457 : vector<1x128xi1>, vector<1x128xf32>
    %459 = arith.addf %452, %458 : vector<1x128xf32>
    %c0_134 = arith.constant 0 : index
    %c0_135 = arith.constant 0 : index
    %460 = vector.load %arg6[%c0_134, %c0_135] : memref<1x128xf32, #tpu.memory_space<vmem>>, vector<1x128xf32>
    tpu.vector_store %arg6[%c0_134, %c0_135], %459 {strides = array<i32>} : memref<1x128xf32, #tpu.memory_space<vmem>>, vector<1x128xf32>,
    return
  }
}

</mosaic_0001>

<bundles_post_ra>
// kernel: total_loss.1
= control target key start
LH: loop header
LB: loop body
LE: loop exit
PB: predicated region body
PF: predicated region fallthrough
CT: control target
= control target key end

     0   :  { %11 = vsyncpa [#allocation3], 0  ;;  %s3465_s0 = inlined_call_operand.vmem [shape: f32[8,4], index: 0, kind: input, shape index: {}]   ;;  %s3466_s1 = inlined_call_operand.vmem [shape: f32[8,4], index: 1, kind: input, shape index: {}]   ;;  %s3467_s2 = inlined_call_operand.hbm [shape: f32[8,8,32], index: 2, kind: input, shape index: {}]   ;;  %s3468_s3 = inlined_call_operand.hbm [shape: f32[8,8,32], index: 3, kind: input, shape index: {}]   ;;  %s3469_s4 = inlined_call_operand.hbm [shape: f32[8,8,32], index: 4, kind: input, shape index: {}]   ;;  %s3470_s5 = inlined_call_operand.hbm [shape: f32[8,8,32], index: 5, kind: input, shape index: {}]   ;;  %s3471_s6 = inlined_call_operand.vmem [shape: f32[1,128], index: 6, kind: output, shape index: {}]  }
   0x1   :  { %12 = vsyncpa [#allocation5], 0 }
   0x2   :  { %13 = vsyncpa [#allocation8], 0  ;;  %s35_s23 = sshll.u32 %s3468_s3, 4  ;;  %s2164_s24 = smov [#allocation4]   ;;  %s36_s23 = int_to_ptr.hbm [resolvable:$true] %s35_s23 }
   0x3   :  { %s37_s25 = sshll.u32 %s2164_s24, 4  ;;  %s22_s28 = sshll.u32 %s3467_s2, 4  ;;  %s38_s25 = int_to_ptr.vmem [resolvable:$true] %s37_s25  ;;  %s23_s28 = int_to_ptr.hbm [resolvable:$true] %s22_s28 }
   0x4   :  { %s2165_s29 = smov 128   ;;  %s2166_s30 = smov 8  }
   0x5   :  { %43 = dma.hbm_to_vmem [thread:$0]  %s36_s23, 1024, %s38_s25, [#allocation5], %s2165_s29, %s2165_s29, %s2166_s30  }
   0x6   :  { %s2167_s7 = smov [#allocation2]   ;;  %s48_s11 = sshll.u32 %s3469_s4, 4  ;;  %s49_s11 = int_to_ptr.hbm [resolvable:$true] %s48_s11 }
   0x7   :  { %s24_s8 = sshll.u32 %s2167_s7, 4  ;;  %s61_s13 = sshll.u32 %s3470_s5, 4  ;;  %s25_s8 = int_to_ptr.vmem [resolvable:$true] %s24_s8  ;;  %s62_s13 = int_to_ptr.hbm [resolvable:$true] %s61_s13 }
   0x8   :  { %30 = dma.hbm_to_vmem [thread:$0]  %s23_s28, 1024, %s25_s8, [#allocation3], %s2165_s29, %s2165_s29, %s2166_s30  }
   0x9   :  { %s2168_s14 = smov [#allocation6]   ;;  %s2169_s2 = smov [#allocation7]  }
   0xa   :  { %s50_s15 = sshll.u32 %s2168_s14, 4  ;;  %s63_s16 = sshll.u32 %s2169_s2, 4  ;;  %s51_s15 = int_to_ptr.vmem [resolvable:$true] %s50_s15  ;;  %s64_s16 = int_to_ptr.vmem [resolvable:$true] %s63_s16 }
   0xb   :  { %56 = dma.hbm_to_vmem [thread:$0]  %s49_s11, 1024, %s51_s15, [#allocation5], %s2165_s29, %s2165_s29, %s2166_s30  }
   0xc   :  { %69 = dma.hbm_to_vmem [thread:$0]  %s62_s13, 1024, %s64_s16, [#allocation8], %s2165_s29, %s2165_s29, %s2166_s30  }
   0xd   :  { %2158 = dma.done.wait [#allocation3], 1024  }
   0xe   :  { %2159 = vsyncadd [#allocation3], 4294966272 }
   0xf   :  { %2160 = dma.done.wait [#allocation5], 2048  }
  0x10   :  { %2161 = vsyncadd [#allocation5], 4294965248 }
  0x11   :  { %2162 = dma.done.wait [#allocation8], 1024  }
  0x12   :  { %2163 = vsyncadd [#allocation8], 4294966272  ;;  %v2170_v0 = vmov 8.0   ;;  %v114_v2 = vld [vmem:[#allocation7 + $0x10] sm:$0xff]  ;;  %vm163_vm0 = vcmask 261120   ;;  %v2227_v3 = vld [vmem:[#allocation7] sm:$0xff] }
  0x13   :  { %1988 = vrcp.f32 %v2170_v0  ;;  %v96_v4 = vld [vmem:[#allocation4] sm:$0xff]  ;;  %v564_v6 = vmul.f32 %v114_v2, %v114_v2  ;;  %v377_v7 = vsel %vm163_vm0, %v114_v2, 0.0  ;;  %v562_v9 = vmul.f32 %v2227_v3, %v2227_v3  ;;  %v2235_v12 = vld [vmem:[#allocation7 + $0x8] sm:$0xff]  ;;  %v99_v17 = vld [vmem:[#allocation4 + $0x18] sm:$0xff]  ;;  %s2174_s22 = smov 127   ;;  %s2176_s28 = smov 126  }
  0x14   :  { %v378_v8 = vrot.slane %v377_v7, 4  ;;  %v363_v10 = vsel %vm163_vm0, %v2227_v3, 0.0  ;;  %v690_v11 = vmul.f32 %v96_v4, %v96_v4  ;;  %v2239_v16 = vsel %vm163_vm0, %v96_v4, 0.0  ;;  %v97_v35 = vld [vmem:[#allocation4 + $0x8] sm:$0xff]  ;;  %v98_v46 = vld [vmem:[#allocation4 + $0x10] sm:$0xff]  ;;  %v115_v57 = vld [vmem:[#allocation7 + $0x18] sm:$0xff] }
  0x15   :  { %v576_v14 = vsel %vm163_vm0, %v564_v6, 0.0  ;;  %v364_v15 = vrot.slane %v363_v10, 4  ;;  %3490 = vst [vmem:[#allocation12_spill] sm:$0xff] %v2239_v16  ;;  %v570_v19 = vsel %vm163_vm0, %v562_v9, 0.0  ;;  %v300_v21 = vrot.slane %v2239_v16, 4  ;;  %v88_v0 = vld [vmem:[#allocation2] sm:$0xff] }
  0x16   :  { %577 = vadd.xlane.f32.xlu0 %v576_v14  ;;  %v379_v18 = vadd.f32 %v378_v8, %v377_v7  ;;  %v698_v20 = vsel %vm163_vm0, %v690_v11, 0.0  ;;  %571 = vadd.xlane.f32.xlu1 %v570_v19  ;;  %v370_v23 = vsel %vm163_vm0, %v2235_v12, 0.0  ;;  %v563_v24 = vmul.f32 %v2235_v12, %v2235_v12  ;;  %v89_v11 = vld [vmem:[#allocation2 + $0x8] sm:$0xff]  ;;  %s2177_s10 = smov 125  }
  0x17   :  { %v365_v22 = vadd.f32 %v364_v15, %v363_v10  ;;  %699 = vadd.xlane.f32.xlu2 %v698_v20  ;;  %v301_v26 = vadd.f32 %v300_v21, %v2239_v16  ;;  %v371_v27 = vrot.slane %v370_v23, 4  ;;  %v693_v28 = vmul.f32 %v99_v17, %v99_v17  ;;  %v91_v21 = vld [vmem:[#allocation2 + $0x18] sm:$0xff] }
  0x18   :  { %v380_v25 = vrot.slane %v379_v18, 2  ;;  %v2250_v30 = vsel %vm163_vm0, %v99_v17, 0.0  ;;  %v2256_v39 = vsel %vm163_vm0, %v97_v35, 0.0  ;;  %v573_v42 = vsel %vm163_vm0, %v563_v24, 0.0  ;;  %v90_v17 = vld [vmem:[#allocation2 + $0x10] sm:$0xff] }
  0x19   :  { %v2225_v1 = vpop.eup %1988  ;;  %v366_v29 = vrot.slane %v365_v22, 2  ;;  %3491 = vst [vmem:[#allocation13_spill] sm:$0xff] %v2250_v30  ;;  %v302_v33 = vrot.slane %v301_v26, 2  ;;  %v372_v34 = vadd.f32 %v371_v27, %v370_v23  ;;  %v707_v37 = vsel %vm163_vm0, %v693_v28, 0.0  ;;  %v92_v28 = vld [vmem:[#allocation2 + $0x20] sm:$0xff] }
  0x1a   :  { %v221_v5 = vmul.f32 8.0, %v2225_v1  ;;  %v381_v32 = vadd.f32 %v380_v25, %v379_v18  ;;  %v321_v38 = vrot.slane %v2250_v30, 4  ;;  %3492 = vst [vmem:[#allocation14_spill] sm:$0xff] %v2256_v39  ;;  %v307_v43 = vrot.slane %v2256_v39, 4 }
  0x1b   :  { %v367_v36 = vadd.f32 %v366_v29, %v365_v22  ;;  %v303_v40 = vadd.f32 %v302_v33, %v301_v26  ;;  %v373_v41 = vrot.slane %v372_v34, 2  ;;  %v691_v45 = vmul.f32 %v97_v35, %v97_v35 }
  0x1c   :  { %v222_v13 = vsub.f32 1.0, %v221_v5  ;;  %v322_v44 = vadd.f32 %v321_v38, %v2250_v30  ;;  %v382_v47 = vrot.slane %v381_v32, 1  ;;  %v308_v49 = vadd.f32 %v307_v43, %v2256_v39  ;;  %v93_v38 = vld [vmem:[#allocation2 + $0x28] sm:$0xff] }
  0x1d   :  { %v374_v48 = vadd.f32 %v373_v41, %v372_v34  ;;  %v368_v51 = vrot.slane %v367_v36, 1  ;;  %v701_v53 = vsel %vm163_vm0, %v691_v45, 0.0  ;;  %vm225_vm1 = vweird.f32 %v2225_v1 }
  0x1e   :  { %v223_v31 = vmul.f32 %v2225_v1, %v222_v13  ;;  %708 = vadd.xlane.f32.xlu0 %v707_v37  ;;  %574 = vadd.xlane.f32.xlu1 %v573_v42  ;;  %v323_v52 = vrot.slane %v322_v44, 2  ;;  %v304_v54 = vrot.slane %v303_v40, 1  ;;  %v309_v55 = vrot.slane %v308_v49, 2 }
  0x1f   :  { %702 = vadd.xlane.f32.xlu2 %v701_v53  ;;  %v692_v56 = vmul.f32 %v98_v46, %v98_v46  ;;  %v2266_v59 = vsel %vm163_vm0, %v98_v46, 0.0  ;;  %v384_v60 = vsel %vm163_vm0, %v115_v57, 0.0  ;;  %v383_v61 = vadd.f32 %v382_v47, %v381_v32 }
  0x20   :  { %v224_v50 = vadd.f32 %v2225_v1, %v223_v31  ;;  %v324_v58 = vadd.f32 %v323_v52, %v322_v44  ;;  %3493 = vst [vmem:[#allocation15_spill] sm:$0xff] %v2266_v59  ;;  %v375_v62 = vrot.slane %v374_v48, 1  ;;  %v310_v63 = vadd.f32 %v309_v55, %v308_v49  ;;  %v94_v55 = vld [vmem:[#allocation2 + $0x30] sm:$0xff] }
  0x21   :  { %v369_v4 = vadd.f32 %v368_v51, %v367_v36  ;;  %v314_v5 = vrot.slane %v2266_v59, 4  ;;  %v385_v6 = vrot.slane %v384_v60, 4  ;;  %v305_v7 = vadd.f32 %v304_v54, %v303_v40 }
  0x22   :  { %v2270_v2 = vsel %vm225_vm1, %v2225_v1, %v224_v50  ;;  %v325_v8 = vrot.slane %v324_v58, 1  ;;  %v704_v9 = vsel %vm163_vm0, %v692_v56, 0.0  ;;  %v565_v10 = vmul.f32 %v115_v57, %v115_v57  ;;  %v95_v56 = vld [vmem:[#allocation2 + $0x38] sm:$0xff] }
  0x23   :  { %v311_v13 = vrot.slane %v310_v63, 1  ;;  %v315_v14 = vadd.f32 %v314_v5, %v2266_v59  ;;  %v386_v15 = vadd.f32 %v385_v6, %v384_v60  ;;  %v164_v18 = vsel %vm163_vm0, %v88_v0, 0.0 }
  0x24   :  { %v2277_v1 = vmul.f32 %v383_v61, %v2270_v2  ;;  %v376_v19 = vadd.f32 %v375_v62, %v374_v48  ;;  %v579_v20 = vsel %vm163_vm0, %v565_v10, 0.0  ;;  %v165_v22 = vrot.slane %v164_v18, 4 }
  0x25   :  { %v2281_v23 = vmul.f32 %v369_v4, %v2270_v2  ;;  %v316_v24 = vrot.slane %v315_v14, 2  ;;  %v387_v25 = vrot.slane %v386_v15, 2  ;;  %v171_v26 = vsel %vm163_vm0, %v89_v11, 0.0 }
  0x26   :  { %705 = vadd.xlane.f32.xlu1 %v704_v9  ;;  %v2285_v27 = vmul.f32 %v305_v7, %v2270_v2  ;;  %v166_v29 = vadd.f32 %v165_v22, %v164_v18  ;;  %v172_v31 = vrot.slane %v171_v26, 4  ;;  %v178_v32 = vsel %vm163_vm0, %v90_v17, 0.0 }
  0x27   :  { %580 = vadd.xlane.f32.xlu2 %v579_v20  ;;  %v326_v33 = vadd.f32 %v325_v8, %v324_v58  ;;  %v312_v34 = vadd.f32 %v311_v13, %v310_v63  ;;  %v179_v35 = vrot.slane %v178_v32, 4  ;;  %v185_v36 = vsel %vm163_vm0, %v91_v21, 0.0 }
  0x28   :  { %v2290_v37 = vmul.f32 %v376_v19, %v2270_v2  ;;  %v167_v40 = vrot.slane %v166_v29, 2  ;;  %v173_v41 = vadd.f32 %v172_v31, %v171_v26  ;;  %v186_v42 = vrot.slane %v185_v36, 4 }
  0x29   :  { %v2292_v43 = vadd.f32 %v316_v24, %v315_v14  ;;  %v2294_v44 = vadd.f32 %v387_v25, %v386_v15  ;;  %v180_v45 = vadd.f32 %v179_v35, %v178_v32  ;;  %v192_v46 = vsel %vm163_vm0, %v92_v28, 0.0 }
  0x2a   :  { %v168_v47 = vadd.f32 %v167_v40, %v166_v29  ;;  %v174_v48 = vrot.slane %v173_v41, 2  ;;  %v187_v49 = vadd.f32 %v186_v42, %v185_v36  ;;  %v193_v50 = vrot.slane %v192_v46, 4 }
  0x2b   :  { %v2298_v51 = vmul.f32 %v326_v33, %v2270_v2  ;;  %v2301_v52 = vmul.f32 %v312_v34, %v2270_v2  ;;  %v181_v53 = vrot.slane %v180_v45, 2  ;;  %v199_v54 = vsel %vm163_vm0, %v93_v38, 0.0 }
  0x2c   :  { %v169_v57 = vrot.slane %v168_v47, 1  ;;  %v175_v58 = vadd.f32 %v174_v48, %v173_v41  ;;  %v188_v60 = vrot.slane %v187_v49, 2  ;;  %v194_v61 = vadd.f32 %v193_v50, %v192_v46  ;;  %v2315_v46 = vld [vmem:[#allocation7 + $0x20] sm:$0xff] }
  0x2d   :  { %v318_v62 = vrot.slane %v2292_v43, 1  ;;  %v389_v63 = vrot.slane %v2294_v44, 1  ;;  %v182_v0 = vadd.f32 %v181_v53, %v180_v45  ;;  %v200_v4 = vrot.slane %v199_v54, 4  ;;  %v2318_v50 = vld [vmem:[#allocation4 + $0x20] sm:$0xff] }
  0x2e   :  { %v170_v5 = vadd.f32 %v169_v57, %v168_v47  ;;  %v176_v6 = vrot.slane %v175_v58, 1  ;;  %v189_v7 = vadd.f32 %v188_v60, %v187_v49  ;;  %v195_v8 = vrot.slane %v194_v61, 2  ;;  %v104_v60 = vld [vmem:[#allocation6] sm:$0xff] }
  0x2f   :  { %v183_v9 = vrot.slane %v182_v0, 1  ;;  %v201_v10 = vadd.f32 %v200_v4, %v199_v54  ;;  %v206_v11 = vsel %vm163_vm0, %v94_v55, 0.0  ;;  %v213_v13 = vsel %vm163_vm0, %v95_v56, 0.0 }
  0x30   :  { %v177_v14 = vadd.f32 %v176_v6, %v175_v58  ;;  %v190_v15 = vrot.slane %v189_v7, 1  ;;  %v196_v17 = vadd.f32 %v195_v8, %v194_v61  ;;  %v207_v18 = vrot.slane %v206_v11, 4  ;;  %v105_v6 = vld [vmem:[#allocation6 + $0x8] sm:$0xff] }
  0x31   :  { %v184_v19 = vadd.f32 %v183_v9, %v182_v0  ;;  %v202_v20 = vrot.slane %v201_v10, 2  ;;  %v214_v21 = vrot.slane %v213_v13, 4  ;;  %v227_v22 = vmul.f32 %v2270_v2, %v170_v5 }
  0x32   :  { %v191_v24 = vadd.f32 %v190_v15, %v189_v7  ;;  %v197_v25 = vrot.slane %v196_v17, 1  ;;  %v208_v26 = vadd.f32 %v207_v18, %v206_v11  ;;  %v228_v28 = vmul.f32 %v2270_v2, %v177_v14  ;;  %v106_v11 = vld [vmem:[#allocation6 + $0x10] sm:$0xff] }
  0x33   :  { %v203_v29 = vadd.f32 %v202_v20, %v201_v10  ;;  %v215_v31 = vadd.f32 %v214_v21, %v213_v13  ;;  %v229_v32 = vmul.f32 %v2270_v2, %v184_v19  ;;  %vm435_vm2 = vcmask 1041409   ;;  %v107_v20 = vld [vmem:[#allocation6 + $0x18] sm:$0xff] }
  0x34   :  { %v198_v33 = vadd.f32 %v197_v25, %v196_v17  ;;  %v209_v34 = vrot.slane %v208_v26, 2  ;;  %v230_v35 = vmul.f32 %v2270_v2, %v191_v24  ;;  %v436_v36 = vsel %vm435_vm2, %v228_v28, %v227_v22 }
  0x35   :  { %v204_v38 = vrot.slane %v203_v29, 1  ;;  %v216_v40 = vrot.slane %v215_v31, 2  ;;  %vm437_vm3 = vcmask 1042434   ;;  %vm3489_vm4 = vcmask 1043459  }
  0x36   :  { %v210_v41 = vadd.f32 %v209_v34, %v208_v26  ;;  %v231_v42 = vmul.f32 %v2270_v2, %v198_v33  ;;  %v438_v45 = vsel %vm437_vm3, %v229_v32, %v436_v36  ;;  %vm3488_vm5 = vcmask 1044484   ;;  %v108_v32 = vld [vmem:[#allocation6 + $0x20] sm:$0xff] }
  0x37   :  { %v205_v47 = vadd.f32 %v204_v38, %v203_v29  ;;  %v217_v48 = vadd.f32 %v216_v40, %v215_v31  ;;  %v440_v49 = vsel %vm3489_vm4, %v230_v35, %v438_v45  ;;  %vm3487_vm6 = vcmask 1045509  }
  0x38   :  { %v211_v53 = vrot.slane %v210_v41, 1  ;;  %v442_v54 = vsel %vm3488_vm5, %v231_v42, %v440_v49  ;;  %vm3484_vm7 = vcmask 1046534   ;;  %vm3483_vm8 = vcmask 1047559   ;;  %v109_v42 = vld [vmem:[#allocation6 + $0x28] sm:$0xff] }
  0x39   :  { %v218_v55 = vrot.slane %v217_v48, 1  ;;  %v232_v56 = vmul.f32 %v2270_v2, %v205_v47  ;;  %v391_v57 = vsel %vm163_vm0, %v2315_v46, 0.0  ;;  %v566_v58 = vmul.f32 %v2315_v46, %v2315_v46 }
  0x3a   :  { %v212_v61 = vadd.f32 %v211_v53, %v210_v41  ;;  %v392_v0 = vrot.slane %v391_v57, 4  ;;  %v2328_v4 = vsel %vm163_vm0, %v2318_v50, 0.0  ;;  %v694_v5 = vmul.f32 %v2318_v50, %v2318_v50 }
  0x3b   :  { %3494 = vst [vmem:[#allocation16_spill] sm:$0xff] %v2328_v4  ;;  %v219_v7 = vadd.f32 %v218_v55, %v217_v48  ;;  %v444_v8 = vsel %vm3487_vm6, %v232_v56, %v442_v54  ;;  %v582_v9 = vsel %vm163_vm0, %v566_v58, 0.0  ;;  %v328_v10 = vrot.slane %v2328_v4, 4 }
  0x3c   :  { %v233_v13 = vmul.f32 %v2270_v2, %v212_v61  ;;  %v393_v14 = vadd.f32 %v392_v0, %v391_v57  ;;  %583 = vadd.xlane.f32.xlu1 %v582_v9  ;;  %v710_v15 = vsel %vm163_vm0, %v694_v5, 0.0  ;;  %v235_v17 = vsel %vm163_vm0, %v104_v60, 0.0  ;;  %v110_v60 = vld [vmem:[#allocation6 + $0x30] sm:$0xff] }
  0x3d   :  { %v234_v18 = vmul.f32 %v2270_v2, %v219_v7  ;;  %v329_v19 = vadd.f32 %v328_v10, %v2328_v4  ;;  %711 = vadd.xlane.f32.xlu2 %v710_v15  ;;  %v236_v21 = vrot.slane %v235_v17, 4  ;;  %v242_v22 = vsel %vm163_vm0, %v105_v6, 0.0 }
  0x3e   :  { %v446_v24 = vsel %vm3484_vm7, %v233_v13, %v444_v8  ;;  %v394_v25 = vrot.slane %v393_v14, 2  ;;  %v243_v26 = vrot.slane %v242_v22, 4  ;;  %v249_v28 = vsel %vm163_vm0, %v106_v11, 0.0 }
  0x3f   :  { %v2344_v29 = vsel %vm3483_vm8, %v234_v18, %v446_v24  ;;  %v330_v31 = vrot.slane %v329_v19, 2  ;;  %v237_v33 = vadd.f32 %v236_v21, %v235_v17  ;;  %v250_v34 = vrot.slane %v249_v28, 4 }
  0x40   :  { %v319_v35 = vadd.f32 %v318_v62, %v2292_v43  ;;  %v466_v36 = vmul.f32 %v2344_v29, %v2344_v29  ;;  %v244_v38 = vadd.f32 %v243_v26, %v242_v22  ;;  %v256_v40 = vsel %vm163_vm0, %v107_v20, 0.0 }
  0x41   :  { %v2352_v41 = vadd.f32 %v394_v25, %v393_v14  ;;  %v238_v45 = vrot.slane %v237_v33, 2  ;;  %v251_v47 = vadd.f32 %v250_v34, %v249_v28  ;;  %v257_v48 = vrot.slane %v256_v40, 4 }
  0x42   :  { %v468_v49 = vsel %vm163_vm0, %v466_v36, 0.0  ;;  %v2355_v53 = vadd.f32 %v330_v31, %v329_v19  ;;  %v245_v54 = vrot.slane %v244_v38, 2  ;;  %v263_v55 = vsel %vm163_vm0, %v108_v32, 0.0 }
  0x43   :  { %v2361_v43 = vadd.f32 %v389_v63, %v2294_v44  ;;  %469 = vadd.xlane.f32.xlu0 %v468_v49  ;;  %v239_v62 = vadd.f32 %v238_v45, %v237_v33  ;;  %v252_v56 = vrot.slane %v251_v47, 2  ;;  %v258_v57 = vadd.f32 %v257_v48, %v256_v40  ;;  %v111_v63 = vld [vmem:[#allocation6 + $0x38] sm:$0xff] }
  0x44   :  { %v2364_v58 = vmul.f32 %v319_v35, %v2270_v2  ;;  %v246_v61 = vadd.f32 %v245_v54, %v244_v38  ;;  %v264_v0 = vrot.slane %v263_v55, 4  ;;  %v270_v5 = vsel %vm163_vm0, %v109_v42, 0.0  ;;  %v2372_v35 = vld [vmem:[#allocation4 + $0x28] sm:$0xff]  ;;  %v2380_v54 = vld [vmem:[#allocation7 + $0x30] sm:$0xff] }
  0x45   :  { %v396_v6 = vrot.slane %v2352_v41, 1  ;;  %v240_v7 = vrot.slane %v239_v62, 1  ;;  %v253_v8 = vadd.f32 %v252_v56, %v251_v47  ;;  %v259_v9 = vrot.slane %v258_v57, 2 }
  0x46   :  { %v332_v44 = vrot.slane %v2355_v53, 1  ;;  %v247_v10 = vrot.slane %v246_v61, 1  ;;  %v265_v11 = vadd.f32 %v264_v0, %v263_v55  ;;  %v271_v13 = vrot.slane %v270_v5, 4 }
  0x47   :  { %v241_v14 = vadd.f32 %v240_v7, %v239_v62  ;;  %v254_v15 = vrot.slane %v253_v8, 1  ;;  %v260_v17 = vadd.f32 %v259_v9, %v258_v57  ;;  %v277_v18 = vsel %vm163_vm0, %v110_v60, 0.0 }
  0x48   :  { %v248_v19 = vadd.f32 %v247_v10, %v246_v61  ;;  %v266_v20 = vrot.slane %v265_v11, 2  ;;  %v272_v21 = vadd.f32 %v271_v13, %v270_v5  ;;  %v278_v22 = vrot.slane %v277_v18, 4 }
  0x49   :  { %v255_v24 = vadd.f32 %v254_v15, %v253_v8  ;;  %v261_v25 = vrot.slane %v260_v17, 1  ;;  %v284_v26 = vsel %vm163_vm0, %v111_v63, 0.0  ;;  %v291_v28 = vmul.f32 %v241_v14, %v2270_v2  ;;  %v2393_v15 = vld [vmem:[#allocation7 + $0x28] sm:$0xff] }
  0x4a   :  { %v267_v31 = vadd.f32 %v266_v20, %v265_v11  ;;  %v273_v32 = vrot.slane %v272_v21, 2  ;;  %v279_v33 = vadd.f32 %v278_v22, %v277_v18  ;;  %v285_v34 = vrot.slane %v284_v26, 4 }
  0x4b   :  { %v262_v36 = vadd.f32 %v261_v25, %v260_v17  ;;  %v292_v38 = vmul.f32 %v248_v19, %v2270_v2  ;;  %v293_v40 = vmul.f32 %v255_v24, %v2270_v2  ;;  %v2378_v42 = vsel %vm163_vm0, %v2372_v35, 0.0 }
  0x4c   :  { %3495 = vst [vmem:[#allocation17_spill] sm:$0xff] %v2378_v42  ;;  %v268_v45 = vrot.slane %v267_v31, 1  ;;  %v274_v47 = vadd.f32 %v273_v32, %v272_v21  ;;  %v280_v48 = vrot.slane %v279_v33, 2  ;;  %v286_v49 = vadd.f32 %v285_v34, %v284_v26  ;;  %v2400_v26 = vld [vmem:[#allocation7 + $0x38] sm:$0xff] }
  0x4d   :  { %v294_v55 = vmul.f32 %v262_v36, %v2270_v2  ;;  %v458_v62 = vsel %vm435_vm2, %v292_v38, %v291_v28  ;;  %v335_v56 = vrot.slane %v2378_v42, 4  ;;  %v695_v57 = vmul.f32 %v2372_v35, %v2372_v35 }
  0x4e   :  { %v269_v60 = vadd.f32 %v268_v45, %v267_v31  ;;  %v275_v61 = vrot.slane %v274_v47, 1  ;;  %v281_v0 = vadd.f32 %v280_v48, %v279_v33  ;;  %v287_v5 = vrot.slane %v286_v49, 2 }
  0x4f   :  { %v459_v7 = vsel %vm437_vm3, %v293_v40, %v458_v62  ;;  %v336_v8 = vadd.f32 %v335_v56, %v2378_v42  ;;  %v713_v9 = vsel %vm163_vm0, %v695_v57, 0.0  ;;  %v405_v63 = vsel %vm163_vm0, %v2380_v54, 0.0 }
  0x50   :  { %v276_v10 = vadd.f32 %v275_v61, %v274_v47  ;;  %v282_v11 = vrot.slane %v281_v0, 1  ;;  %v288_v13 = vadd.f32 %v287_v5, %v286_v49  ;;  %v295_v14 = vmul.f32 %v269_v60, %v2270_v2  ;;  %714 = vadd.xlane.f32.xlu1 %v713_v9 }
  0x51   :  { %v460_v17 = vsel %vm3489_vm4, %v294_v55, %v459_v7  ;;  %v337_v18 = vrot.slane %v336_v8, 2  ;;  %v406_v19 = vrot.slane %v405_v63, 4  ;;  %v568_v20 = vmul.f32 %v2380_v54, %v2380_v54  ;;  %v2416_v55 = vld [vmem:[#allocation4 + $0x38] sm:$0xff] }
  0x52   :  { %v283_v21 = vadd.f32 %v282_v11, %v281_v0  ;;  %v289_v22 = vrot.slane %v288_v13, 1  ;;  %v296_v24 = vmul.f32 %v276_v10, %v2270_v2  ;;  %v461_v25 = vsel %vm3488_vm5, %v295_v14, %v460_v17 }
  0x53   :  { %v338_v28 = vadd.f32 %v337_v18, %v336_v8  ;;  %v407_v31 = vadd.f32 %v406_v19, %v405_v63  ;;  %v588_v32 = vsel %vm163_vm0, %v568_v20, 0.0  ;;  %v398_v33 = vsel %vm163_vm0, %v2393_v15, 0.0 }
  0x54   :  { %v290_v34 = vadd.f32 %v289_v22, %v288_v13  ;;  %v297_v36 = vmul.f32 %v283_v21, %v2270_v2  ;;  %v462_v38 = vsel %vm3487_vm6, %v296_v24, %v461_v25  ;;  %589 = vadd.xlane.f32.xlu2 %v588_v32  ;;  %v399_v40 = vrot.slane %v398_v33, 4 }
  0x55   :  { %v2409_v45 = vmul.f32 %v2361_v43, %v2270_v2  ;;  %v397_v47 = vadd.f32 %v396_v6, %v2352_v41  ;;  %v408_v48 = vrot.slane %v407_v31, 2  ;;  %v412_v49 = vsel %vm163_vm0, %v2400_v26, 0.0  ;;  %v2425_v6 = vld [vmem:[#allocation4 + $0x30] sm:$0xff] }
  0x56   :  { %v298_v62 = vmul.f32 %v290_v34, %v2270_v2  ;;  %v463_v56 = vsel %vm3484_vm7, %v297_v36, %v462_v38  ;;  %v400_v57 = vadd.f32 %v399_v40, %v398_v33  ;;  %v413_v60 = vrot.slane %v412_v49, 4 }
  0x57   :  { %3496 = vst [vmem:[#allocation18_spill] sm:$0xff] %v2409_v45  ;;  %v333_v43 = vadd.f32 %v332_v44, %v2355_v53  ;;  %v339_v61 = vrot.slane %v338_v28, 1  ;;  %v409_v0 = vadd.f32 %v408_v48, %v407_v31  ;;  %v569_v41 = vmul.f32 %v2400_v26, %v2400_v26 }
  0x58   :  { %v2428_v5 = vsel %vm3483_vm8, %v298_v62, %v463_v56  ;;  %v401_v7 = vrot.slane %v400_v57, 2  ;;  %v414_v8 = vadd.f32 %v413_v60, %v412_v49  ;;  %v2432_v9 = vsel %vm163_vm0, %v2416_v55, 0.0 }
  0x59   :  { %3497 = vst [vmem:[#allocation19_spill] sm:$0xff] %v2432_v9  ;;  %v467_v63 = vmul.f32 %v2428_v5, %v2428_v5  ;;  %v410_v53 = vrot.slane %v409_v0, 1  ;;  %v591_v44 = vsel %vm163_vm0, %v569_v41, 0.0  ;;  %v349_v10 = vrot.slane %v2432_v9, 4 }
  0x5a   :  { %v402_v11 = vadd.f32 %v401_v7, %v400_v57  ;;  %v415_v13 = vrot.slane %v414_v8, 2  ;;  %592 = vadd.xlane.f32.xlu1 %v591_v44  ;;  %v697_v14 = vmul.f32 %v2416_v55, %v2416_v55  ;;  %v2442_v17 = vsel %vm163_vm0, %v2425_v6, 0.0 }
  0x5b   :  { %3498 = vst [vmem:[#allocation20_spill] sm:$0xff] %v2442_v17  ;;  %v471_v18 = vsel %vm163_vm0, %v467_v63, 0.0  ;;  %v411_v19 = vadd.f32 %v410_v53, %v409_v0  ;;  %v350_v20 = vadd.f32 %v349_v10, %v2432_v9  ;;  %v342_v21 = vrot.slane %v2442_v17, 4 }
  0x5c   :  { %v2448_v22 = vmul.f32 %v397_v47, %v2270_v2  ;;  %472 = vadd.xlane.f32.xlu0 %v471_v18  ;;  %v403_v24 = vrot.slane %v402_v11, 1  ;;  %v416_v25 = vadd.f32 %v415_v13, %v414_v8  ;;  %v719_v31 = vsel %vm163_vm0, %v697_v14, 0.0 }
  0x5d   :  { %v567_v32 = vmul.f32 %v2393_v15, %v2393_v15  ;;  %v351_v33 = vrot.slane %v350_v20, 2  ;;  %720 = vadd.xlane.f32.xlu2 %v719_v31  ;;  %v343_v34 = vadd.f32 %v342_v21, %v2442_v17  ;;  %v522_v36 = vsel %vm435_vm2, %v2290_v37, %v2281_v23 }
  0x5e   :  { %3499 = vst [vmem:[#allocation21_spill] sm:$0xff] %v2448_v22  ;;  %v340_v38 = vadd.f32 %v339_v61, %v338_v28  ;;  %v404_v40 = vadd.f32 %v403_v24, %v402_v11  ;;  %v417_v47 = vrot.slane %v416_v25, 1  ;;  %v523_v48 = vsel %vm437_vm3, %v2277_v1, %v522_v36 }
  0x5f   :  { %v352_v49 = vadd.f32 %v351_v33, %v350_v20  ;;  %v344_v62 = vrot.slane %v343_v34, 2  ;;  %v2460_v56 = vmul.f32 %v411_v19, %v2270_v2  ;;  %v524_v57 = vsel %vm3489_vm4, %v2409_v45, %v523_v48 }
  0x60   :  { %v418_v60 = vadd.f32 %v417_v47, %v416_v25  ;;  %v2465_v0 = vmul.f32 %v404_v40, %v2270_v2  ;;  %v525_v28 = vsel %vm3488_vm5, %v2448_v22, %v524_v57  ;;  %v2470_v61 = vmul.f32 %v333_v43, %v2270_v2 }
  0x61   :  { %3500 = vst [vmem:[#allocation22_spill] sm:$0xff] %v2460_v56  ;;  %v585_v41 = vsel %vm163_vm0, %v567_v32, 0.0  ;;  %v345_v7 = vadd.f32 %v344_v62, %v343_v34  ;;  %v353_v8 = vrot.slane %v352_v49, 1  ;;  %v506_v63 = vsel %vm435_vm2, %v2301_v52, %v2285_v27 }
  0x62   :  { %3501 = vst [vmem:[#allocation23_spill] sm:$0xff] %v2465_v0  ;;  %v2477_v53 = vmul.f32 %v418_v60, %v2270_v2  ;;  %v526_v44 = vsel %vm3487_vm6, %v2465_v0, %v525_v28  ;;  %v2482_v10 = vmul.f32 %v340_v38, %v2270_v2  ;;  %v507_v43 = vsel %vm437_vm3, %v2364_v58, %v506_v63 }
  0x63   :  { %v346_v11 = vrot.slane %v345_v7, 1  ;;  %v527_v13 = vsel %vm3484_vm7, %v2460_v56, %v526_v44  ;;  %v354_v14 = vadd.f32 %v353_v8, %v352_v49  ;;  %v508_v18 = vsel %vm3489_vm4, %v2298_v51, %v507_v43 }
  0x64   :  { %3502 = vst [vmem:[#allocation24_spill] sm:$0xff] %v2477_v53  ;;  %586 = vadd.xlane.f32.xlu0 %v585_v41  ;;  %v2492_v19 = vsel %vm3483_vm8, %v2477_v53, %v527_v13  ;;  %v509_v20 = vsel %vm3488_vm5, %v2470_v61, %v508_v18  ;;  %v696_v21 = vmul.f32 %v2425_v6, %v2425_v6 }
  0x65   :  { %v531_v24 = vmul.f32 %v2492_v19, %v2492_v19  ;;  %v347_v25 = vadd.f32 %v346_v11, %v345_v7  ;;  %v2501_v31 = vmul.f32 %v354_v14, %v2270_v2  ;;  %v510_v32 = vsel %vm3487_vm6, %v2482_v10, %v509_v20 }
  0x66   :  { %v716_v36 = vsel %vm163_vm0, %v696_v21, 0.0 }
  0x67   :  { %v535_v33 = vsel %vm163_vm0, %v531_v24, 0.0  ;;  %v2507_v34 = vmul.f32 %v347_v25, %v2270_v2 }
  0x68   :  { %536 = vadd.xlane.f32.xlu1 %v535_v33 }
  0x69   :  { %v511_v38 = vsel %vm3484_vm7, %v2507_v34, %v510_v32 }
  0x6a   :  { %v2514_v40 = vsel %vm3483_vm8, %v2501_v31, %v511_v38 }
  0x6b   :  { %v530_v47 = vmul.f32 %v2514_v40, %v2514_v40 }
  0x6c   :  { %717 = vadd.xlane.f32.xlu0 %v716_v36 }
  0x6d   :  { %v532_v48 = vsel %vm163_vm0, %v530_v47, 0.0 }
  0x74   :  { %533 = vadd.xlane.f32.xlu0 %v532_v48 }
  0x89   :  { %v572_v49 = vpop.xlane.xlu1 %571  ;;  %v2521_v62 = vpop.xlane.xlu0 %577 }
  0x8a   :  { %v2519_v2 = vpop.xlane.xlu2 %699  ;;  %1990 = vrsqrt.f32 %v572_v49  ;;  %vm600_vm9 = vweird.f32 %v572_v49  ;;  %vm620_vm11 = vweird.f32 %v2521_v62 }
  0x8b   :  { %vm728_vm8 = vweird.f32 %v2519_v2 }
  0x90   :  { %v2530_v41 = vpop.eup %1990 }
  0x91   :  { %v2523_v57 = vpop.xlane.xlu1 %574  ;;  %v2528_v28 = vpop.xlane.xlu0 %708  ;;  %v595_v8 = vmul.f32 %v2530_v41, %v572_v49  ;;  %vm601_vm10 = vweird.f32 %v2530_v41 }
  0x92   :  { %v2525_v60 = vpop.xlane.xlu2 %702  ;;  %1992 = vrsqrt.f32 %v2523_v57  ;;  %vm2582_vm12 = vmor %vm600_vm9, %vm601_vm10  ;;  %vm610_vm13 = vweird.f32 %v2523_v57 }
  0x93   :  { %1994 = vrsqrt.f32 %v2521_v62  ;;  %v596_v13 = vmul.f32 %v2530_v41, %v595_v8 }
  0x94   :  { %1996 = vrsqrt.f32 %v2519_v2 }
  0x95   :  { %1998 = vrsqrt.f32 %v2528_v28  ;;  %v597_v24 = vmul.f32 0.5, %v596_v13 }
  0x98   :  { %v2533_v7 = vpop.eup %1992 }
  0x99   :  { %v2536_v63 = vpop.xlane.xlu1 %705  ;;  %v605_v43 = vmul.f32 %v2533_v7, %v2523_v57  ;;  %v2543_v11 = vpop.eup %1994  ;;  %vm611_vm14 = vweird.f32 %v2533_v7 }
  0x9a   :  { %v2539_v44 = vpop.xlane.xlu2 %580  ;;  %v2548_v18 = vpop.eup %1996  ;;  %v615_v20 = vmul.f32 %v2543_v11, %v2521_v62  ;;  %vm2595_vm1 = vmor %vm610_vm13, %vm611_vm14  ;;  %vm621_vm10 = vweird.f32 %v2543_v11  ;;  %vm758_vm14 = vweird.f32 %v2528_v28 }
  0x9b   :  { %v606_v21 = vmul.f32 %v2533_v7, %v605_v43  ;;  %v2554_v25 = vpop.eup %1998  ;;  %v723_v32 = vmul.f32 %v2548_v18, %v2519_v2  ;;  %v598_v43 = vsub.f32 1.5, %v597_v24  ;;  %vm729_vm13 = vweird.f32 %v2548_v18 }
  0x9c   :  { %v616_v38 = vmul.f32 %v2543_v11, %v615_v20  ;;  %v753_v17 = vmul.f32 %v2554_v25, %v2528_v28 }
  0x9d   :  { %v607_v47 = vmul.f32 0.5, %v606_v21  ;;  %v724_v9 = vmul.f32 %v2548_v18, %v723_v32  ;;  %v599_v39 = vmul.f32 %v2530_v41, %v598_v43 }
  0x9e   :  { %v617_v42 = vmul.f32 0.5, %v616_v38 }
  0x9f   :  { %v608_v59 = vsub.f32 1.5, %v607_v47  ;;  %v725_v47 = vmul.f32 0.5, %v724_v9 }
  0xa0   :  { %v618_v43 = vsub.f32 1.5, %v617_v42  ;;  %v603_v42 = vsel %vm2582_vm12, %v2530_v41, %v599_v39  ;;  %vm738_vm12 = vweird.f32 %v2525_v60 }
  0xa2   :  { %v619_v45 = vmul.f32 %v2543_v11, %v618_v43 }
  0xaf   :  { %v2559_v33 = vpop.xlane.xlu1 %583 }
  0xb0   :  { %v2563_v48 = vpop.xlane.xlu2 %711 }
  0xb6   :  { %v470_v14 = vpop.xlane.xlu0 %469 }
  0xb7   :  { %2000 = vrsqrt.f32 %v470_v14  ;;  %vm480_vm9 = vweird.f32 %v470_v14 }
  0xb8   :  { %2002 = vrsqrt.f32 %v2525_v60 }
  0xb9   :  { %2004 = vrsqrt.f32 %v2536_v63 }
  0xba   :  { %2006 = vrsqrt.f32 %v2539_v44 }
  0xbb   :  { %2008 = vrsqrt.f32 %v2559_v33 }
  0xbc   :  { %2010 = vrsqrt.f32 %v2563_v48 }
  0xbd   :  { %v2001_v36 = vpop.eup %2000 }
  0xbe   :  { %v2565_v8 = vpop.eup %2002  ;;  %v475_v13 = vmul.f32 %v2001_v36, %v470_v14  ;;  %vm481_vm15 = vweird.f32 %v2001_v36 }
  0xbf   :  { %v2572_v21 = vpop.eup %2004  ;;  %v733_v30 = vmul.f32 %v2565_v8, %v2525_v60  ;;  %vm482_vm7 = vmor %vm480_vm9, %vm481_vm15  ;;  %vm759_vm15 = vweird.f32 %v2554_v25  ;;  %vm748_vm9 = vweird.f32 %v2536_v63 }
  0xc0   :  { %v476_v20 = vmul.f32 %v2001_v36, %v475_v13  ;;  %v2576_v24 = vpop.eup %2006  ;;  %v754_v13 = vmul.f32 %v2554_v25, %v753_v17  ;;  %v743_v0 = vmul.f32 %v2572_v21, %v2536_v63  ;;  %v726_v17 = vsub.f32 1.5, %v725_v47  ;;  %vm2670_vm6 = vmor %vm758_vm14, %vm759_vm15 }
  0xc1   :  { %v2579_v53 = vpop.eup %2008  ;;  %v734_v4 = vmul.f32 %v2565_v8, %v733_v30  ;;  %v625_v57 = vmul.f32 %v2576_v24, %v2539_v44  ;;  %vm640_vm14 = vweird.f32 %v2559_v33 }
  0xc2   :  { %v477_v49 = vmul.f32 0.5, %v476_v20  ;;  %v2588_v38 = vpop.eup %2010  ;;  %v609_v20 = vmul.f32 %v2533_v7, %v608_v59  ;;  %v635_v30 = vmul.f32 %v2579_v53, %v2559_v33  ;;  %v744_v39 = vmul.f32 %v2572_v21, %v743_v0 }
  0xc3   :  { %v763_v59 = vmul.f32 %v2588_v38, %v2563_v48  ;;  %v735_v16 = vmul.f32 0.5, %v734_v4  ;;  %v626_v47 = vmul.f32 %v2576_v24, %v625_v57  ;;  %vm641_vm15 = vweird.f32 %v2579_v53 }
  0xc4   :  { %v478_v56 = vsub.f32 1.5, %v477_v49  ;;  %v674_v49 = vmin.f32 %v603_v42, 1e+12  ;;  %v613_v32 = vsel %vm2595_vm1, %v2533_v7, %v609_v20  ;;  %v636_v0 = vmul.f32 %v2579_v53, %v635_v30  ;;  %vm2633_vm1 = vmor %vm620_vm11, %vm621_vm10 }
  0xc5   :  { %v675_v4 = vmin.f32 %v613_v32, 1e+12  ;;  %v736_v42 = vsub.f32 1.5, %v735_v16  ;;  %v627_v30 = vmul.f32 0.5, %v626_v47  ;;  %v623_v62 = vsel %vm2633_vm1, %v2543_v11, %v619_v45  ;;  %vm2659_vm1 = vmor %vm728_vm8, %vm729_vm13 }
  0xc6   :  { %v479_v9 = vmul.f32 %v2001_v36, %v478_v56  ;;  %v755_v56 = vmul.f32 0.5, %v754_v13  ;;  %v682_v43 = vmul.f32 %v674_v49, %v2227_v3  ;;  %vm749_vm11 = vweird.f32 %v2572_v21 }
  0xc7   :  { %v683_v16 = vmul.f32 %v675_v4, %v2235_v12  ;;  %vm630_vm10 = vweird.f32 %v2539_v44  ;;  %v628_v11 = vsub.f32 1.5, %v627_v30  ;;  %v2663_v12 = vpop.xlane.xlu2 %589  ;;  %v737_v2 = vmul.f32 %v2565_v8, %v736_v42  ;;  %vm2694_vm5 = vmor %vm748_vm9, %vm749_vm11 }
  0xc8   :  { %v483_v14 = vsel %vm482_vm7, %v2001_v36, %v479_v9  ;;  %v764_v36 = vmul.f32 %v2588_v38, %v763_v59  ;;  %v2626_v9 = vmul.f32 %v2548_v18, %v726_v17  ;;  %v756_v22 = vsub.f32 1.5, %v755_v56  ;;  %v2641_v59 = vpop.xlane.xlu1 %714  ;;  %vm2715_vm9 = vmor %vm640_vm14, %vm641_vm15 }
  0xc9   :  { %v494_v41 = vmin.f32 %v483_v14, 1e+12  ;;  %vm739_vm7 = vweird.f32 %v2565_v8  ;;  %v637_v17 = vmul.f32 0.5, %v636_v0  ;;  %2012 = vrsqrt.f32 %v2641_v59 }
  0xca   :  { %v765_v56 = vmul.f32 0.5, %v764_v36  ;;  %v757_v49 = vmul.f32 %v2554_v25, %v756_v22  ;;  %v676_v36 = vmin.f32 %v623_v62, 1e+12  ;;  %vm631_vm8 = vweird.f32 %v2576_v24  ;;  %vm2680_vm13 = vmor %vm738_vm12, %vm739_vm7  ;;  %v2056_v62 = vld [vmem:[#allocation7 + $0x10] sm:$0xff] }
  0xcb   :  { %v2621_v13 = vmul.f32 %v494_v41, %v2344_v29  ;;  %v745_v29 = vmul.f32 0.5, %v744_v39  ;;  %v638_v4 = vsub.f32 1.5, %v637_v17  ;;  %vm768_vm12 = vweird.f32 %v2563_v48  ;;  %vm2706_vm4 = vmor %vm630_vm10, %vm631_vm8 }
  0xcc   :  { %v766_v7 = vsub.f32 1.5, %v765_v56  ;;  %vm769_vm7 = vweird.f32 %v2588_v38  ;;  %v629_v30 = vmul.f32 %v2576_v24, %v628_v11  ;;  %v684_v17 = vmul.f32 %v2056_v62, %v676_v36 }
  0xcd   :  { %v836_v20 = vperm.slane %v2621_v13, 0  ;;  %v829_v57 = vrot.slane %v2621_v13, 1  ;;  %v830_v41 = vrot.slane %v2621_v13, 2  ;;  %v746_v32 = vsub.f32 1.5, %v745_v29  ;;  %vm2728_vm11 = vmor %vm768_vm12, %vm769_vm7 }
  0xce   :  { %v639_v56 = vmul.f32 %v2579_v53, %v638_v4  ;;  %v731_v11 = vsel %vm2659_vm1, %v2548_v18, %v2626_v9  ;;  %v741_v48 = vsel %vm2680_vm13, %v2565_v8, %v737_v2  ;;  %v633_v22 = vsel %vm2706_vm4, %v2576_v24, %v629_v30 }
  0xcf   :  { %v2646_v14 = vpop.xlane.xlu0 %472  ;;  %v852_v3 = vmul.f32 %v836_v20, %v682_v43  ;;  %v837_v39 = vperm.slane %v829_v57, 0  ;;  %v838_v43 = vperm.slane %v830_v41, 0  ;;  %v2687_v20 = vpop.eup %2012  ;;  %v747_v57 = vmul.f32 %v2572_v21, %v746_v32  ;;  %v2060_v32 = vld [vmem:[#allocation4 + $0x10] sm:$0xff] }
  0xd0   :  { %2014 = vrsqrt.f32 %v2646_v14  ;;  %v761_v41 = vsel %vm2670_vm6, %v2554_v25, %v757_v49  ;;  %v2733_v33 = vpop.xlane.xlu1 %592  ;;  %v773_v25 = vmul.f32 %v2687_v20, %v2641_v59  ;;  %v802_v9 = vmin.f32 %v731_v11, 1e+12 }
  0xd1   :  { %v860_v47 = vsel %vm163_vm0, %v852_v3, 0.0  ;;  %v853_v0 = vmul.f32 %v837_v39, %v683_v16  ;;  %2016 = vrsqrt.f32 %v2663_v12  ;;  %v767_v16 = vmul.f32 %v2588_v38, %v766_v7  ;;  %v2058_v3 = vld [vmem:[#allocation4] sm:$0xff] }
  0xd2   :  { %861 = vadd.xlane.f32.xlu2 %v860_v47  ;;  %v854_v47 = vmul.f32 %v838_v43, %v684_v17  ;;  %v751_v49 = vsel %vm2694_vm5, %v2572_v21, %v747_v57  ;;  %v805_v36 = vmin.f32 %v761_v41, 1e+12  ;;  %v643_v4 = vsel %vm2715_vm9, %v2579_v53, %v639_v56  ;;  %v2759_v21 = vpop.xlane.xlu2 %720 }
  0xd3   :  { %v863_v28 = vsel %vm163_vm0, %v853_v0, 0.0  ;;  %v771_v8 = vsel %vm2728_vm11, %v2588_v38, %v767_v16  ;;  %v803_v7 = vmin.f32 %v741_v48, 1e+12  ;;  %v804_v24 = vmin.f32 %v751_v49, 1e+12  ;;  %v2057_v38 = vld [vmem:[#allocation4 + $0x18] sm:$0xff] }
  0xd4   :  { %864 = vadd.xlane.f32.xlu0 %v863_v28  ;;  %v866_v2 = vsel %vm163_vm0, %v854_v47, 0.0  ;;  %v774_v28 = vmul.f32 %v2687_v20, %v773_v25  ;;  %v677_v43 = vmin.f32 %v633_v22, 1e+12  ;;  %v2767_v60 = vmul.f32 %v2057_v38, %v805_v36  ;;  %v2061_v25 = vld [vmem:[#allocation7 + $0x18] sm:$0xff] }
  0xd5   :  { %v678_v30 = vmin.f32 %v643_v4, 1e+12  ;;  %v806_v63 = vmin.f32 %v771_v8, 1e+12  ;;  %vm490_vm5 = vweird.f32 %v2646_v14  ;;  %v810_v16 = vmul.f32 %v2058_v3, %v802_v9 }
  0xd6   :  { %v2015_v42 = vpop.eup %2014  ;;  %v2777_v11 = vmul.f32 %v2060_v32, %v804_v24  ;;  %v2780_v48 = vmul.f32 %v2061_v25, %v677_v43  ;;  %vm778_vm10 = vweird.f32 %v2641_v59  ;;  %vm779_vm1 = vweird.f32 %v2687_v20 }
  0xd7   :  { %v485_v44 = vmul.f32 %v2015_v42, %v2646_v14  ;;  %v2721_v39 = vpop.xlane.xlu0 %586  ;;  %v2750_v45 = vpop.eup %2016  ;;  %vm491_vm4 = vweird.f32 %v2015_v42  ;;  %v775_v14 = vmul.f32 0.5, %v774_v28  ;;  %v2791_v9 = vmul.f32 %v806_v63, %v2318_v50  ;;  %vm2848_vm9 = vmor %vm778_vm10, %vm779_vm1 }
  0xd8   :  { %2018 = vrsqrt.f32 %v2721_v39  ;;  %v655_v53 = vmul.f32 %v2750_v45, %v2663_v12  ;;  %vm492_vm6 = vmor %vm490_vm5, %vm491_vm4  ;;  %v831_v8 = vrot.slane %v2621_v13, 3  ;;  %vm650_vm8 = vweird.f32 %v2721_v39 }
  0xd9   :  { %v486_v0 = vmul.f32 %v2015_v42, %v485_v44  ;;  %2020 = vrsqrt.f32 %v2733_v33  ;;  %v2059_v44 = vld [vmem:[#allocation4 + $0x8] sm:$0xff]  ;;  %v776_v50 = vsub.f32 1.5, %v775_v14  ;;  %vm660_vm14 = vweird.f32 %v2663_v12 }
  0xda   :  { %2022 = vrsqrt.f32 %v2759_v21  ;;  %v811_v41 = vmul.f32 %v2059_v44, %v803_v7  ;;  %v839_v44 = vperm.slane %v831_v8, 0  ;;  %v833_v14 = vrot.slane %v2621_v13, 5 }
  0xdb   :  { %v487_v18 = vmul.f32 0.5, %v486_v0  ;;  %v2785_v22 = vpop.xlane.xlu1 %536  ;;  %vm661_vm11 = vweird.f32 %v2750_v45  ;;  %vm670_vm4 = vweird.f32 %v2733_v33 }
  0xdc   :  { %867 = vadd.xlane.f32.xlu0 %v866_v2  ;;  %vm2881_vm10 = vmor %vm660_vm14, %vm661_vm11 }
  0xdd   :  { %v488_v29 = vsub.f32 1.5, %v487_v18  ;;  %v2788_v18 = vmul.f32 %v678_v30, %v2315_v46  ;;  %v832_v46 = vrot.slane %v2621_v13, 4 }
  0xde   :  { %v2763_v57 = vpop.eup %2018 }
  0xdf   :  { %v489_v62 = vmul.f32 %v2015_v42, %v488_v29  ;;  %v645_v17 = vmul.f32 %v2763_v57, %v2721_v39  ;;  %v2773_v56 = vpop.xlane.xlu0 %717  ;;  %v2782_v49 = vpop.eup %2020  ;;  %vm651_vm13 = vweird.f32 %v2763_v57 }
  0xe0   :  { %2024 = vrsqrt.f32 %v2773_v56  ;;  %v2802_v7 = vpop.eup %2022  ;;  %v665_v29 = vmul.f32 %v2782_v49, %v2733_v33  ;;  %vm2819_vm15 = vmor %vm650_vm8, %vm651_vm13  ;;  %vm788_vm12 = vweird.f32 %v2773_v56  ;;  %vm671_vm13 = vweird.f32 %v2782_v49 }
  0xe1   :  { %v493_v47 = vsel %vm492_vm6, %v2015_v42, %v489_v62  ;;  %v646_v0 = vmul.f32 %v2763_v57, %v645_v17  ;;  %v656_v42 = vmul.f32 %v2750_v45, %v655_v53  ;;  %2026 = vrsqrt.f32 %v2785_v22 }
  0xe2   :  { %v495_v36 = vmin.f32 %v493_v47, 1e+12  ;;  %v793_v39 = vmul.f32 %v2802_v7, %v2759_v21  ;;  %vm798_vm6 = vweird.f32 %v2759_v21  ;;  %vm799_vm14 = vweird.f32 %v2802_v7 }
  0xe3   :  { %v647_v4 = vmul.f32 0.5, %v646_v0  ;;  %v657_v30 = vmul.f32 0.5, %v656_v42  ;;  %v666_v0 = vmul.f32 %v2782_v49, %v665_v29 }
  0xe4   :  { %v2797_v2 = vmul.f32 %v495_v36, %v2428_v5 }
  0xe5   :  { %v648_v24 = vsub.f32 1.5, %v647_v4  ;;  %v667_v62 = vmul.f32 0.5, %v666_v0 }
  0xe6   :  { %v2807_v28 = vpop.eup %2024  ;;  %v892_v5 = vperm.slane %v2797_v2, 0  ;;  %v885_v43 = vrot.slane %v2797_v2, 1  ;;  %v886_v53 = vrot.slane %v2797_v2, 2  ;;  %v887_v38 = vrot.slane %v2797_v2, 3 }
  0xe7   :  { %v649_v63 = vmul.f32 %v2763_v57, %v648_v24  ;;  %v783_v17 = vmul.f32 %v2807_v28, %v2773_v56  ;;  %v2825_v3 = vpop.xlane.xlu0 %533  ;;  %vm789_vm7 = vweird.f32 %v2807_v28  ;;  %v841_v56 = vperm.slane %v833_v14, 0 }
  0xe8   :  { %2028 = vrsqrt.f32 %v2825_v3  ;;  %v908_v32 = vmul.f32 %v892_v5, %v810_v16  ;;  %v893_v47 = vperm.slane %v885_v43, 0  ;;  %v895_v36 = vperm.slane %v887_v38, 0  ;;  %v2837_v16 = vpop.eup %2026  ;;  %vm2860_vm5 = vmor %vm788_vm12, %vm789_vm7 }
  0xe9   :  { %v784_v25 = vmul.f32 %v2807_v28, %v783_v17  ;;  %v894_v24 = vperm.slane %v886_v53, 0  ;;  %v653_v8 = vsel %vm2819_vm15, %v2763_v57, %v649_v63  ;;  %v777_v43 = vmul.f32 %v2687_v20, %v776_v50  ;;  %vm2911_vm12 = vmor %vm670_vm4, %vm671_vm13 }
  0xea   :  { %v916_v42 = vsel %vm163_vm0, %v908_v32, 0.0  ;;  %v909_v4 = vmul.f32 %v893_v47, %v811_v41  ;;  %v911_v29 = vmul.f32 %v895_v36, %v2767_v60  ;;  %v658_v38 = vsub.f32 1.5, %v657_v30  ;;  %vm2924_vm7 = vmor %vm798_vm6, %vm799_vm14 }
  0xeb   :  { %v785_v5 = vmul.f32 0.5, %v784_v25  ;;  %917 = vadd.xlane.f32.xlu1 %v916_v42  ;;  %v679_v53 = vmin.f32 %v653_v8, 1e+12  ;;  %v794_v60 = vmul.f32 %v2802_v7, %v793_v39  ;;  %v549_v17 = vmul.f32 %v2837_v16, %v2785_v22 }
  0xec   :  { %v919_v41 = vsel %vm163_vm0, %v909_v4, 0.0  ;;  %v925_v50 = vsel %vm163_vm0, %v911_v29, 0.0  ;;  %v910_v32 = vmul.f32 %v894_v24, %v2777_v11  ;;  %v840_v25 = vperm.slane %v832_v46, 0 }
  0xed   :  { %v786_v63 = vsub.f32 1.5, %v785_v5  ;;  %920 = vadd.xlane.f32.xlu2 %v919_v41  ;;  %926 = vadd.xlane.f32.xlu0 %v925_v50  ;;  %v687_v47 = vmul.f32 %v679_v53, %v2393_v15  ;;  %v659_v36 = vmul.f32 %v2750_v45, %v658_v38  ;;  %v855_v42 = vmul.f32 %v839_v44, %v2780_v48 }
  0xee   :  { %v2029_v30 = vpop.eup %2028  ;;  %v888_v4 = vrot.slane %v2797_v2, 4  ;;  %v781_v11 = vsel %vm2848_vm9, %v2687_v20, %v777_v43  ;;  %v795_v46 = vmul.f32 0.5, %v794_v60  ;;  %v668_v44 = vsub.f32 1.5, %v667_v62 }
  0xef   :  { %v787_v0 = vmul.f32 %v2807_v28, %v786_v63  ;;  %v539_v39 = vmul.f32 %v2029_v30, %v2825_v3  ;;  %v857_v24 = vmul.f32 %v841_v56, %v687_v47  ;;  %v550_v8 = vmul.f32 %v2837_v16, %v549_v17 }
  0xf0   :  { %v922_v20 = vsel %vm163_vm0, %v910_v32, 0.0  ;;  %vm544_vm1 = vweird.f32 %v2825_v3  ;;  %vm545_vm8 = vweird.f32 %v2029_v30  ;;  %v890_v12 = vrot.slane %v2797_v2, 6 }
  0xf1   :  { %v540_v14 = vmul.f32 %v2029_v30, %v539_v39  ;;  %v791_v48 = vsel %vm2860_vm5, %v2807_v28, %v787_v0  ;;  %v869_v43 = vsel %vm163_vm0, %v855_v42, 0.0  ;;  %v896_v38 = vperm.slane %v888_v4, 0  ;;  %vm2900_vm15 = vmor %vm544_vm1, %vm545_vm8 }
  0xf2   :  { %v808_v5 = vmin.f32 %v791_v48, 1e+12  ;;  %v663_v28 = vsel %vm2881_vm10, %v2750_v45, %v659_v36  ;;  %v796_v41 = vsub.f32 1.5, %v795_v46  ;;  %v875_v57 = vsel %vm163_vm0, %v857_v24, 0.0 }
  0xf3   :  { %v541_v29 = vmul.f32 0.5, %v540_v14  ;;  %923 = vadd.xlane.f32.xlu1 %v922_v20  ;;  %v856_v63 = vmul.f32 %v840_v25, %v2788_v18  ;;  %v807_v50 = vmin.f32 %v781_v11, 1e+12  ;;  %v889_v62 = vrot.slane %v2797_v2, 5 }
  0xf4   :  { %v816_v3 = vmul.f32 %v808_v5, %v2425_v6  ;;  %v669_v45 = vmul.f32 %v2782_v49, %v668_v44  ;;  %v551_v59 = vmul.f32 0.5, %v550_v8  ;;  %v898_v32 = vperm.slane %v890_v12, 0 }
  0xf5   :  { %v542_v53 = vsub.f32 1.5, %v541_v29  ;;  %870 = vadd.xlane.f32.xlu2 %v869_v43  ;;  %876 = vadd.xlane.f32.xlu0 %v875_v57  ;;  %v912_v47 = vmul.f32 %v896_v38, %v2791_v9  ;;  %v680_v18 = vmin.f32 %v663_v28, 1e+12  ;;  %v797_v0 = vmul.f32 %v2802_v7, %v796_v41 }
  0xf6   :  { %v834_v39 = vrot.slane %v2621_v13, 6  ;;  %v914_v25 = vmul.f32 %v898_v32, %v816_v3  ;;  %v872_v36 = vsel %vm163_vm0, %v856_v63, 0.0  ;;  %v815_v9 = vmul.f32 %v807_v50, %v2372_v35 }
  0xf7   :  { %v543_v17 = vmul.f32 %v2029_v30, %v542_v53  ;;  %v897_v42 = vperm.slane %v889_v62, 0  ;;  %v552_v11 = vsub.f32 1.5, %v551_v59  ;;  %vm554_vm9 = vweird.f32 %v2785_v22 }
  0xf8   :  { %v928_v21 = vsel %vm163_vm0, %v912_v47, 0.0  ;;  %v688_v15 = vmul.f32 %v680_v18, %v2380_v54  ;;  %vm555_vm11 = vweird.f32 %v2837_v16  ;;  %v934_v46 = vsel %vm163_vm0, %v914_v25, 0.0 }
  0xf9   :  { %v547_v56 = vsel %vm2900_vm15, %v2029_v30, %v543_v17  ;;  %v673_v30 = vsel %vm2911_vm12, %v2782_v49, %v669_v45  ;;  %v801_v35 = vsel %vm2924_vm7, %v2802_v7, %v797_v0  ;;  %v913_v24 = vmul.f32 %v897_v42, %v815_v9  ;;  %vm2943_vm4 = vmor %vm554_vm9, %vm555_vm11 }
  0xfa   :  { %v558_v4 = vmin.f32 %v547_v56, 1e+12  ;;  %v842_v48 = vperm.slane %v834_v39, 0  ;;  %v681_v49 = vmin.f32 %v673_v30, 1e+12  ;;  %v553_v22 = vmul.f32 %v2837_v16, %v552_v11 }
  0xfb   :  { %873 = vadd.xlane.f32.xlu1 %v872_v36  ;;  %v835_v8 = vrot.slane %v2621_v13, 7  ;;  %v809_v20 = vmin.f32 %v801_v35, 1e+12  ;;  %v931_v7 = vsel %vm163_vm0, %v913_v24, 0.0  ;;  %v891_v29 = vrot.slane %v2797_v2, 7 }
  0xfc   :  { %v560_v14 = vmul.f32 %v558_v4, %v2514_v40  ;;  %v858_v54 = vmul.f32 %v842_v48, %v688_v15  ;;  %v689_v40 = vmul.f32 %v681_v49, %v2400_v26  ;;  %v557_v12 = vsel %vm2943_vm4, %v2837_v16, %v553_v22 }
  0xfd   :  { %929 = vadd.xlane.f32.xlu2 %v928_v21  ;;  %935 = vadd.xlane.f32.xlu0 %v934_v46  ;;  %v843_v38 = vperm.slane %v835_v8, 0  ;;  %v817_v28 = vmul.f32 %v809_v20, %v2416_v55  ;;  %v899_v53 = vperm.slane %v891_v29, 0  ;;  %v559_v57 = vmin.f32 %v557_v12, 1e+12  ;;  %v3544_v8 = vld [vmem:[#allocation12_spill] sm:$0xff] }
  0xfe   :  { %v818_v5 = vmul.f32 %v560_v14, %v2621_v13  ;;  %v878_v43 = vsel %vm163_vm0, %v858_v54, 0.0  ;;  %v1044_v32 = vmul.f32 %v2285_v27, %v2285_v27  ;;  %v1046_v18 = vmul.f32 %v2364_v58, %v2364_v58 }
  0xff   :  { %v859_v13 = vmul.f32 %v843_v38, %v689_v40  ;;  %v915_v26 = vmul.f32 %v899_v53, %v817_v28  ;;  %v561_v60 = vmul.f32 %v559_v57, %v2492_v19  ;;  %v1045_v19 = vmul.f32 %v2301_v52, %v2301_v52  ;;  %v3545_v40 = vld [vmem:[#allocation18_spill] sm:$0xff] }
 0x100   :  { %v820_v41 = vsel %vm163_vm0, %v818_v5, 0.0  ;;  %v1048_v0 = vmul.f32 %v2470_v61, %v2470_v61  ;;  %v1083_v39 = vmul.f32 %v2281_v23, %v2281_v23  ;;  %v1084_v27 = vmul.f32 %v2290_v37, %v2290_v37 }
 0x101   :  { %v881_v3 = vsel %vm163_vm0, %v859_v13, 0.0  ;;  %v937_v16 = vsel %vm163_vm0, %v915_v26, 0.0  ;;  %v819_v63 = vmul.f32 %v561_v60, %v2797_v2  ;;  %v1047_v2 = vmul.f32 %v2298_v51, %v2298_v51 }
 0x102   :  { %v1049_v52 = vmul.f32 %v2482_v10, %v2482_v10  ;;  %v1060_v56 = vsel %vm435_vm2, %v1045_v19, %v1044_v32  ;;  %v1085_v58 = vmul.f32 %v2277_v1, %v2277_v1  ;;  %v1050_v51 = vmul.f32 %v2507_v34, %v2507_v34  ;;  %v3554_v32 = vld [vmem:[#allocation23_spill] sm:$0xff] }
 0x103   :  { %932 = vadd.xlane.f32.xlu1 %v931_v7  ;;  %v823_v55 = vsel %vm163_vm0, %v819_v63, 0.0  ;;  %v1061_v61 = vsel %vm437_vm3, %v1046_v18, %v1060_v56  ;;  %v1051_v23 = vmul.f32 %v2501_v31, %v2501_v31  ;;  %vm3539_vm5 = vcmask 1043459  }
 0x104   :  { %v1062_v33 = vsel %vm3539_vm5, %v1047_v2, %v1061_v61  ;;  %vm3540_vm6 = vcmask 1044484   ;;  %vm3541_vm10 = vcmask 1045509   ;;  %v1099_v10 = vsel %vm435_vm2, %v1084_v27, %v1083_v39  ;;  %vm3546_vm13 = vmmov %vm3539_vm5  ;;  %v3557_v2 = vld [vmem:[#allocation16_spill] sm:$0xff] }
 0x105   :  { %879 = vadd.xlane.f32.xlu2 %v878_v43  ;;  %821 = vadd.xlane.f32.xlu0 %v820_v41  ;;  %v1063_v37 = vsel %vm3540_vm6, %v1048_v0, %v1062_v33  ;;  %vm3542_vm1 = vcmask 1046534   ;;  %v1100_v1 = vsel %vm437_vm3, %v1085_v58, %v1099_v10  ;;  %vm3543_vm8 = vcmask 1047559   ;;  %vm3547_vm14 = vmmov %vm3540_vm6  ;;  %v3562_v33 = vld [vmem:[#allocation24_spill] sm:$0xff] }
 0x106   :  { %v1064_v36 = vsel %vm3541_vm10, %v1049_v52, %v1063_v37  ;;  %v948_v4 = vlaneseq  ;;  %v1086_v29 = vmul.f32 %v3545_v40, %v3545_v40  ;;  %vm3549_vm15 = vmmov %vm3539_vm5  ;;  %v1088_v19 = vmul.f32 %v3554_v32, %v3554_v32  ;;  %v3559_v52 = vld [vmem:[#allocation22_spill] sm:$0xff]  ;;  %v86_v40 = vld [vmem:[%s3465_s0] sm:$0xff] }
 0x107   :  { %v1065_v9 = vsel %vm3542_vm1, %v1050_v51, %v1064_v36  ;;  %vm3550_vm12 = vmmov %vm3539_vm5  ;;  %v1089_v56 = vmul.f32 %v3559_v52, %v3559_v52  ;;  %v1090_v37 = vmul.f32 %v3562_v33, %v3562_v33 }
 0x108   :  { %v1066_v34 = vsel %vm3543_vm8, %v1051_v23, %v1065_v9  ;;  %v2996_v21 = vand.u32 127, %v948_v4  ;;  %v1101_v63 = vsel %vm3550_vm12, %v1086_v29, %v1100_v1  ;;  %vm3551_vm7 = vmmov %vm3540_vm6  ;;  %v3049_v9 = vld [vmem:[%s3466_s1] sm:$0xff]  ;;  %v142_v29 = vsub.f32 1.0, %v86_v40 }
 0x109   :  { %v1068_v11 = vsel %vm163_vm0, %v1066_v34, 0.0  ;;  %vm3552_vm9 = vmmov %vm3541_vm10  ;;  %vm992_vm10 = vcmask 64512  }
 0x10a   :  { %vm3553_vm11 = vmmov %vm3552_vm9 }
 0x10b   :  { %882 = vadd.xlane.f32.xlu1 %v881_v3  ;;  %v3548_v3 = vld [vmem:[#allocation21_spill] sm:$0xff]  ;;  %vm3555_vm4 = vmmov %vm3542_vm1 }
 0x10c   :  { %v1087_v60 = vmul.f32 %v3548_v3, %v3548_v3  ;;  %vm3556_vm5 = vmmov %vm3540_vm6 }
 0x10d   :  { %938 = vadd.xlane.f32.xlu2 %v937_v16  ;;  %vm3558_vm6 = vmmov %vm3543_vm8 }
 0x10e   :  { %v1102_v18 = vsel %vm3556_vm5, %v1087_v60, %v1101_v63  ;;  %vm3560_vm8 = vmmov %vm3558_vm6  ;;  %vm1239_vm5 = vcmp.eq.f32.partialorder %v3049_v9, 1.0 }
 0x10f   :  { %vm3564_vm12 = vmmov %vm3558_vm6 }
 0x113   :  { %824 = vadd.xlane.f32.xlu1 %v823_v55 }
 0x11b   :  { %1069 = vadd.xlane.f32.xlu1 %v1068_v11  ;;  %v3565_v11 = vld [vmem:[#allocation14_spill] sm:$0xff] }
 0x123   :  { %1138 = vadd.xlane.f32.xlu1 %v3544_v8 }
 0x12b   :  { %1146 = vadd.xlane.f32.xlu1 %v3557_v2 }
 0x145   :  { %v862_v62 = vpop.xlane.xlu2 %861 }
 0x146   :  { %v950_v48 = vperm.slane %v862_v62, %v2996_v21 }
 0x147   :  { %v865_v50 = vpop.xlane.xlu0 %864 }
 0x148   :  { %v951_v15 = vperm.slane %v865_v50, %v2996_v21 }
 0x14a   :  { %v958_v20 = vsel %vm435_vm2, %v951_v15, %v950_v48  ;;  %v3568_v15 = vld [vmem:[#allocation17_spill] sm:$0xff] }
 0x14f   :  { %v868_v45 = vpop.xlane.xlu0 %867 }
 0x150   :  { %v952_v35 = vperm.slane %v868_v45, %v2996_v21 }
 0x152   :  { %v959_v12 = vsel %vm437_vm3, %v952_v35, %v958_v20 }
 0x15e   :  { %v918_v59 = vpop.xlane.xlu1 %917 }
 0x15f   :  { %v974_v49 = vperm.slane %v918_v59, %v2996_v21 }
 0x160   :  { %v921_v17 = vpop.xlane.xlu2 %920  ;;  %v927_v47 = vpop.xlane.xlu0 %926 }
 0x161   :  { %v975_v46 = vperm.slane %v921_v17, %v2996_v21  ;;  %v977_v7 = vperm.slane %v927_v47, %v2996_v21 }
 0x163   :  { %v982_v5 = vsel %vm435_vm2, %v975_v46, %v974_v49 }
 0x166   :  { %v924_v6 = vpop.xlane.xlu1 %923 }
 0x167   :  { %v976_v14 = vperm.slane %v924_v6, %v2996_v21 }
 0x168   :  { %v871_v25 = vpop.xlane.xlu2 %870  ;;  %v877_v31 = vpop.xlane.xlu0 %876 }
 0x169   :  { %v953_v22 = vperm.slane %v871_v25, %v2996_v21  ;;  %v983_v43 = vsel %vm437_vm3, %v976_v14, %v982_v5  ;;  %v955_v41 = vperm.slane %v877_v31, %v2996_v21  ;;  %v3567_v31 = vld [vmem:[#allocation15_spill] sm:$0xff] }
 0x16a   :  { %v984_v16 = vsel %vm3549_vm15, %v977_v7, %v983_v43  ;;  %vm120_vm15 = vcmask 31744  }
 0x16b   :  { %v960_v28 = vsel %vm3546_vm13, %v953_v22, %v959_v12  ;;  %vm3561_vm13 = vmmov %vm3552_vm9 }
 0x16c   :  { %v1103_v51 = vsel %vm3561_vm13, %v1088_v19, %v1102_v18  ;;  %vm3571_vm13 = vcmask 1043459  }
 0x16e   :  { %v874_v42 = vpop.xlane.xlu1 %873 }
 0x16f   :  { %v954_v44 = vperm.slane %v874_v42, %v2996_v21  ;;  %v121_v42 = vsel %vm120_vm15, %v3049_v9, 0.0 }
 0x170   :  { %v930_v30 = vpop.xlane.xlu2 %929  ;;  %v936_v53 = vpop.xlane.xlu0 %935 }
 0x171   :  { %v978_v38 = vperm.slane %v930_v30, %v2996_v21  ;;  %v961_v57 = vsel %vm3547_vm14, %v954_v44, %v960_v28  ;;  %v980_v50 = vperm.slane %v936_v53, %v2996_v21  ;;  %vm3563_vm14 = vmmov %vm3542_vm1  ;;  %v3566_v30 = vld [vmem:[#allocation13_spill] sm:$0xff] }
 0x172   :  { %v962_v45 = vsel %vm3552_vm9, %v955_v41, %v961_v57  ;;  %v1104_v10 = vsel %vm3563_vm14, %v1089_v56, %v1103_v51 }
 0x173   :  { %v985_v55 = vsel %vm3551_vm7, %v978_v38, %v984_v16  ;;  %v1105_v1 = vsel %vm3564_vm12, %v1090_v37, %v1104_v10 }
 0x174   :  { %v1107_v34 = vsel %vm163_vm0, %v1105_v1, 0.0 }
 0x176   :  { %v933_v24 = vpop.xlane.xlu1 %932 }
 0x177   :  { %v979_v13 = vperm.slane %v933_v24, %v2996_v21 }
 0x178   :  { %v880_v54 = vpop.xlane.xlu2 %879  ;;  %v822_v46 = vpop.xlane.xlu0 %821 }
 0x179   :  { %v956_v26 = vperm.slane %v880_v54, %v2996_v21  ;;  %v986_v59 = vsel %vm3553_vm11, %v979_v13, %v985_v55  ;;  %v3059_v14 = vmul.f32 14.285714, %v822_v46  ;;  %v3569_v55 = vld [vmem:[#allocation20_spill] sm:$0xff] }
 0x17a   :  { %v987_v25 = vsel %vm3542_vm1, %v980_v50, %v986_v59  ;;  %v3570_v59 = vld [vmem:[#allocation19_spill] sm:$0xff] }
 0x17b   :  { %v963_v47 = vsel %vm3555_vm4, %v956_v26, %v962_v45 }
 0x17e   :  { %v883_v62 = vpop.xlane.xlu1 %882 }
 0x17f   :  { %v957_v17 = vperm.slane %v883_v62, %v2996_v21 }
 0x180   :  { %v939_v6 = vpop.xlane.xlu2 %938 }
 0x181   :  { %v981_v0 = vperm.slane %v939_v6, %v2996_v21  ;;  %v964_v39 = vsel %vm3558_vm6, %v957_v17, %v963_v47  ;;  %vm1029_vm6 = vcmask 7168  }
 0x182   :  { %v990_v27 = vmul.f32 14.285714, %v964_v39 }
 0x183   :  { %v988_v58 = vsel %vm3560_vm8, %v981_v0, %v987_v25  ;;  %v2171_v25 = vmov 32.0  }
 0x184   :  { %v993_v61 = vsel %vm992_vm10, %v990_v27, -inf  ;;  %v991_v23 = vmul.f32 14.285714, %v988_v58 }
 0x185   :  { %994 = vmax.xlane.f32.xlu2 %v993_v61 }
 0x186   :  { %v996_v36 = vsel %vm992_vm10, %v991_v23, -inf  ;;  %v825_v35 = vpop.xlane.xlu1 %824 }
 0x187   :  { %997 = vmax.xlane.f32.xlu0 %v996_v36  ;;  %v3061_v48 = vmul.f32 14.285714, %v825_v35 }
 0x18d   :  { %122 = vadd.xlane.f32.xlu2 %v121_v42 }
 0x18e   :  { %v3080_v56 = vpop.xlane.xlu1 %1069 }
 0x18f   :  { %1108 = vadd.xlane.f32.xlu0 %v1107_v34  ;;  %vm1078_vm1 = vcmp.eq.f32.partialorder %v3080_v56, inf  ;;  %vm1080_vm8 = vcmp.eq.f32.partialorder %v3080_v56, 0.0 }
 0x195   :  { %1140 = vadd.xlane.f32.xlu2 %v3565_v11 }
 0x196   :  { %v1139_v1 = vpop.xlane.xlu1 %1138 }
 0x197   :  { %1144 = vadd.xlane.f32.xlu0 %v3566_v30 }
 0x19d   :  { %1142 = vadd.xlane.f32.xlu2 %v3567_v31 }
 0x1a5   :  { %1148 = vadd.xlane.f32.xlu2 %v3568_v15 }
 0x1f8   :  { %v995_v24 = vpop.xlane.xlu2 %994 }
 0x1f9   :  { %v3064_v49 = vmax.f32 %v3059_v14, %v995_v24 }
 0x1fa   :  { %v998_v22 = vpop.xlane.xlu0 %997 }
 0x1fb   :  { %v1007_v44 = vsub.f32 %v990_v27, %v3064_v49  ;;  %v3068_v54 = vmax.f32 %v3061_v48, %v998_v22  ;;  %v1001_v11 = vsub.f32 %v3059_v14, %v3064_v49 }
 0x1fd   :  { %v1009_v8 = vmul.f32 1.442695, %v1007_v44  ;;  %v1008_v20 = vsub.f32 %v991_v23, %v3068_v54  ;;  %v1002_v31 = vsub.f32 %v3061_v48, %v3068_v54  ;;  %v1003_v24 = vmul.f32 1.442695, %v1001_v11 }
 0x1ff   :  { %v1011_v5 = vmul.f32 1.442695, %v1008_v20  ;;  %2030 = vpow2.f32 %v1009_v8  ;;  %v1005_v8 = vmul.f32 1.442695, %v1002_v31 }
 0x200   :  { %v123_v7 = vpop.xlane.xlu2 %122 }
 0x201   :  { %2032 = vpow2.f32 %v1011_v5  ;;  %v135_v57 = vand.u32 2147483648, %v123_v7  ;;  %vm129_vm0 = vweird.f32 %v123_v7  ;;  %v133_v3 = vand.u32 2147483647, %v123_v7 }
 0x202   :  { %2034 = vrcp.f32 %v123_v7  ;;  %v3083_v61 = vpop.xlane.xlu0 %1108 }
 0x203   :  { %2036 = vlog2.f32 %v86_v40  ;;  %v136_v50 = vor.u32 1.1754944e-38, %v135_v57  ;;  %vm134_vm11 = vcmp.eq.f32.partialorder %v133_v3, 8.507059e+37  ;;  %vm1117_vm14 = vcmp.eq.f32.partialorder %v3083_v61, inf }
 0x204   :  { %2038 = vlog2.f32 %v142_v29  ;;  %vm1119_vm12 = vcmp.eq.f32.partialorder %v3083_v61, 0.0 }
 0x205   :  { %v2031_v12 = vpop.eup %2030  ;;  %2040 = vrcp.f32 %v2171_v25 }
 0x206   :  { %v1013_v43 = vsel %vm992_vm10, %v2031_v12, 0.0  ;;  %2042 = vrsqrt.f32 %v3080_v56 }
 0x207   :  { %v2033_v38 = vpop.eup %2032  ;;  %1014 = vadd.xlane.f32.xlu0 %v1013_v43  ;;  %2044 = vrsqrt.f32 %v3083_v61  ;;  %v1147_v43 = vpop.xlane.xlu1 %1146 }
 0x208   :  { %v1016_v28 = vsel %vm992_vm10, %v2033_v38, 0.0  ;;  %v2035_v41 = vpop.eup %2034  ;;  %v1141_v37 = vpop.xlane.xlu2 %1140  ;;  %2046 = vpow2.f32 %v1003_v24 }
 0x209   :  { %1017 = vadd.xlane.f32.xlu1 %v1016_v28  ;;  %v125_v13 = vmul.f32 %v2035_v41, %v123_v7  ;;  %v2037_v53 = vpop.eup %2036  ;;  %vm130_vm7 = vweird.f32 %v2035_v41  ;;  %2048 = vpow2.f32 %v1005_v8  ;;  %v1120_v8 = vand.u32 2147483648, %v3083_v61 }
 0x20a   :  { %v2039_v60 = vpop.eup %2038  ;;  %v140_v63 = vmul.f32 0.6931472, %v2037_v53  ;;  %vm131_vm9 = vmor %vm129_vm0, %vm130_vm7  ;;  %v1145_v20 = vpop.xlane.xlu0 %1144  ;;  %vm3573_vm0 = vcmask 1045509   ;;  %vm3574_vm7 = vcmask 1046534  }
 0x20b   :  { %v126_v26 = vsub.f32 1.0, %v125_v13  ;;  %v144_v45 = vmul.f32 0.6931472, %v2039_v60  ;;  %v2041_v52 = vpop.eup %2040 }
 0x20c   :  { %v141_v32 = vmax.f32 %v140_v63, -100.0  ;;  %v1155_v58 = vmul.f32 32.0, %v2041_v52  ;;  %v2043_v23 = vpop.eup %2042  ;;  %vm1159_vm4 = vweird.f32 %v2041_v52 }
 0x20d   :  { %v127_v16 = vmul.f32 %v2035_v41, %v126_v26  ;;  %v145_v47 = vmax.f32 %v144_v45, -100.0  ;;  %v1072_v36 = vmul.f32 %v2043_v23, %v3080_v56  ;;  %v2045_v34 = vpop.eup %2044  ;;  %v2172_v26 = vmov 0.0  }
 0x20e   :  { %v1156_v51 = vsub.f32 1.0, %v1155_v58  ;;  %v1111_v15 = vmul.f32 %v2045_v34, %v3083_v61  ;;  %v3118_v3 = vsel %vm1239_vm5, 1.0, %v2172_v26 }
 0x20f   :  { %1150 = vadd.xlane.f32.xlu0 %v3569_v55  ;;  %v128_v62 = vadd.f32 %v2035_v41, %v127_v16  ;;  %v1073_v42 = vmul.f32 %v2043_v23, %v1072_v36  ;;  %v1245_v63 = vsel %vm1029_vm6, %v3118_v3, 0.0  ;;  %v2047_v55 = vpop.eup %2046 }
 0x210   :  { %v1157_v33 = vmul.f32 %v2041_v52, %v1156_v51  ;;  %v1143_v35 = vpop.xlane.xlu2 %1142  ;;  %v1112_v7 = vmul.f32 %v2045_v34, %v1111_v15 }
 0x211   :  { %1152 = vadd.xlane.f32.xlu1 %v3570_v59  ;;  %v132_v17 = vsel %vm131_vm9, %v2035_v41, %v128_v62  ;;  %v1074_v46 = vmul.f32 0.5, %v1073_v42  ;;  %vm3575_vm9 = vcmask 1047559  }
 0x212   :  { %v137_v19 = vsel %vm134_vm11, %v136_v50, %v132_v17  ;;  %v1158_v10 = vadd.f32 %v2041_v52, %v1157_v33  ;;  %v1113_v41 = vmul.f32 0.5, %v1112_v7 }
 0x213   :  { %v138_v6 = vmul.f32 %v137_v19, %v3049_v9  ;;  %v1075_v5 = vsub.f32 1.5, %v1074_v46  ;;  %v2049_v19 = vpop.eup %2048 }
 0x214   :  { %v3089_v30 = vsel %vm1159_vm4, %v2041_v52, %v1158_v10  ;;  %v1114_v59 = vsub.f32 1.5, %v1113_v41 }
 0x215   :  { %v146_v18 = vmul.f32 %v141_v32, %v138_v6  ;;  %v147_v2 = vsub.f32 1.0, %v138_v6  ;;  %v3095_v22 = vmul.f32 %v3089_v30, %v1141_v37  ;;  %v3098_v44 = vmul.f32 %v3089_v30, %v1139_v1 }
 0x216   :  { %v3101_v40 = vmul.f32 %v3089_v30, %v1143_v35  ;;  %v3109_v38 = vmul.f32 %v3089_v30, %v1145_v20  ;;  %v1076_v28 = vmul.f32 %v2043_v23, %v1075_v5  ;;  %v3121_v60 = vmul.f32 %v3089_v30, %v1147_v43 }
 0x217   :  { %v148_v0 = vmul.f32 %v147_v2, %v145_v47  ;;  %v1170_v29 = vmul.f32 %v3095_v22, %v3095_v22  ;;  %v1169_v12 = vmul.f32 %v3098_v44, %v3098_v44  ;;  %v1115_v52 = vmul.f32 %v2045_v34, %v1114_v59 }
 0x218   :  { %v1171_v13 = vmul.f32 %v3101_v40, %v3101_v40  ;;  %v1149_v16 = vpop.xlane.xlu2 %1148  ;;  %v1172_v50 = vmul.f32 %v3109_v38, %v3109_v38  ;;  %v1077_v45 = vmul.f32 %v1076_v28, %v3080_v56  ;;  %v1173_v2 = vmul.f32 %v3121_v60, %v3121_v60 }
 0x219   :  { %v149_v39 = vadd.f32 %v148_v0, %v146_v18  ;;  %v1186_v53 = vperm.slane %v1170_v29, %v2996_v21  ;;  %v1185_v57 = vperm.slane %v1169_v12, %v2996_v21  ;;  %v3132_v47 = vmul.f32 %v3089_v30, %v1149_v16 }
 0x21a   :  { %v1187_v17 = vperm.slane %v1171_v13, %v2996_v21  ;;  %v1079_v25 = vsel %vm1078_vm1, %v3080_v56, %v1077_v45  ;;  %v1189_v23 = vperm.slane %v1173_v2, %v2996_v21  ;;  %v1116_v10 = vmul.f32 %v1115_v52, %v3083_v61 }
 0x21b   :  { %v150_v27 = vsel %vm120_vm15, %v149_v39, 0.0  ;;  %v1193_v6 = vsel %vm435_vm2, %v1186_v53, %v1185_v57  ;;  %v1081_v39 = vand.u32 2147483648, %v3080_v56  ;;  %v1174_v51 = vmul.f32 %v3132_v47, %v3132_v47 }
 0x21c   :  { %151 = vadd.xlane.f32.xlu0 %v150_v27  ;;  %v1188_v27 = vperm.slane %v1172_v50, %v2996_v21  ;;  %v1194_v58 = vsel %vm437_vm3, %v1187_v17, %v1193_v6  ;;  %vm3572_vm15 = vcmask 1044484   ;;  %v1118_v7 = vsel %vm1117_vm14, %v3083_v61, %v1116_v10 }
 0x21d   :  { %v1082_v33 = vsel %vm1080_vm8, %v1081_v39, %v1079_v25  ;;  %v1190_v56 = vperm.slane %v1174_v51, %v2996_v21  ;;  %v1121_v53 = vsel %vm1119_vm12, %v1120_v8, %v1118_v7  ;;  %v3170_v57 = vshrl.u32 %v948_v4, 7 }
 0x21e   :  { %v1195_v37 = vsel %vm3571_vm13, %v1188_v27, %v1194_v58  ;;  %v1122_v31 = vsub.f32 150.0, %v1082_v33  ;;  %v2173_v39 = vmov 0   ;;  %vm1892_vm8 = vcmp.eq.s32.totalorder %v2996_v21, 1 }
 0x21f   :  { %v1196_v24 = vsel %vm3572_vm15, %v1189_v23, %v1195_v37  ;;  %1979 = vset.pattern.permute.xlu1 %v2173_v39  ;;  %1978 = vset.pattern.permute.xlu0 %v2173_v39  ;;  %vm1890_vm13 = vcmp.eq.s32.totalorder %v2996_v21, 0  ;;  %vm1895_vm14 = vcmp.eq.s32.totalorder %v2996_v21, 2  ;;  %vm3576_vm15 = vcmask 1043459  }
 0x220   :  { %v1123_v41 = vmax.f32 %v1122_v31, 0.0  ;;  %1977 = vset.pattern.permute.xlu2 %v2173_v39  ;;  %vm3577_vm12 = vcmask 1044484  }
 0x224   :  { %1246 = vadd.xlane.f32.xlu0 %v1245_v63 }
 0x27a   :  { %v1015_v62 = vpop.xlane.xlu0 %1014 }
 0x27b   :  { %v1019_v32 = vadd.f32 %v2047_v55, %v1015_v62  ;;  %v3178_v62 = vcvt.s32.f32 %v3170_v57 }
 0x27c   :  { %v1018_v18 = vpop.xlane.xlu1 %1017 }
 0x27d   :  { %2050 = vlog2.f32 %v1019_v32  ;;  %v1020_v0 = vadd.f32 %v2049_v19, %v1018_v18 }
 0x27f   :  { %2052 = vlog2.f32 %v1020_v0 }
 0x282   :  { %v1151_v36 = vpop.xlane.xlu0 %1150 }
 0x283   :  { %v2051_v1 = vpop.eup %2050  ;;  %v3147_v42 = vmul.f32 %v3089_v30, %v1151_v36 }
 0x284   :  { %v1022_v34 = vmul.f32 0.6931472, %v2051_v1  ;;  %v1153_v11 = vpop.xlane.xlu1 %1152 }
 0x285   :  { %v2053_v15 = vpop.eup %2052  ;;  %v1175_v46 = vmul.f32 %v3147_v42, %v3147_v42  ;;  %v3154_v35 = vmul.f32 %v3089_v30, %v1153_v11  ;;  %v1197_v30 = vsel %vm3573_vm0, %v1190_v56, %v1196_v24 }
 0x286   :  { %v1025_v20 = vadd.f32 %v1022_v34, %v3064_v49  ;;  %v1024_v5 = vmul.f32 0.6931472, %v2053_v15 }
 0x287   :  { %v1191_v29 = vperm.slane %v1175_v46, %v2996_v21  ;;  %v1176_v12 = vmul.f32 %v3154_v35, %v3154_v35 }
 0x288   :  { %v1026_v43 = vadd.f32 %v1024_v5, %v3068_v54  ;;  %v1027_v28 = vsub.f32 %v1025_v20, %v3059_v14  ;;  %v1124_v14 = vadd.f32 %v1123_v41, %v1121_v53 }
 0x289   :  { %v1192_v13 = vperm.slane %v1176_v12, %v2996_v21  ;;  %v1198_v49 = vsel %vm3574_vm7, %v1191_v29, %v1197_v30 }
 0x28a   :  { %v1028_v61 = vsub.f32 %v1026_v43, %v3061_v48  ;;  %v1030_v54 = vsel %vm1029_vm6, %v1027_v28, 0.0  ;;  %v1125_v45 = vmul.f32 %v1124_v14, %v1124_v14  ;;  %v3183_v48 = vsel %vm1239_vm5, %v3178_v62, -1.0 }
 0x28b   :  { %v1199_v16 = vsel %vm3575_vm9, %v1192_v13, %v1198_v49  ;;  %v1257_v19 = vsel %vm1029_vm6, %v3183_v48, -inf  ;;  %vm3578_vm9 = vcmask 1046534  }
 0x28c   :  { %v1201_v63 = vsel %vm992_vm10, %v1199_v16, 0.0  ;;  %v1031_v55 = vsel %vm1029_vm6, %v1028_v61, 0.0  ;;  %v1126_v32 = vsel %vm1029_vm6, %v1125_v45, 0.0 }
 0x28d   :  { %1202 = vadd.xlane.f32.xlu2 %v1201_v63  ;;  %v1032_v50 = vadd.f32 %v1031_v55, %v1030_v54 }
 0x28f   :  { %1033 = vadd.xlane.f32.xlu1 %v1032_v50  ;;  %v152_v4 = vpop.xlane.xlu0 %151 }
 0x290   :  { %v153_v59 = vrot.slane %v152_v4, 4 }
 0x292   :  { %v154_v17 = vadd.f32 %v153_v59, %v152_v4 }
 0x294   :  { %v155_v6 = vrot.slane %v154_v17, 2 }
 0x295   :  { %1127 = vadd.xlane.f32.xlu2 %v1126_v32 }
 0x296   :  { %v156_v18 = vadd.f32 %v155_v6, %v154_v17 }
 0x297   :  { %1258 = vmax.xlane.f32.xlu1 %v1257_v19  ;;  %v1247_v63 = vpop.xlane.xlu0 %1246 }
 0x298   :  { %v157_v2 = vrot.slane %v156_v18, 1  ;;  %v1248_v14 = vrot.slane %v1247_v63, 4 }
 0x29a   :  { %v158_v0 = vadd.f32 %v157_v2, %v156_v18 }
 0x29c   :  { %1917 = vpush %v158_v0 }
 0x2cd   :  { %s1918_s0 = spop %1917 }
 0x2ce   :  { %v160_v18 = vstv %s1918_s0 }
 0x300   :  { %v1203_v27 = vpop.xlane.xlu2 %1202 }
 0x301   :  { %2054 = vrsqrt.f32 %v1203_v27  ;;  %vm1210_vm4 = vweird.f32 %v1203_v27 }
 0x302   :  { %v1034_v25 = vpop.xlane.xlu1 %1033 }
 0x303   :  { %v1035_v52 = vrot.slane %v1034_v25, 4 }
 0x305   :  { %v1036_v58 = vadd.f32 %v1035_v52, %v1034_v25 }
 0x307   :  { %v2055_v51 = vpop.eup %2054  ;;  %v1037_v23 = vrot.slane %v1036_v58, 2 }
 0x308   :  { %v1205_v33 = vmul.f32 %v2055_v51, %v1203_v27  ;;  %v1128_v37 = vpop.xlane.xlu2 %1127  ;;  %vm1211_vm11 = vweird.f32 %v2055_v51 }
 0x309   :  { %v1129_v36 = vrot.slane %v1128_v37, 4  ;;  %v1038_v10 = vadd.f32 %v1037_v23, %v1036_v58  ;;  %vm1212_vm1 = vmor %vm1210_vm4, %vm1211_vm11  ;;  %vm3579_vm11 = vcmask 1047559  }
 0x30a   :  { %v1206_v1 = vmul.f32 %v2055_v51, %v1205_v33  ;;  %vm3580_vm4 = vmmov %vm3576_vm15 }
 0x30b   :  { %v1130_v56 = vadd.f32 %v1129_v36, %v1128_v37  ;;  %v1039_v34 = vrot.slane %v1038_v10, 1 }
 0x30c   :  { %v1207_v11 = vmul.f32 0.5, %v1206_v1 }
 0x30d   :  { %v1131_v31 = vrot.slane %v1130_v56, 2  ;;  %v1040_v15 = vadd.f32 %v1039_v34, %v1038_v10 }
 0x30e   :  { %v1208_v46 = vsub.f32 1.5, %v1207_v11 }
 0x30f   :  { %1919 = vpush %v1040_v15  ;;  %v1132_v24 = vadd.f32 %v1131_v31, %v1130_v56 }
 0x310   :  { %v1209_v8 = vmul.f32 %v2055_v51, %v1208_v46 }
 0x311   :  { %v1133_v20 = vrot.slane %v1132_v24, 1 }
 0x312   :  { %v1213_v5 = vsel %vm1212_vm1, %v2055_v51, %v1209_v8  ;;  %vm3581_vm1 = vmmov %vm3577_vm12 }
 0x313   :  { %v1134_v7 = vadd.f32 %v1133_v20, %v1132_v24  ;;  %v1217_v29 = vperm.slane %v1213_v5, 2  ;;  %v1215_v12 = vperm.slane %v1213_v5, 0  ;;  %v1216_v43 = vperm.slane %v1213_v5, 1 }
 0x314   :  { %v1220_v13 = vperm.slane %v1213_v5, 5  ;;  %v1218_v49 = vperm.slane %v1213_v5, 3 }
 0x315   :  { %1921 = vpush %v1134_v7  ;;  %v3192_v30 = vmul.f32 %v1217_v29, %v3101_v40  ;;  %v3195_v28 = vmul.f32 %v1215_v12, %v3098_v44  ;;  %v3198_v41 = vmul.f32 %v1216_v43, %v3095_v22  ;;  %v1222_v22 = vperm.slane %v1213_v5, 7 }
 0x316   :  { %v3204_v53 = vmul.f32 %v1220_v13, %v3132_v47  ;;  %v3207_v40 = vmul.f32 %v1218_v49, %v3109_v38  ;;  %v1219_v44 = vperm.slane %v1213_v5, 4  ;;  %v1221_v38 = vperm.slane %v1213_v5, 6  ;;  %v1259_v47 = vpop.xlane.xlu1 %1258 }
 0x317   :  { %1286 = vperm.xlu1 %1979, %v3192_v30   ;;  %1280 = vperm.xlu2 %1977, %v3195_v28   ;;  %v3213_v61 = vmul.f32 %v1222_v22, %v3154_v35  ;;  %v1260_v55 = vrot.slane %v1259_v47, 4  ;;  %v1249_v35 = vadd.f32 %v1248_v14, %v1247_v63 }
 0x318   :  { %1283 = vperm.xlu0 %1978, %v3198_v41   ;;  %v3216_v16 = vmul.f32 %v1219_v44, %v3121_v60  ;;  %v3221_v54 = vmul.f32 %v1221_v38, %v3147_v42  ;;  %v161_v42 = vmul.f32 0.03125, %v160_v18 }
 0x319   :  { %v1261_v50 = vmax.f32 %v1259_v47, %v1260_v55  ;;  %v1250_v4 = vrot.slane %v1249_v35, 2 }
 0x31a   :  { %v162_v27 = vsub.f32 0.0, %v161_v42 }
 0x31b   :  { %v1262_v45 = vrot.slane %v1261_v50, 2  ;;  %v1251_v60 = vadd.f32 %v1250_v4, %v1249_v35 }
 0x31c   :  { %v1891_v51 = vsel %vm1890_vm13, %v162_v27, 0.0  ;;  %vm3583_vm13 = vmmov %vm3578_vm9 }
 0x31d   :  { %v1263_v59 = vmax.f32 %v1261_v50, %v1262_v45  ;;  %v1252_v17 = vrot.slane %v1251_v60, 1 }
 0x31f   :  { %1295 = vperm.xlu1 %1979, %v3204_v53   ;;  %1289 = vperm.xlu2 %1977, %v3207_v40   ;;  %v1264_v32 = vrot.slane %v1263_v59, 1  ;;  %v1253_v19 = vadd.f32 %v1252_v17, %v1251_v60 }
 0x320   :  { %1980 = vset.pattern.permute.xlu0 %v3170_v57 }
 0x321   :  { %v1265_v6 = vmax.f32 %v1263_v59, %v1264_v32  ;;  %1923 = vpush %v1253_v19 }
 0x323   :  { %1925 = vpush %v1265_v6 }
 0x327   :  { %1301 = vperm.xlu1 %1979, %v3213_v61   ;;  %1292 = vperm.xlu2 %1977, %v3216_v16  }
 0x32f   :  { %1298 = vperm.xlu2 %1977, %v3221_v54  }
 0x340   :  { %s1920_s18 = spop %1919 }
 0x341   :  { %v1042_v2 = vstv %s1920_s18 }
 0x342   :  { %v1043_v0 = vmul.f32 0.125, %v1042_v2 }
 0x344   :  { %v1884_v25 = vmul.f32 0.01, %v1043_v0  ;;  %v1893_v52 = vsel %vm1892_vm8, %v1043_v0, 0.0  ;;  %vm3582_vm8 = vmmov %vm3573_vm0 }
 0x345   :  { %v1894_v33 = vadd.f32 %v1893_v52, %v1891_v51 }
 0x346   :  { %s1922_s19 = spop %1921  ;;  %v1885_v37 = vadd.f32 %v1884_v25, %v162_v27 }
 0x347   :  { %v1136_v58 = vstv %s1922_s19 }
 0x348   :  { %v1137_v23 = vmul.f32 0.125, %v1136_v58 }
 0x34a   :  { %v1886_v36 = vmul.f32 0.0005, %v1137_v23  ;;  %v1896_v10 = vsel %vm1895_vm14, %v1137_v23, 0.0  ;;  %vm3584_vm14 = vmmov %vm3579_vm11 }
 0x34b   :  { %v3227_v1 = vadd.f32 %v1896_v10, %v1894_v33 }
 0x34c   :  { %v3229_v56 = vadd.f32 %v1886_v36, %v1885_v37 }
 0x352   :  { %s3236_s20 = spop %1923 }
 0x354   :  { %s3239_s21 = spop %1925 }
 0x355   :  { %v1267_v44 = vstv %s3239_s21 }
 0x356   :  { %vm1268_vm7 = vcmp.eq.f32.partialorder %v3178_v62, %v1267_v44 }
 0x357   :  { %v1913_v35 = vsel %vm1268_vm7, 1.0, %v2172_v26 }
 0x371   :  { %v1281_v34 = vpop.permute.xlu2 %1280 }
 0x372   :  { %v1303_v24 = vperm.slane %v1281_v34, %v2996_v21 }
 0x379   :  { %v1290_v11 = vpop.permute.xlu2 %1289 }
 0x37a   :  { %v1306_v12 = vperm.slane %v1290_v11, %v2996_v21 }
 0x381   :  { %v1293_v8 = vpop.permute.xlu2 %1292 }
 0x382   :  { %v1307_v49 = vperm.slane %v1293_v8, %v2996_v21 }
 0x389   :  { %v1287_v31 = vpop.permute.xlu1 %1286  ;;  %v1299_v22 = vpop.permute.xlu2 %1298 }
 0x38a   :  { %v1284_v15 = vpop.permute.xlu0 %1283  ;;  %v1305_v20 = vperm.slane %v1287_v31, %v2996_v21  ;;  %v1309_v63 = vperm.slane %v1299_v22, %v2996_v21 }
 0x38b   :  { %v1304_v46 = vperm.slane %v1284_v15, %v2996_v21 }
 0x38d   :  { %v1311_v5 = vsel %vm435_vm2, %v1304_v46, %v1303_v24 }
 0x38e   :  { %v1312_v7 = vsel %vm437_vm3, %v1305_v20, %v1311_v5 }
 0x38f   :  { %v1313_v13 = vsel %vm3576_vm15, %v1306_v12, %v1312_v7  ;;  %vm1395_vm15 = vcmp.ne.f32.partialorder %v3178_v62, %v1267_v44 }
 0x390   :  { %v1314_v38 = vsel %vm3577_vm12, %v1307_v49, %v1313_v13  ;;  %vm2175_vm12 = vmmov 1  }
 0x391   :  { %v1296_v29 = vpop.permute.xlu1 %1295 }
 0x392   :  { %v1308_v43 = vperm.slane %v1296_v29, %v2996_v21 }
 0x394   :  { %v1315_v47 = vsel %vm3573_vm0, %v1308_v43, %v1314_v38  ;;  %vm3292_vm0 = vmxor %vm1239_vm5, %vm2175_vm12  ;;  %vm3591_vm12 = vcmask 1047559  }
 0x395   :  { %v1316_v50 = vsel %vm3578_vm9, %v1309_v63, %v1315_v47  ;;  %vm1419_vm7 = vmand %vm3292_vm0, %vm1395_vm15 }
 0x396   :  { %vm1396_vm9 = vmand %vm1239_vm5, %vm1395_vm15  ;;  %vm3590_vm15 = vcmask 1046534  }
 0x399   :  { %v1302_v55 = vpop.permute.xlu1 %1301 }
 0x39a   :  { %v1310_v14 = vperm.slane %v1302_v55, %v2996_v21 }
 0x39c   :  { %v3255_v45 = vsel %vm3579_vm11, %v1310_v14, %v1316_v50  ;;  %vm1454_vm11 = vcmask 15368  }
 0x39d   :  { %v1319_v4 = vmul.f32 %v1913_v35, %v3255_v45 }
 0x39f   :  { %v1320_v60 = vsel %vm992_vm10, %v1319_v4, 0.0 }
 0x3a0   :  { %v1321_v59 = vrot.slane %v1320_v60, 4 }
 0x3a2   :  { %v1322_v17 = vadd.f32 %v1321_v59, %v1320_v60 }
 0x3a4   :  { %v1323_v32 = vrot.slane %v1322_v17, 2 }
 0x3a6   :  { %v1324_v19 = vadd.f32 %v1323_v32, %v1322_v17 }
 0x3a8   :  { %v1325_v6 = vrot.slane %v1324_v19, 1 }
 0x3aa   :  { %v1326_v18 = vadd.f32 %v1325_v6, %v1324_v19  ;;  %v1455_v19 = vsel %vm1454_vm11, %v3183_v48, -inf }
 0x3ac   :  { %1332 = vperm.xlu0 %1980, %v1326_v18  }
 0x3b4   :  { %1981 = vset.pattern.permute.xlu0 %v2173_v39 }
 0x41e   :  { %v1333_v42 = vpop.permute.xlu0 %1332 }
 0x41f   :  { %v1339_v2 = vmul.f32 %v1333_v42, %v3216_v16  ;;  %v1336_v0 = vmul.f32 %v1333_v42, %v3198_v41  ;;  %v1335_v27 = vmul.f32 %v1333_v42, %v3195_v28  ;;  %v1338_v25 = vmul.f32 %v1333_v42, %v3207_v40 }
 0x420   :  { %v1337_v52 = vmul.f32 %v1333_v42, %v3192_v30  ;;  %v1341_v58 = vmul.f32 %v1333_v42, %v3221_v54  ;;  %v1340_v51 = vmul.f32 %v1333_v42, %v3204_v53  ;;  %v1342_v23 = vmul.f32 %v1333_v42, %v3213_v61 }
 0x421   :  { %1364 = vperm.xlu0 %1981, %v1339_v2   ;;  %1355 = vperm.xlu1 %1979, %v1336_v0  }
 0x422   :  { %1352 = vperm.xlu2 %1977, %v1335_v27  }
 0x429   :  { %1361 = vperm.xlu1 %1979, %v1338_v25   ;;  %1440 = vrot.lane.b32.xlu0 %v3118_v3, %s2174_s22 }
 0x42a   :  { %1358 = vperm.xlu2 %1977, %v1337_v52  }
 0x431   :  { %1370 = vperm.xlu1 %1979, %v1341_v58  }
 0x432   :  { %1367 = vperm.xlu2 %1977, %v1340_v51  }
 0x439   :  { %1982 = vset.pattern.permute.xlu1 %v3170_v57 }
 0x43a   :  { %1373 = vperm.xlu2 %1977, %v1342_v23  }
 0x47c   :  { %v1353_v33 = vpop.permute.xlu2 %1352 }
 0x47d   :  { %v1375_v11 = vperm.slane %v1353_v33, %v2996_v21 }
 0x484   :  { %v1359_v37 = vpop.permute.xlu2 %1358 }
 0x485   :  { %v1377_v46 = vperm.slane %v1359_v37, %v2996_v21 }
 0x48c   :  { %v1368_v34 = vpop.permute.xlu2 %1367 }
 0x48d   :  { %v1380_v43 = vperm.slane %v1368_v34, %v2996_v21 }
 0x493   :  { %v1356_v36 = vpop.permute.xlu1 %1355  ;;  %v1365_v8 = vpop.permute.xlu0 %1364 }
 0x494   :  { %v1376_v10 = vperm.slane %v1356_v36, %v2996_v21  ;;  %v1379_v7 = vperm.slane %v1365_v8, %v2996_v21  ;;  %v1374_v29 = vpop.permute.xlu2 %1373 }
 0x495   :  { %v1382_v22 = vperm.slane %v1374_v29, %v2996_v21 }
 0x496   :  { %v1383_v31 = vsel %vm435_vm2, %v1376_v10, %v1375_v11 }
 0x497   :  { %v1384_v20 = vsel %vm437_vm3, %v1377_v46, %v1383_v31 }
 0x49b   :  { %v1362_v15 = vpop.permute.xlu1 %1361  ;;  %v1441_v14 = vpop.permute.xlu0 %1440 }
 0x49c   :  { %v1378_v24 = vperm.slane %v1362_v15, %v2996_v21  ;;  %v1443_v50 = vsel %vm1029_vm6, %v1441_v14, 0.0 }
 0x49e   :  { %v1385_v5 = vsel %vm3580_vm4, %v1378_v24, %v1384_v20 }
 0x49f   :  { %v1386_v12 = vsel %vm3581_vm1, %v1379_v7, %v1385_v5 }
 0x4a0   :  { %v1387_v38 = vsel %vm3582_vm8, %v1380_v43, %v1386_v12  ;;  %vm3587_vm8 = vcmask 1043459  }
 0x4a3   :  { %v1371_v13 = vpop.permute.xlu1 %1370 }
 0x4a4   :  { %v1381_v49 = vperm.slane %v1371_v13, %v2996_v21 }
 0x4a6   :  { %v1388_v47 = vsel %vm3583_vm13, %v1381_v49, %v1387_v38  ;;  %vm3588_vm13 = vcmask 1044484  }
 0x4a7   :  { %v1389_v63 = vsel %vm3584_vm14, %v1382_v22, %v1388_v47  ;;  %vm3589_vm14 = vcmask 1045509  }
 0x4a8   :  { %v1391_v55 = vsel %vm992_vm10, %v1389_v63, 0.0 }
 0x4a9   :  { %1392 = vadd.xlane.f32.xlu1 %v1391_v55 }
 0x4b1   :  { %1444 = vadd.xlane.f32.xlu1 %v1443_v50 }
 0x51c   :  { %v1393_v4 = vpop.xlane.xlu1 %1392 }
 0x51d   :  { %v1394_v60 = vsub.f32 1.0, %v1393_v4 }
 0x51f   :  { %v1420_v59 = vsel %vm1419_vm7, %v1394_v60, 1e+30  ;;  %v1397_v17 = vsel %vm1396_vm9, %v1394_v60, -1e+30  ;;  %v1410_v42 = vrot.slane %v1394_v60, 4 }
 0x520   :  { %v1421_v32 = vsel %vm1029_vm6, %v1420_v59, inf  ;;  %v1398_v44 = vsel %vm1029_vm6, %v1397_v17, -inf  ;;  %v1255_v17 = vstv %s3236_s20 }
 0x521   :  { %1422 = vmin.xlane.f32.xlu0 %v1421_v32  ;;  %1399 = vmax.xlane.f32.xlu2 %v1398_v44  ;;  %v1411_v0 = vmax.f32 %v1394_v60, %v1410_v42  ;;  %vm1433_vm1 = vcmp.ge.f32.partialorder %v1255_v17, 2.0 }
 0x523   :  { %v1412_v58 = vrot.slane %v1411_v0, 2 }
 0x524   :  { %v1445_v6 = vpop.xlane.xlu1 %1444 }
 0x525   :  { %v1446_v18 = vrot.slane %v1445_v6, 4  ;;  %v1413_v36 = vmax.f32 %v1411_v0, %v1412_v58 }
 0x527   :  { %v1447_v2 = vadd.f32 %v1446_v18, %v1445_v6  ;;  %v1414_v24 = vrot.slane %v1413_v36, 1 }
 0x529   :  { %1456 = vmax.xlane.f32.xlu2 %v1455_v19  ;;  %v1448_v52 = vrot.slane %v1447_v2, 2  ;;  %v1415_v13 = vmax.f32 %v1413_v36, %v1414_v24 }
 0x52b   :  { %v1449_v10 = vadd.f32 %v1448_v52, %v1447_v2 }
 0x52d   :  { %v1450_v8 = vrot.slane %v1449_v10, 1 }
 0x52f   :  { %v1451_v49 = vadd.f32 %v1450_v8, %v1449_v10 }
 0x594   :  { %v1423_v27 = vpop.xlane.xlu0 %1422  ;;  %v1400_v25 = vpop.xlane.xlu2 %1399 }
 0x595   :  { %v1424_v51 = vrot.slane %v1423_v27, 4  ;;  %v1401_v23 = vrot.slane %v1400_v25, 4 }
 0x597   :  { %v1425_v33 = vmin.f32 %v1423_v27, %v1424_v51  ;;  %v1402_v37 = vmax.f32 %v1400_v25, %v1401_v23 }
 0x599   :  { %v1426_v34 = vrot.slane %v1425_v33, 2  ;;  %v1403_v11 = vrot.slane %v1402_v37, 2 }
 0x59b   :  { %v1404_v31 = vmax.f32 %v1402_v37, %v1403_v11  ;;  %v1427_v15 = vmin.f32 %v1425_v33, %v1426_v34 }
 0x59c   :  { %v1457_v46 = vpop.xlane.xlu2 %1456 }
 0x59d   :  { %v1458_v20 = vrot.slane %v1457_v46, 4  ;;  %v1405_v5 = vrot.slane %v1404_v31, 1  ;;  %v1428_v7 = vrot.slane %v1427_v15, 1 }
 0x59f   :  { %v1459_v29 = vmax.f32 %v1457_v46, %v1458_v20  ;;  %v1406_v12 = vmax.f32 %v1404_v31, %v1405_v5  ;;  %v1429_v43 = vmin.f32 %v1427_v15, %v1428_v7 }
 0x5a1   :  { %v1460_v22 = vrot.slane %v1459_v29, 2  ;;  %1927 = vpush %v1406_v12 }
 0x5a2   :  { %1929 = vpush %v1415_v13 }
 0x5a3   :  { %1931 = vpush %v1429_v43  ;;  %v1461_v38 = vmax.f32 %v1459_v29, %v1460_v22 }
 0x5a4   :  { %1933 = vpush %v1451_v49 }
 0x5a5   :  { %v1462_v47 = vrot.slane %v1461_v38, 1 }
 0x5a7   :  { %v1463_v63 = vmax.f32 %v1461_v38, %v1462_v47 }
 0x5a9   :  { %1935 = vpush %v1463_v63 }
 0x5d2   :  { %s1928_s23 = spop %1927 }
 0x5d3   :  { %v1408_v55 = vstv %s1928_s23  ;;  %s1930_s24 = spop %1929 }
 0x5d4   :  { %v1409_v14 = vmax.f32 %v1408_v55, 0.0  ;;  %v1417_v50 = vstv %s1930_s24  ;;  %s1932_s25 = spop %1931 }
 0x5d5   :  { %v1431_v4 = vstv %s1932_s25  ;;  %s3304_s26 = spop %1933 }
 0x5d6   :  { %v1432_v60 = vmin.f32 %v1417_v50, %v1431_v4 }
 0x5d8   :  { %v1434_v59 = vsub.f32 %v1409_v14, %v1432_v60 }
 0x5da   :  { %v1435_v32 = vadd.f32 0.8, %v1434_v59  ;;  %s3307_s27 = spop %1935 }
 0x5db   :  { %v1465_v44 = vstv %s3307_s27 }
 0x5dc   :  { %v1436_v19 = vmax.f32 %v1435_v32, 0.0  ;;  %vm1466_vm4 = vcmp.eq.f32.partialorder %v3178_v62, %v1465_v44  ;;  %vm1545_vm7 = vcmp.ne.f32.partialorder %v3178_v62, %v1465_v44 }
 0x5dd   :  { %v1914_v6 = vsel %vm1466_vm4, 1.0, %v2172_v26  ;;  %vm1568_vm9 = vmand %vm3292_vm0, %vm1545_vm7 }
 0x5de   :  { %v3314_v18 = vsel %vm1433_vm1, %v1436_v19, 0.0  ;;  %v1469_v42 = vmul.f32 %v1914_v6, %v3255_v45  ;;  %vm1546_vm4 = vmand %vm1239_vm5, %vm1545_vm7  ;;  %vm1602_vm1 = vcmask 23568   ;;  %vm3596_vm7 = vcmask 1047559  }
 0x5df   :  { %v1603_v44 = vsel %vm1602_vm1, %v3183_v48, -inf }
 0x5e0   :  { %v1470_v2 = vsel %vm992_vm10, %v1469_v42, 0.0 }
 0x5e1   :  { %v1471_v0 = vrot.slane %v1470_v2, 4 }
 0x5e3   :  { %v1472_v27 = vadd.f32 %v1471_v0, %v1470_v2 }
 0x5e5   :  { %v1473_v25 = vrot.slane %v1472_v27, 2 }
 0x5e7   :  { %v1474_v52 = vadd.f32 %v1473_v25, %v1472_v27 }
 0x5e9   :  { %v1475_v58 = vrot.slane %v1474_v52, 1 }
 0x5eb   :  { %v1476_v51 = vadd.f32 %v1475_v58, %v1474_v52 }
 0x5ed   :  { %1482 = vperm.xlu1 %1982, %v1476_v51  }
 0x5f5   :  { %1983 = vset.pattern.permute.xlu1 %v2173_v39 }
 0x65f   :  { %v1483_v23 = vpop.permute.xlu1 %1482 }
 0x660   :  { %v1487_v33 = vmul.f32 %v1483_v23, %v3192_v30  ;;  %v1486_v37 = vmul.f32 %v1483_v23, %v3198_v41  ;;  %v1485_v36 = vmul.f32 %v1483_v23, %v3195_v28  ;;  %v1490_v10 = vmul.f32 %v1483_v23, %v3204_v53 }
 0x661   :  { %v1488_v34 = vmul.f32 %v1483_v23, %v3207_v40  ;;  %v1489_v11 = vmul.f32 %v1483_v23, %v3216_v16  ;;  %v1491_v31 = vmul.f32 %v1483_v23, %v3221_v54  ;;  %v1492_v15 = vmul.f32 %v1483_v23, %v3213_v61 }
 0x662   :  { %1508 = vperm.xlu1 %1983, %v1487_v33   ;;  %1505 = vperm.xlu0 %1981, %v1486_v37  }
 0x663   :  { %1502 = vperm.xlu2 %1977, %v1485_v36  }
 0x66a   :  { %1517 = vperm.xlu1 %1983, %v1490_v10   ;;  %1511 = vperm.xlu0 %1981, %v1488_v34  }
 0x66b   :  { %1514 = vperm.xlu2 %1977, %v1489_v11  }
 0x672   :  { %1520 = vperm.xlu0 %1981, %v1491_v31   ;;  %1984 = vset.pattern.permute.xlu1 %v3170_v57 }
 0x673   :  { %1523 = vperm.xlu2 %1977, %v1492_v15  }
 0x67a   :  { %1588 = vrot.lane.b32.xlu0 %v3118_v3, %s2176_s28 }
 0x6bd   :  { %v1503_v46 = vpop.permute.xlu2 %1502 }
 0x6be   :  { %v1525_v7 = vperm.slane %v1503_v46, %v2996_v21 }
 0x6c5   :  { %v1515_v5 = vpop.permute.xlu2 %1514 }
 0x6c6   :  { %v1529_v38 = vperm.slane %v1515_v5, %v2996_v21 }
 0x6cd   :  { %v1524_v63 = vpop.permute.xlu2 %1523 }
 0x6ce   :  { %v1532_v60 = vperm.slane %v1524_v63, %v2996_v21 }
 0x6d4   :  { %v1506_v24 = vpop.permute.xlu0 %1505  ;;  %v1509_v8 = vpop.permute.xlu1 %1508 }
 0x6d5   :  { %v1526_v20 = vperm.slane %v1506_v24, %v2996_v21  ;;  %v1527_v29 = vperm.slane %v1509_v8, %v2996_v21 }
 0x6d7   :  { %v1533_v12 = vsel %vm435_vm2, %v1526_v20, %v1525_v7 }
 0x6d8   :  { %v1534_v49 = vsel %vm437_vm3, %v1527_v29, %v1533_v12 }
 0x6dc   :  { %v1512_v43 = vpop.permute.xlu0 %1511  ;;  %v1518_v47 = vpop.permute.xlu1 %1517 }
 0x6dd   :  { %v1528_v13 = vperm.slane %v1512_v43, %v2996_v21  ;;  %v1530_v14 = vperm.slane %v1518_v47, %v2996_v21 }
 0x6df   :  { %v1535_v22 = vsel %vm3587_vm8, %v1528_v13, %v1534_v49 }
 0x6e0   :  { %v1536_v55 = vsel %vm3588_vm13, %v1529_v38, %v1535_v22  ;;  %vm3592_vm13 = vcmask 1043459  }
 0x6e1   :  { %v1537_v59 = vsel %vm3589_vm14, %v1530_v14, %v1536_v55  ;;  %vm3593_vm14 = vcmask 1044484  }
 0x6e4   :  { %v1521_v50 = vpop.permute.xlu0 %1520 }
 0x6e5   :  { %v1531_v4 = vperm.slane %v1521_v50, %v2996_v21 }
 0x6e7   :  { %v1538_v17 = vsel %vm3590_vm15, %v1531_v4, %v1537_v59  ;;  %vm3594_vm15 = vcmask 1045509  }
 0x6e8   :  { %v1539_v32 = vsel %vm3591_vm12, %v1532_v60, %v1538_v17  ;;  %vm3595_vm12 = vcmask 1046534  }
 0x6e9   :  { %v1541_v19 = vsel %vm992_vm10, %v1539_v32, 0.0 }
 0x6ea   :  { %1542 = vadd.xlane.f32.xlu1 %v1541_v19 }
 0x6ec   :  { %v1589_v6 = vpop.permute.xlu0 %1588 }
 0x6ed   :  { %v1591_v42 = vsel %vm1029_vm6, %v1589_v6, 0.0 }
 0x6f2   :  { %1592 = vadd.xlane.f32.xlu1 %v1591_v42 }
 0x75d   :  { %v1543_v2 = vpop.xlane.xlu1 %1542 }
 0x75e   :  { %v1544_v0 = vsub.f32 1.0, %v1543_v2 }
 0x760   :  { %v1569_v27 = vsel %vm1568_vm9, %v1544_v0, 1e+30  ;;  %v1547_v25 = vsel %vm1546_vm4, %v1544_v0, -1e+30  ;;  %v1560_v33 = vrot.slane %v1544_v0, 4 }
 0x761   :  { %v1570_v52 = vsel %vm1454_vm11, %v1569_v27, inf  ;;  %v1548_v58 = vsel %vm1454_vm11, %v1547_v25, -inf }
 0x762   :  { %1571 = vmin.xlane.f32.xlu0 %v1570_v52  ;;  %1549 = vmax.xlane.f32.xlu2 %v1548_v58  ;;  %v1561_v36 = vmax.f32 %v1544_v0, %v1560_v33  ;;  %v1453_v52 = vstv %s3304_s26 }
 0x763   :  { %vm1582_vm8 = vcmp.ge.f32.partialorder %v1453_v52, 2.0 }
 0x764   :  { %v1562_v31 = vrot.slane %v1561_v36, 2 }
 0x765   :  { %v1593_v51 = vpop.xlane.xlu1 %1592 }
 0x766   :  { %v1594_v23 = vrot.slane %v1593_v51, 4  ;;  %v1563_v20 = vmax.f32 %v1561_v36, %v1562_v31 }
 0x768   :  { %v1595_v37 = vadd.f32 %v1594_v23, %v1593_v51  ;;  %v1564_v49 = vrot.slane %v1563_v20, 1 }
 0x76a   :  { %1604 = vmax.xlane.f32.xlu2 %v1603_v44  ;;  %v1596_v11 = vrot.slane %v1595_v37, 2  ;;  %v1565_v4 = vmax.f32 %v1563_v20, %v1564_v49 }
 0x76c   :  { %v1597_v5 = vadd.f32 %v1596_v11, %v1595_v37 }
 0x76e   :  { %v1598_v22 = vrot.slane %v1597_v5, 1 }
 0x770   :  { %v1599_v60 = vadd.f32 %v1598_v22, %v1597_v5 }
 0x7d5   :  { %v1572_v10 = vpop.xlane.xlu0 %1571  ;;  %v1550_v34 = vpop.xlane.xlu2 %1549 }
 0x7d6   :  { %v1573_v15 = vrot.slane %v1572_v10, 4  ;;  %v1551_v46 = vrot.slane %v1550_v34, 4 }
 0x7d8   :  { %v1574_v24 = vmin.f32 %v1572_v10, %v1573_v15  ;;  %v1552_v8 = vmax.f32 %v1550_v34, %v1551_v46 }
 0x7da   :  { %v1575_v7 = vrot.slane %v1574_v24, 2  ;;  %v1553_v29 = vrot.slane %v1552_v8, 2 }
 0x7dc   :  { %v1554_v12 = vmax.f32 %v1552_v8, %v1553_v29  ;;  %v1576_v43 = vmin.f32 %v1574_v24, %v1575_v7 }
 0x7dd   :  { %v1605_v13 = vpop.xlane.xlu2 %1604 }
 0x7de   :  { %v1606_v38 = vrot.slane %v1605_v13, 4  ;;  %v1555_v47 = vrot.slane %v1554_v12, 1  ;;  %v1577_v63 = vrot.slane %v1576_v43, 1 }
 0x7e0   :  { %v1607_v55 = vmax.f32 %v1605_v13, %v1606_v38  ;;  %v1556_v14 = vmax.f32 %v1554_v12, %v1555_v47  ;;  %v1578_v50 = vmin.f32 %v1576_v43, %v1577_v63 }
 0x7e2   :  { %v1608_v59 = vrot.slane %v1607_v55, 2  ;;  %1937 = vpush %v1556_v14 }
 0x7e3   :  { %1939 = vpush %v1565_v4 }
 0x7e4   :  { %1941 = vpush %v1578_v50  ;;  %v1609_v17 = vmax.f32 %v1607_v55, %v1608_v59 }
 0x7e5   :  { %1943 = vpush %v1599_v60 }
 0x7e6   :  { %v1610_v32 = vrot.slane %v1609_v17, 1 }
 0x7e8   :  { %v1611_v19 = vmax.f32 %v1609_v17, %v1610_v32 }
 0x7ea   :  { %1945 = vpush %v1611_v19 }
 0x813   :  { %s1938_s29 = spop %1937 }
 0x814   :  { %v1558_v6 = vstv %s1938_s29  ;;  %s1940_s30 = spop %1939 }
 0x815   :  { %v1559_v42 = vmax.f32 %v1558_v6, 0.0  ;;  %v1567_v2 = vstv %s1940_s30  ;;  %s1942_s7 = spop %1941 }
 0x816   :  { %v1580_v0 = vstv %s1942_s7  ;;  %s3357_s8 = spop %1943 }
 0x817   :  { %v1581_v27 = vmin.f32 %v1567_v2, %v1580_v0 }
 0x819   :  { %v1583_v25 = vsub.f32 %v1559_v42, %v1581_v27 }
 0x81b   :  { %v1584_v58 = vadd.f32 0.8, %v1583_v25  ;;  %s3360_s9 = spop %1945 }
 0x81c   :  { %v1613_v44 = vstv %s3360_s9 }
 0x81d   :  { %v1585_v51 = vmax.f32 %v1584_v58, 0.0  ;;  %vm1614_vm11 = vcmp.eq.f32.partialorder %v3178_v62, %v1613_v44  ;;  %vm1693_vm9 = vcmp.ne.f32.partialorder %v3178_v62, %v1613_v44 }
 0x81e   :  { %v1915_v23 = vsel %vm1614_vm11, 1.0, %v2172_v26  ;;  %vm1716_vm4 = vmand %vm3292_vm0, %vm1693_vm9 }
 0x81f   :  { %v1586_v33 = vsel %vm1582_vm8, %v1585_v51, 0.0  ;;  %v1617_v37 = vmul.f32 %v1915_v23, %v3255_v45  ;;  %vm1694_vm11 = vmand %vm1239_vm5, %vm1693_vm9 }
 0x820   :  { %v3369_v36 = vadd.f32 %v1586_v33, %v3314_v18 }
 0x821   :  { %v1618_v10 = vsel %vm992_vm10, %v1617_v37, 0.0 }
 0x822   :  { %v1619_v34 = vrot.slane %v1618_v10, 4 }
 0x824   :  { %v1620_v11 = vadd.f32 %v1619_v34, %v1618_v10 }
 0x826   :  { %v1621_v31 = vrot.slane %v1620_v11, 2 }
 0x828   :  { %v1622_v15 = vadd.f32 %v1621_v31, %v1620_v11 }
 0x82a   :  { %v1623_v46 = vrot.slane %v1622_v15, 1 }
 0x82c   :  { %v1624_v24 = vadd.f32 %v1623_v46, %v1622_v15 }
 0x82e   :  { %1630 = vperm.xlu1 %1984, %v1624_v24  }
 0x836   :  { %1985 = vset.pattern.permute.xlu1 %v2173_v39 }
 0x8a0   :  { %v1631_v8 = vpop.permute.xlu1 %1630 }
 0x8a1   :  { %v1636_v20 = vmul.f32 %v1631_v8, %v3207_v40  ;;  %v1634_v5 = vmul.f32 %v1631_v8, %v3198_v41  ;;  %v1633_v7 = vmul.f32 %v1631_v8, %v3195_v28  ;;  %v1639_v18 = vmul.f32 %v1631_v8, %v3221_v54 }
 0x8a2   :  { %v1637_v29 = vmul.f32 %v1631_v8, %v3216_v16  ;;  %v1635_v12 = vmul.f32 %v1631_v8, %v3192_v30  ;;  %v1640_v43 = vmul.f32 %v1631_v8, %v3213_v61  ;;  %v1638_v13 = vmul.f32 %v1631_v8, %v3204_v53 }
 0x8a3   :  { %1659 = vperm.xlu1 %1985, %v1636_v20   ;;  %1653 = vperm.xlu2 %1977, %v1634_v5  }
 0x8a4   :  { %1650 = vperm.xlu0 %1981, %v1633_v7  }
 0x8ab   :  { %1668 = vperm.xlu1 %1985, %v1639_v18   ;;  %1662 = vperm.xlu2 %1977, %v1637_v29  }
 0x8ac   :  { %1656 = vperm.xlu0 %1981, %v1635_v12  }
 0x8b3   :  { %1671 = vperm.xlu2 %1977, %v1640_v43   ;;  %1736 = vrot.lane.b32.xlu1 %v3118_v3, %s2177_s10 }
 0x8b4   :  { %1665 = vperm.xlu0 %1981, %v1638_v13  }
 0x8bc   :  { %1986 = vset.pattern.permute.xlu0 %v3170_v57 }
 0x8fd   :  { %v1654_v49 = vpop.permute.xlu2 %1653 }
 0x8fe   :  { %v1674_v14 = vperm.slane %v1654_v49, %v2996_v21 }
 0x905   :  { %v1663_v47 = vpop.permute.xlu2 %1662 }
 0x906   :  { %v1677_v17 = vperm.slane %v1663_v47, %v2996_v21 }
 0x90d   :  { %v1672_v32 = vpop.permute.xlu2 %1671 }
 0x90e   :  { %v1680_v0 = vperm.slane %v1672_v32, %v2996_v21 }
 0x915   :  { %v1660_v38 = vpop.permute.xlu1 %1659 }
 0x916   :  { %v1651_v22 = vpop.permute.xlu0 %1650  ;;  %v1676_v3 = vperm.slane %v1660_v38, %v2996_v21 }
 0x917   :  { %v1673_v63 = vperm.slane %v1651_v22, %v2996_v21 }
 0x919   :  { %v1681_v4 = vsel %vm435_vm2, %v1674_v14, %v1673_v63 }
 0x91d   :  { %v1669_v59 = vpop.permute.xlu1 %1668 }
 0x91e   :  { %v1657_v55 = vpop.permute.xlu0 %1656  ;;  %v1679_v42 = vperm.slane %v1669_v59, %v2996_v21 }
 0x91f   :  { %v1675_v50 = vperm.slane %v1657_v55, %v2996_v21 }
 0x921   :  { %v1682_v60 = vsel %vm437_vm3, %v1675_v50, %v1681_v4 }
 0x922   :  { %v1683_v57 = vsel %vm3592_vm13, %v1676_v3, %v1682_v60 }
 0x923   :  { %v1684_v2 = vsel %vm3593_vm14, %v1677_v17, %v1683_v57 }
 0x925   :  { %v1737_v51 = vpop.permute.xlu1 %1736 }
 0x926   :  { %v1666_v19 = vpop.permute.xlu0 %1665  ;;  %v1739_v23 = vsel %vm1029_vm6, %v1737_v51, 0.0  ;;  %vm1750_vm6 = vcmask 31768  }
 0x927   :  { %v1678_v6 = vperm.slane %v1666_v19, %v2996_v21  ;;  %v1751_v44 = vsel %vm1750_vm6, %v3183_v48, -inf }
 0x929   :  { %v1685_v27 = vsel %vm3594_vm15, %v1678_v6, %v1684_v2 }
 0x92a   :  { %v1686_v25 = vsel %vm3595_vm12, %v1679_v42, %v1685_v27 }
 0x92b   :  { %v1687_v52 = vsel %vm3596_vm7, %v1680_v0, %v1686_v25 }
 0x92c   :  { %v1689_v58 = vsel %vm992_vm10, %v1687_v52, 0.0 }
 0x92d   :  { %1690 = vadd.xlane.f32.xlu0 %v1689_v58 }
 0x935   :  { %1740 = vadd.xlane.f32.xlu0 %v1739_v23 }
 0x9a0   :  { %v1691_v33 = vpop.xlane.xlu0 %1690 }
 0x9a1   :  { %v1692_v37 = vsub.f32 1.0, %v1691_v33 }
 0x9a3   :  { %v1717_v10 = vsel %vm1716_vm4, %v1692_v37, 1e+30  ;;  %v1695_v34 = vsel %vm1694_vm11, %v1692_v37, -1e+30  ;;  %v1708_v24 = vrot.slane %v1692_v37, 4 }
 0x9a4   :  { %v1718_v11 = vsel %vm1602_vm1, %v1717_v10, inf  ;;  %v1696_v31 = vsel %vm1602_vm1, %v1695_v34, -inf }
 0x9a5   :  { %1719 = vmin.xlane.f32.xlu1 %v1718_v11  ;;  %1697 = vmax.xlane.f32.xlu2 %v1696_v31  ;;  %v1709_v20 = vmax.f32 %v1692_v37, %v1708_v24  ;;  %v1601_v37 = vstv %s3357_s8 }
 0x9a6   :  { %vm1730_vm8 = vcmp.ge.f32.partialorder %v1601_v37, 2.0 }
 0x9a7   :  { %v1710_v29 = vrot.slane %v1709_v20, 2 }
 0x9a8   :  { %v1741_v15 = vpop.xlane.xlu0 %1740 }
 0x9a9   :  { %v1742_v46 = vrot.slane %v1741_v15, 4  ;;  %v1711_v22 = vmax.f32 %v1709_v20, %v1710_v29 }
 0x9ab   :  { %v1743_v8 = vadd.f32 %v1742_v46, %v1741_v15  ;;  %v1712_v50 = vrot.slane %v1711_v22, 1 }
 0x9ad   :  { %1752 = vmax.xlane.f32.xlu2 %v1751_v44  ;;  %v1744_v18 = vrot.slane %v1743_v8, 2  ;;  %v1713_v19 = vmax.f32 %v1711_v22, %v1712_v50 }
 0x9af   :  { %v1745_v38 = vadd.f32 %v1744_v18, %v1743_v8 }
 0x9b1   :  { %v1746_v4 = vrot.slane %v1745_v38, 1 }
 0x9b3   :  { %v1747_v6 = vadd.f32 %v1746_v4, %v1745_v38 }
 0xa18   :  { %v1720_v5 = vpop.xlane.xlu1 %1719  ;;  %v1698_v7 = vpop.xlane.xlu2 %1697 }
 0xa19   :  { %v1721_v12 = vrot.slane %v1720_v5, 4  ;;  %v1699_v43 = vrot.slane %v1698_v7, 4 }
 0xa1b   :  { %v1722_v13 = vmin.f32 %v1720_v5, %v1721_v12  ;;  %v1700_v49 = vmax.f32 %v1698_v7, %v1699_v43 }
 0xa1d   :  { %v1723_v47 = vrot.slane %v1722_v13, 2  ;;  %v1701_v63 = vrot.slane %v1700_v49, 2 }
 0xa1f   :  { %v1702_v55 = vmax.f32 %v1700_v49, %v1701_v63  ;;  %v1724_v48 = vmin.f32 %v1722_v13, %v1723_v47 }
 0xa20   :  { %v1753_v14 = vpop.xlane.xlu2 %1752 }
 0xa21   :  { %v1754_v60 = vrot.slane %v1753_v14, 4  ;;  %v1703_v3 = vrot.slane %v1702_v55, 1  ;;  %v1725_v59 = vrot.slane %v1724_v48, 1 }
 0xa23   :  { %v1755_v57 = vmax.f32 %v1753_v14, %v1754_v60  ;;  %v1704_v17 = vmax.f32 %v1702_v55, %v1703_v3  ;;  %v1726_v32 = vmin.f32 %v1724_v48, %v1725_v59 }
 0xa25   :  { %v1756_v42 = vrot.slane %v1755_v57, 2  ;;  %1947 = vpush %v1704_v17 }
 0xa26   :  { %1949 = vpush %v1713_v19 }
 0xa27   :  { %1951 = vpush %v1726_v32  ;;  %v1757_v2 = vmax.f32 %v1755_v57, %v1756_v42 }
 0xa28   :  { %1953 = vpush %v1747_v6 }
 0xa29   :  { %v1758_v0 = vrot.slane %v1757_v2, 1 }
 0xa2b   :  { %v1759_v27 = vmax.f32 %v1757_v2, %v1758_v0 }
 0xa2d   :  { %1955 = vpush %v1759_v27 }
 0xa56   :  { %s1948_s11 = spop %1947 }
 0xa57   :  { %v1706_v25 = vstv %s1948_s11  ;;  %s1950_s3 = spop %1949 }
 0xa58   :  { %v1707_v52 = vmax.f32 %v1706_v25, 0.0  ;;  %v1715_v58 = vstv %s1950_s3  ;;  %s1952_s12 = spop %1951 }
 0xa59   :  { %v1728_v51 = vstv %s1952_s12  ;;  %s3411_s13 = spop %1953 }
 0xa5a   :  { %v1729_v23 = vmin.f32 %v1715_v58, %v1728_v51 }
 0xa5c   :  { %v1731_v33 = vsub.f32 %v1707_v52, %v1729_v23 }
 0xa5e   :  { %v1732_v10 = vadd.f32 0.8, %v1731_v33  ;;  %s3414_s14 = spop %1955 }
 0xa5f   :  { %v1761_v34 = vstv %s3414_s14 }
 0xa60   :  { %v1733_v11 = vmax.f32 %v1732_v10, 0.0  ;;  %vm1762_vm1 = vcmp.eq.f32.partialorder %v3178_v62, %v1761_v34 }
 0xa61   :  { %v1916_v31 = vsel %vm1762_vm1, 1.0, %v2172_v26 }
 0xa62   :  { %v1734_v44 = vsel %vm1730_vm8, %v1733_v11, 0.0  ;;  %v1765_v15 = vmul.f32 %v1916_v31, %v3255_v45 }
 0xa63   :  { %v3421_v46 = vadd.f32 %v1734_v44, %v3369_v36 }
 0xa64   :  { %v1766_v24 = vsel %vm992_vm10, %v1765_v15, 0.0 }
 0xa65   :  { %v1767_v8 = vrot.slane %v1766_v24, 4 }
 0xa67   :  { %v1768_v20 = vadd.f32 %v1767_v8, %v1766_v24 }
 0xa69   :  { %v1769_v5 = vrot.slane %v1768_v20, 2 }
 0xa6b   :  { %v1770_v7 = vadd.f32 %v1769_v5, %v1768_v20 }
 0xa6d   :  { %v1771_v18 = vrot.slane %v1770_v7, 1 }
 0xa6f   :  { %v1772_v29 = vadd.f32 %v1771_v18, %v1770_v7 }
 0xa71   :  { %1778 = vperm.xlu0 %1986, %v1772_v29  }
 0xa79   :  { %1987 = vset.pattern.permute.xlu0 %v2173_v39 }
 0xae3   :  { %v1779_v12 = vpop.permute.xlu0 %1778 }
 0xae4   :  { %v1787_v26 = vmul.f32 %v1779_v12, %v3221_v54  ;;  %v1782_v43 = vmul.f32 %v1779_v12, %v3198_v41  ;;  %v1781_v45 = vmul.f32 %v1779_v12, %v3195_v28  ;;  %v1784_v36 = vmul.f32 %v1779_v12, %v3207_v40 }
 0xae5   :  { %v1783_v13 = vmul.f32 %v1779_v12, %v3192_v30  ;;  %v1786_v49 = vmul.f32 %v1779_v12, %v3204_v53  ;;  %v1785_v39 = vmul.f32 %v1779_v12, %v3216_v16  ;;  %v1788_v54 = vmul.f32 %v1779_v12, %v3213_v61 }
 0xae6   :  { %1816 = vperm.xlu0 %1987, %v1787_v26   ;;  %1801 = vperm.xlu2 %1977, %v1782_v43  }
 0xae7   :  { %1798 = vperm.xlu1 %1985, %v1781_v45  }
 0xaee   :  { %1807 = vperm.xlu2 %1977, %v1784_v36  }
 0xaef   :  { %1804 = vperm.xlu1 %1985, %v1783_v13   ;;  %v1749_v13 = vstv %s3411_s13 }
 0xaf6   :  { %1813 = vperm.xlu2 %1977, %v1786_v49  }
 0xaf7   :  { %1810 = vperm.xlu1 %1985, %v1785_v39  }
 0xaff   :  { %1819 = vperm.xlu1 %1985, %v1788_v54  }
 0xb40   :  { %v1802_v41 = vpop.permute.xlu2 %1801 }
 0xb41   :  { %v1822_v30 = vperm.slane %v1802_v41, %v2996_v21 }
 0xb48   :  { %v1808_v22 = vpop.permute.xlu2 %1807 }
 0xb49   :  { %v1824_v55 = vperm.slane %v1808_v22, %v2996_v21 }
 0xb50   :  { %v1814_v48 = vpop.permute.xlu2 %1813 }
 0xb51   :  { %v1826_v4 = vperm.slane %v1814_v48, %v2996_v21 }
 0xb58   :  { %v1817_v60 = vpop.permute.xlu0 %1816 }
 0xb59   :  { %v1799_v28 = vpop.permute.xlu1 %1798  ;;  %v1827_v59 = vperm.slane %v1817_v60, %v2996_v21 }
 0xb5a   :  { %v1821_v47 = vperm.slane %v1799_v28, %v2996_v21 }
 0xb5c   :  { %v1829_v63 = vsel %vm435_vm2, %v1822_v30, %v1821_v47  ;;  %vm3597_vm2 = vmmov %vm3595_vm12  ;;  %vm1841_vm12 = vcmp.ne.f32.partialorder %v3178_v62, %v1761_v34 }
 0xb5d   :  { %vm1842_vm9 = vmand %vm1239_vm5, %vm1841_vm12  ;;  %vm1898_vm5 = vcmp.eq.s32.totalorder %v2996_v21, 3 }
 0xb61   :  { %v1805_v38 = vpop.permute.xlu1 %1804 }
 0xb62   :  { %v1823_v40 = vperm.slane %v1805_v38, %v2996_v21 }
 0xb64   :  { %v1830_v53 = vsel %vm437_vm3, %v1823_v40, %v1829_v63  ;;  %vm3598_vm3 = vmmov %vm3596_vm7 }
 0xb65   :  { %v1831_v14 = vsel %vm3592_vm13, %v1824_v55, %v1830_v53  ;;  %vm1864_vm7 = vmand %vm3292_vm0, %vm1841_vm12  ;;  %vm1901_vm0 = vcmp.eq.s32.totalorder %v2996_v21, 4 }
 0xb69   :  { %v1811_v16 = vpop.permute.xlu1 %1810 }
 0xb6a   :  { %v1825_v61 = vperm.slane %v1811_v16, %v2996_v21 }
 0xb6c   :  { %v1832_v50 = vsel %vm3593_vm14, %v1825_v61, %v1831_v14 }
 0xb6d   :  { %v1833_v3 = vsel %vm3594_vm15, %v1826_v4, %v1832_v50 }
 0xb6e   :  { %v1834_v32 = vsel %vm3597_vm2, %v1827_v59, %v1833_v3 }
 0xb71   :  { %v1820_v57 = vpop.permute.xlu1 %1819 }
 0xb72   :  { %v1828_v17 = vperm.slane %v1820_v57, %v2996_v21 }
 0xb74   :  { %v1835_v19 = vsel %vm3598_vm3, %v1828_v17, %v1834_v32 }
 0xb75   :  { %v1837_v6 = vsel %vm992_vm10, %v1835_v19, 0.0  ;;  %vm1878_vm10 = vcmp.ge.f32.partialorder %v1749_v13, 2.0 }
 0xb76   :  { %1838 = vadd.xlane.f32.xlu2 %v1837_v6 }
 0xbe9   :  { %v1839_v42 = vpop.xlane.xlu2 %1838 }
 0xbea   :  { %v1840_v2 = vsub.f32 1.0, %v1839_v42 }
 0xbec   :  { %v1865_v0 = vsel %vm1864_vm7, %v1840_v2, 1e+30  ;;  %v1843_v27 = vsel %vm1842_vm9, %v1840_v2, -1e+30  ;;  %v1856_v58 = vrot.slane %v1840_v2, 4 }
 0xbed   :  { %v1866_v25 = vsel %vm1750_vm6, %v1865_v0, inf  ;;  %v1844_v52 = vsel %vm1750_vm6, %v1843_v27, -inf }
 0xbee   :  { %1867 = vmin.xlane.f32.xlu0 %v1866_v25  ;;  %1845 = vmax.xlane.f32.xlu1 %v1844_v52  ;;  %v1857_v51 = vmax.f32 %v1840_v2, %v1856_v58 }
 0xbf0   :  { %v1858_v33 = vrot.slane %v1857_v51, 2 }
 0xbf2   :  { %v1859_v11 = vmax.f32 %v1857_v51, %v1858_v33 }
 0xbf4   :  { %v1860_v24 = vrot.slane %v1859_v11, 1 }
 0xbf6   :  { %v1861_v18 = vmax.f32 %v1859_v11, %v1860_v24 }
 0xc61   :  { %v1868_v23 = vpop.xlane.xlu0 %1867  ;;  %v1846_v62 = vpop.xlane.xlu1 %1845 }
 0xc62   :  { %v1869_v37 = vrot.slane %v1868_v23, 4  ;;  %v1847_v10 = vrot.slane %v1846_v62, 4 }
 0xc64   :  { %v1870_v35 = vmin.f32 %v1868_v23, %v1869_v37  ;;  %v1848_v34 = vmax.f32 %v1846_v62, %v1847_v10 }
 0xc66   :  { %v1871_v9 = vrot.slane %v1870_v35, 2  ;;  %v1849_v31 = vrot.slane %v1848_v34, 2 }
 0xc68   :  { %v1872_v44 = vmin.f32 %v1870_v35, %v1871_v9  ;;  %v1850_v15 = vmax.f32 %v1848_v34, %v1849_v31 }
 0xc6a   :  { %v1851_v8 = vrot.slane %v1850_v15, 1  ;;  %v1873_v20 = vrot.slane %v1872_v44, 1 }
 0xc6c   :  { %v1852_v5 = vmax.f32 %v1850_v15, %v1851_v8  ;;  %v1874_v7 = vmin.f32 %v1872_v44, %v1873_v20 }
 0xc6e   :  { %1957 = vpush %v1852_v5 }
 0xc6f   :  { %1959 = vpush %v1861_v18 }
 0xc70   :  { %1961 = vpush %v1874_v7 }
 0xc9f   :  { %s1958_s15 = spop %1957 }
 0xca0   :  { %v1854_v29 = vstv %s1958_s15  ;;  %s1960_s2 = spop %1959 }
 0xca1   :  { %v1855_v12 = vmax.f32 %v1854_v29, 0.0  ;;  %v1863_v26 = vstv %s1960_s2  ;;  %s1962_s16 = spop %1961 }
 0xca2   :  { %v1876_v43 = vstv %s1962_s16 }
 0xca3   :  { %v1877_v45 = vmin.f32 %v1863_v26, %v1876_v43 }
 0xca5   :  { %v1879_v36 = vsub.f32 %v1855_v12, %v1877_v45 }
 0xca7   :  { %v1880_v49 = vadd.f32 0.8, %v1879_v36 }
 0xca9   :  { %v1881_v39 = vmax.f32 %v1880_v49, 0.0 }
 0xcab   :  { %v1882_v54 = vsel %vm1878_vm10, %v1881_v39, 0.0 }
 0xcac   :  { %v1883_v41 = vadd.f32 %v1882_v54, %v3421_v46 }
 0xcae   :  { %v1888_v28 = vmul.f32 0.005, %v1883_v41  ;;  %v1899_v22 = vsel %vm1898_vm5, %v1883_v41, 0.0 }
 0xcaf   :  { %v1900_v38 = vadd.f32 %v1899_v22, %v3227_v1 }
 0xcb0   :  { %v1889_v47 = vadd.f32 %v1888_v28, %v3229_v56 }
 0xcb2   :  { %v1902_v40 = vsel %vm1901_vm0, %v1889_v47, 0.0 }
 0xcb3   :  { %v1903_v30 = vadd.f32 %v1902_v40, %v1900_v38 }
 0xcb5   :  { %1904 = vst [vmem:[%s3471_s6] sm:$0x1] %v1903_v30 }
 0xcb6   :  { %1909 = vsyncpa [#allocation3], 1 }
 0xcb7   :  { %1910 = vsyncpa [#allocation5], 1 }
 0xcb8   :  { %1911 = vsyncpa [#allocation8], 1 }

</bundles_post_ra>
